<compile_context>
chip_gen: v5e
topology: v5e:2x2
jax: 0.10.0
libtpu: 0.0.40
codegen_flags: <defaults>
</compile_context>

<pallas_src>
import math

import jax
import jax.numpy as jnp
from jax.experimental import pallas as pl
from jax.experimental.pallas import tpu as pltpu

# ------------------------- model hyper-parameters (small) -------------------------
B = 2                 # batch
MEL = 16              # mel feature dim
D = 32                # hidden dim
H = 4                 # attention heads
DK = D // H           # per-head dim
LAYERS = 2            # encoder layers
FFN = 64              # feed-forward dim
VOCAB = 40            # ctc output dim
BEAM = 4              # beam size
SUBSAMPLE_RATE = 4
CHUNK = 8             # decoding chunk (after subsampling)
RIGHT_CONTEXT = 6
T_IN = (CHUNK - 1) * SUBSAMPLE_RATE + RIGHT_CONTEXT + 1   # 35
REQUIRED_CACHE = 16
CACHE_T1 = 16

T_Q = CHUNK                     # query length per chunk (post-subsampling)
T_KV = CACHE_T1 + T_Q           # key/value length (cache + chunk)
BT = B * T_Q
T1, F1 = 17, 7                  # spatial dims after conv1 (3x3, stride 2 on 35x16)
F2 = 3                          # freq bins after conv2
K1 = 9                          # conv 3x3 tap count
K1P = 16                        # conv1 contraction padded 9 -> 16
SQRT_D = math.sqrt(D)
LN_EPS = 1e-5
LANES = 128

# ---- weight-slab row offsets: every matrix is a row block, columns start at lane 0,
# ---- padded to 128 lanes; the whole slab is a single HBM->VMEM DMA. ----------------
W1_R = 0                          # conv1 weight        (K1P, D)
W2_R = W1_R + K1P                 # conv2: 9 blocks of (D, D), block k at W2_R + k*D
EW_R = W2_R + K1 * D              # embed: 3 blocks of (D, D), block f at EW_R + f*D
LYR_R = EW_R + F2 * D             # per-layer blocks start
LYR_STRIDE = 3 * D + FFN          # wqkv(D rows) + wo(D) + wff1(D) + wff2(FFN)
QKV_OFF = 0
WO_OFF = D
FF1_OFF = 2 * D
FF2_OFF = 3 * D
CTC_R = LYR_R + LAYERS * LYR_STRIDE
W_ROWS = CTC_R + D                # 752

# ---- vector-slab rows (one (1,128) slot per gamma/beta/bias) -----------------------
V_CONV1B, V_CONV2B, V_EMBEDB, V_AFTG, V_AFTB, V_CTCB = 0, 1, 2, 3, 4, 5
V_LYR = 6
V_N1G, V_N1B, V_BQKV, V_BO, V_N2G, V_N2B, V_BFF1, V_BFF2 = range(8)
V_LYR_STRIDE = 8
V_ROWS = ((V_LYR + LAYERS * V_LYR_STRIDE + 7) // 8) * 8   # 24


def _pick_matmul_dtype():
    # bf16 matmul inputs (f32 accumulation) on v6e / v7x; f32 on v5e & unknown chips.
    try:
        kind = jax.devices()[0].device_kind.lower()
    except Exception:
        return jnp.float32
    return jnp.bfloat16 if ("v6" in kind or "v7" in kind) else jnp.float32


MATMUL_DTYPE = _pick_matmul_dtype()
VMEM = pltpu.MemorySpace.VMEM


def _mm(a, b):
    return jnp.dot(a.astype(MATMUL_DTYPE), b.astype(MATMUL_DTYPE),
                   preferred_element_type=jnp.float32)


def _mm_nt(a, b):  # a @ b.T without materializing the transpose
    return jax.lax.dot_general(a.astype(MATMUL_DTYPE), b.astype(MATMUL_DTYPE),
                               (((1,), (1,)), ((), ())),
                               preferred_element_type=jnp.float32)


def _layernorm(x, g, b):
    mu = jnp.mean(x, axis=-1, keepdims=True)
    var = jnp.mean((x - mu) ** 2, axis=-1, keepdims=True)
    return (x - mu) * jax.lax.rsqrt(var + LN_EPS) * g + b


# ------------------------------- the fused kernel ----------------------------------
def _fused_encoder_kernel(col_ref, pos_ref, bias_ref, cache_ref, w_ref, v_ref,
                          out_ref, rcache_ref):
    # ---- Conv2dSubsampling4 (conv1 + conv2) + embed linear + pos-enc ---------------
    # col_ref holds 27 = 9(conv2 taps) x 3(output freq) contiguous (B*T_Q, 16) blocks
    # of conv1 im2col patches -> everything below is accumulated matmuls on
    # sublane-aligned, lane-offset-0 slices (no lane concats, tiny live ranges).
    w1 = w_ref[W1_R:W1_R + K1P, :D]
    b1 = v_ref[V_CONV1B:V_CONV1B + 1, :D]
    b2 = v_ref[V_CONV2B:V_CONV2B + 1, :D]
    x = None
    for f in range(F2):
        acc = None
        for k in range(K1):
            r0 = (k * F2 + f) * BT
            h1 = jnp.maximum(_mm(col_ref[r0:r0 + BT, :], w1) + b1, 0.0)     # (BT, D)
            t = _mm(h1, w_ref[W2_R + k * D:W2_R + (k + 1) * D, :D])
            acc = t if acc is None else acc + t
        h2f = jnp.maximum(acc + b2, 0.0)                                    # (BT, D)
        t = _mm(h2f, w_ref[EW_R + f * D:EW_R + (f + 1) * D, :D])
        x = t if x is None else x + t
    x = (x + v_ref[V_EMBEDB:V_EMBEDB + 1, :D]) * SQRT_D + pos_ref[...]      # (BT, D)

    scale = 1.0 / math.sqrt(DK)
    bias = bias_ref[...]                             # (B*H*T_Q, T_KV) additive mask

    for l in range(LAYERS):
        lw = LYR_R + l * LYR_STRIDE
        lv = V_LYR + l * V_LYR_STRIDE

        # ------------------------ self-attention (pre-norm) ------------------------
        residual = x
        xn = _layernorm(x, v_ref[lv + V_N1G:lv + V_N1G + 1, :D],
                        v_ref[lv + V_N1B:lv + V_N1B + 1, :D])
        qkv = (_mm(xn, w_ref[lw + QKV_OFF:lw + QKV_OFF + D, :3 * D])
               + v_ref[lv + V_BQKV:lv + V_BQKV + 1, :3 * D])                # (BT, 3D)
        q = qkv[:, :D] * scale
        k = qkv[:, D:2 * D]
        v = qkv[:, 2 * D:3 * D]

        # KV-cache concat (heads stay packed in lanes) + one K store and one V store
        # per layer in the kernel-facing lane-dense cache layout.
        ck = cache_ref[2 * l]                        # (B*CACHE_T1, D) old K
        cv = cache_ref[2 * l + 1]                    # (B*CACHE_T1, D) old V
        k_cats, v_cats, nk, nv = [], [], [], []
        for b0 in range(B):
            k_cat = jnp.concatenate(
                [ck[b0 * CACHE_T1:(b0 + 1) * CACHE_T1, :],
                 k[b0 * T_Q:(b0 + 1) * T_Q, :]], axis=0)                    # (T_KV, D)
            v_cat = jnp.concatenate(
                [cv[b0 * CACHE_T1:(b0 + 1) * CACHE_T1, :],
                 v[b0 * T_Q:(b0 + 1) * T_Q, :]], axis=0)
            k_cats.append(k_cat)
            v_cats.append(v_cat)
            nk.append(k_cat[T_KV - CACHE_T1:, :])    # keep last CACHE_T1 steps
            nv.append(v_cat[T_KV - CACHE_T1:, :])
        rcache_ref[2 * l] = jnp.concatenate(nk, axis=0).astype(rcache_ref.dtype)
        rcache_ref[2 * l + 1] = jnp.concatenate(nv, axis=0).astype(rcache_ref.dtype)

        # scores for all B*H heads stacked along sublanes -> ONE batched softmax
        s_blocks = []
        for b0 in range(B):
            for h in range(H):
                c0 = h * DK
                s_blocks.append(_mm_nt(q[b0 * T_Q:(b0 + 1) * T_Q, c0:c0 + DK],
                                       k_cats[b0][:, c0:c0 + DK]))          # (T_Q, T_KV)
        s_all = jnp.concatenate(s_blocks, axis=0) + bias                    # (B*H*T_Q, T_KV)
        mx = jnp.max(s_all, axis=-1, keepdims=True)
        p = jnp.exp(s_all - mx)                      # masked keys underflow to 0
        den = jnp.sum(p, axis=-1, keepdims=True)     # > 0 -> no NaN even if fully masked
        attn = p * pl.reciprocal(den, approx=True)

        # attention output: per-head Wo fold (no lane concat of head outputs)
        att_blocks = []
        for b0 in range(B):
            o_b = None
            for h in range(H):
                c0 = h * DK
                row = (b0 * H + h) * T_Q
                hv = _mm(attn[row:row + T_Q, :], v_cats[b0][:, c0:c0 + DK])     # (T_Q, DK)
                t = _mm(hv, w_ref[lw + WO_OFF + c0:lw + WO_OFF + c0 + DK, :D])  # (T_Q, D)
                o_b = t if o_b is None else o_b + t
            att_blocks.append(o_b)
        x = (residual + jnp.concatenate(att_blocks, axis=0)
             + v_ref[lv + V_BO:lv + V_BO + 1, :D])

        # ------------------------------ feed-forward -------------------------------
        residual = x
        yn = _layernorm(x, v_ref[lv + V_N2G:lv + V_N2G + 1, :D],
                        v_ref[lv + V_N2B:lv + V_N2B + 1, :D])
        y = jnp.maximum(_mm(yn, w_ref[lw + FF1_OFF:lw + FF1_OFF + D, :FFN])
                        + v_ref[lv + V_BFF1:lv + V_BFF1 + 1, :FFN], 0.0)
        x = (residual + _mm(y, w_ref[lw + FF2_OFF:lw + FF2_OFF + FFN, :D])
             + v_ref[lv + V_BFF2:lv + V_BFF2 + 1, :D])

    # ---- after_norm + CTC linear + log_softmax -> single 128-lane output slab ------
    xo = _layernorm(x, v_ref[V_AFTG:V_AFTG + 1, :D], v_ref[V_AFTB:V_AFTB + 1, :D])
    out_ref[:, :D] = xo.astype(out_ref.dtype)
    logits = _mm(xo, w_ref[CTC_R:CTC_R + D, :VOCAB]) + v_ref[V_CTCB:V_CTCB + 1, :VOCAB]
    mxl = jnp.max(logits, axis=-1, keepdims=True)
    s = logits - mxl
    lse = jnp.log(jnp.sum(jnp.exp(s), axis=-1, keepdims=True))
    out_ref[:, D:D + VOCAB] = (s - lse).astype(out_ref.dtype)


def fused_encoder(col1x, pos2d, bias_all, cache_kf, wslab, vslab):
    return pl.pallas_call(
        _fused_encoder_kernel,
        out_shape=(
            jax.ShapeDtypeStruct((BT, LANES), jnp.float32),                 # [out | ctc]
            jax.ShapeDtypeStruct((2 * LAYERS, B * CACHE_T1, D), jnp.float32),
        ),
        in_specs=[pl.BlockSpec(memory_space=VMEM)] * 6,
        out_specs=(pl.BlockSpec(memory_space=VMEM),
                   pl.BlockSpec(memory_space=VMEM)),
    )(col1x, pos2d, bias_all, cache_kf, wslab, vslab)


# ----------------------------------- XLA glue ---------------------------------------
def im2col(x, k, stride):
    b, Hd, Wd, C = x.shape
    Ho = (Hd - k) // stride + 1
    Wo = (Wd - k) // stride + 1
    cols = []
    for i in range(k):
        for j in range(k):
            cols.append(x[:, i:i + stride * Ho:stride, j:j + stride * Wo:stride, :])
    col = jnp.stack(cols, axis=-1)                    # (b, Ho, Wo, C, k*k)
    return col.reshape(b, Ho, Wo, C * k * k), Ho, Wo


def conv_im2col_expanded(x):
    """Raw-feature conv1 patches pre-gathered into the 27 contiguous (B*T_Q, 16)
    blocks ((conv2 tap k) x (output freq f)) the fused kernel consumes.
    # TODO(synk): this strided patch gather stays XLA glue; doing it in-kernel would
    # need strided sublane slices of an in-VMEM value, which Mosaic has no cheap form of.
    """
    col1, _, _ = im2col(x[..., None], 3, 2)           # (B, T1, F1, 9)
    blocks = []
    for k in range(K1):
        i, j = divmod(k, 3)
        for f in range(F2):
            blk = col1[:, i:i + 2 * T_Q - 1:2, 2 * f + j, :]   # (B, T_Q, 9)
            blocks.append(blk.reshape(BT, K1))
    col = jnp.concatenate(blocks, axis=0)             # (27*B*T_Q, 9)
    return jnp.pad(col, ((0, 0), (0, K1P - K1)))      # pad contraction 9 -> 16


def position_encoding(offset, size, d_model, dtype):
    # WeNet PositionalEncoding.position_encoding with tensor offset (negative -> 0).
    pos = offset[:, None] + jnp.arange(size)          # (B, size)
    pos = jnp.where(pos > 0, pos, 0).astype(jnp.float32)[:, :, None]
    div = jnp.exp(jnp.arange(0, d_model, 2, dtype=jnp.float32)
                  * -(math.log(10000.0) / d_model))
    sin = jnp.sin(pos * div)
    cos = jnp.cos(pos * div)
    pe = jnp.stack([sin, cos], axis=-1).reshape(offset.shape[0], size, d_model)
    return pe.astype(dtype)


def make_params(key):
    def nrm(k, shape, scale=0.1):
        return scale * jax.random.normal(k, shape, dtype=jnp.float32)

    keys = jax.random.split(key, 64)
    ki = iter(keys)
    p = {
        "cmvn_mean": nrm(next(ki), (1, MEL)),
        "cmvn_istd": jnp.abs(nrm(next(ki), (1, MEL))) + 1.0,
        # conv weights stored pre-reshaped for im2col matmul:
        # torch Conv2d weight (out,in,3,3).reshape(out,-1).T  ->  (in*9, out)
        "conv1_w2d": nrm(next(ki), (1 * K1, D)),
        "conv1_b": nrm(next(ki), (1, D)),
        "conv2_w2d": nrm(next(ki), (D * K1, D)),
        "conv2_b": nrm(next(ki), (1, D)),
        "embed_out_w": nrm(next(ki), (D * F2, D)),
        "embed_out_b": nrm(next(ki), (1, D)),
        "after_norm_g": jnp.ones((1, D), jnp.float32),
        "after_norm_b": jnp.zeros((1, D), jnp.float32),
        "ctc_w": nrm(next(ki), (D, VOCAB)),
        "ctc_b": nrm(next(ki), (1, VOCAB)),
        "layers": [],
    }
    for _ in range(LAYERS):
        lp = {
            "norm1_g": jnp.ones((1, D), jnp.float32),
            "norm1_b": jnp.zeros((1, D), jnp.float32),
            "norm2_g": jnp.ones((1, D), jnp.float32),
            "norm2_b": jnp.zeros((1, D), jnp.float32),
            "wq": nrm(next(ki), (D, D)), "bq": nrm(next(ki), (1, D)),
            "wk": nrm(next(ki), (D, D)), "bk": nrm(next(ki), (1, D)),
            "wv": nrm(next(ki), (D, D)), "bv": nrm(next(ki), (1, D)),
            "wo": nrm(next(ki), (D, D)), "bo": nrm(next(ki), (1, D)),
            "w_ff1": nrm(next(ki), (D, FFN)), "b_ff1": nrm(next(ki), (1, FFN)),
            "w_ff2": nrm(next(ki), (FFN, D)), "b_ff2": nrm(next(ki), (1, D)),
        }
        p["layers"].append(lp)
    return p


def pack_params(p):
    """One-time repack of torch-layout weights into two packed slabs (one DMA each):
    a (W_ROWS,128) weight-matrix slab and a (V_ROWS,128) gamma/beta/bias slab."""
    def pad_lanes(w):
        return jnp.pad(w, ((0, 0), (0, LANES - w.shape[1])))

    wrows = [
        pad_lanes(jnp.pad(p["conv1_w2d"], ((0, K1P - K1), (0, 0)))),
        # conv2 rows (c*9+k, out) -> per-tap blocks (k, c, out)
        pad_lanes(p["conv2_w2d"].reshape(D, K1, D).transpose(1, 0, 2).reshape(K1 * D, D)),
        # embed rows (c*F2+f, out) -> per-freq blocks (f, c, out)
        pad_lanes(p["embed_out_w"].reshape(D, F2, D).transpose(1, 0, 2).reshape(F2 * D, D)),
    ]
    for lp in p["layers"]:
        wrows.append(pad_lanes(jnp.concatenate([lp["wq"], lp["wk"], lp["wv"]], axis=1)))
        wrows.append(pad_lanes(lp["wo"]))
        wrows.append(pad_lanes(lp["w_ff1"]))
        wrows.append(pad_lanes(lp["w_ff2"]))
    wrows.append(pad_lanes(p["ctc_w"]))
    wslab = jnp.concatenate(wrows, axis=0)
    assert wslab.shape == (W_ROWS, LANES)

    vrows = [pad_lanes(p["conv1_b"]), pad_lanes(p["conv2_b"]), pad_lanes(p["embed_out_b"]),
             pad_lanes(p["after_norm_g"]), pad_lanes(p["after_norm_b"]), pad_lanes(p["ctc_b"])]
    for lp in p["layers"]:
        vrows += [pad_lanes(lp["norm1_g"]), pad_lanes(lp["norm1_b"]),
                  pad_lanes(jnp.concatenate([lp["bq"], lp["bk"], lp["bv"]], axis=1)),
                  pad_lanes(lp["bo"]), pad_lanes(lp["norm2_g"]), pad_lanes(lp["norm2_b"]),
                  pad_lanes(lp["b_ff1"]), pad_lanes(lp["b_ff2"])]
    vrows.append(jnp.zeros((V_ROWS - len(vrows), LANES), jnp.float32))
    vslab = jnp.concatenate(vrows, axis=0)
    assert vslab.shape == (V_ROWS, LANES)

    return {"cmvn_mean": p["cmvn_mean"], "cmvn_istd": p["cmvn_istd"],
            "wslab": wslab, "vslab": vslab}


# --- att-cache layout converters: used ONCE at the exported-model API boundary; the
# --- cache stays in the kernel-facing layout across decoding steps (perf item 7). ---
def cache_to_kernel_layout(att_cache_ext):
    # (B, L, H, CACHE_T1, 2*DK) -> (2*L, B*CACHE_T1, D); row-block order [layer][K,V]
    k = jnp.transpose(att_cache_ext[..., :DK], (1, 0, 3, 2, 4)
                      ).reshape(LAYERS, 1, B * CACHE_T1, D)
    v = jnp.transpose(att_cache_ext[..., DK:], (1, 0, 3, 2, 4)
                      ).reshape(LAYERS, 1, B * CACHE_T1, D)
    return jnp.concatenate([k, v], axis=1).reshape(2 * LAYERS, B * CACHE_T1, D)


def cache_from_kernel_layout(cache_kf):
    kv = cache_kf.reshape(LAYERS, 2, B, CACHE_T1, H, DK)
    out = jnp.concatenate([kv[:, 0], kv[:, 1]], axis=-1)     # (L, B, T, H, 2*DK)
    return jnp.transpose(out, (1, 0, 3, 2, 4))               # (B, L, H, T, 2*DK)


@jax.jit
def streaming_encoder_forward(pk, chunk_xs, chunk_lens, offset,
                              att_cache, cnn_cache, cache_mask):
    del cnn_cache                       # transformer variant: no conformer cnn cache
    t_in = chunk_xs.shape[1]
    off = offset[:, 0]

    # ~make_pad_mask(chunk_lens, T).unsqueeze(1) -> float, then subsample; additive bias
    chunk_mask = (jnp.arange(t_in)[None, :] < chunk_lens[:, None]
                  ).astype(jnp.float32)[:, None, :]
    chunk_mask_sub = chunk_mask[:, :, 2::2][:, :, 2::2]              # (B, 1, T_Q)
    masks = jnp.concatenate([cache_mask, chunk_mask_sub], axis=2)    # (B, 1, T_KV)
    mask_bias = (masks[:, 0, :] - 1.0) * 1e30                        # 0 valid / -1e30 masked
    bias_all = jnp.broadcast_to(mask_bias[:, None, :], (B, H * T_Q, T_KV)
                                ).reshape(B * H * T_Q, T_KV)

    # global CMVN + conv patch gather (XLA glue); everything else is one pallas_call
    x = (chunk_xs - pk["cmvn_mean"]) * pk["cmvn_istd"]
    col1x = conv_im2col_expanded(x)                                  # (27*B*T_Q, 16)
    pos2d = position_encoding(off, T_Q, D, jnp.float32).reshape(BT, D)

    outslab, r_att_cache = fused_encoder(col1x, pos2d, bias_all, att_cache,
                                         pk["wslab"], pk["vslab"])

    chunk_out = outslab[:, :D].reshape(B, T_Q, D)
    log_ctc_probs = outslab[:, D:D + VOCAB].reshape(B, T_Q, VOCAB)
    # TODO(synk): top-k has no clean Pallas TPU equivalent; computed with jax.lax.top_k
    log_probs, log_probs_idx = jax.lax.top_k(log_ctc_probs, BEAM)
    log_probs = log_probs.astype(chunk_xs.dtype)

    r_cache_mask = masks[:, :, -REQUIRED_CACHE:]
    r_offset = (off + T_Q)[:, None]
    chunk_out_lens = chunk_lens // SUBSAMPLE_RATE
    r_cnn_cache = ()   # transformer variant -> conformer cnn cache not produced

    return (log_probs, log_probs_idx, chunk_out, chunk_out_lens,
            r_offset, r_att_cache, r_cnn_cache, r_cache_mask)


# -------------------------------------- main ----------------------------------------
if __name__ == "__main__":
    key = jax.random.PRNGKey(0)
    kp, kx, kc = jax.random.split(key, 3)
    params = make_params(kp)
    packed = pack_params(params)

    chunk_xs = jax.random.normal(kx, (B, T_IN, MEL), dtype=jnp.float32)
    chunk_lens = jnp.array([T_IN, 28], dtype=jnp.int32)
    offset = jnp.array([[16], [8]], dtype=jnp.int32)
    att_cache_ext = 0.1 * jax.random.normal(kc, (B, LAYERS, H, CACHE_T1, 2 * DK),
                                            dtype=jnp.float32)
    # boundary conversion done once; the cache stays in kernel layout across chunks
    att_cache = cache_to_kernel_layout(att_cache_ext)
    cnn_cache = jnp.zeros((B, LAYERS, D, 1), dtype=jnp.float32)   # unused (transformer)
    cache_mask = jnp.stack([
        jnp.ones((1, REQUIRED_CACHE), jnp.float32),
        jnp.concatenate([jnp.zeros((1, 8), jnp.float32),
                         jnp.ones((1, 8), jnp.float32)], axis=1),
    ], axis=0)                                                    # (B, 1, REQUIRED_CACHE)

    outs = streaming_encoder_forward(packed, chunk_xs, chunk_lens, offset,
                                     att_cache, cnn_cache, cache_mask)
    (log_probs, log_probs_idx, chunk_out, chunk_out_lens,
     r_offset, r_att_cache, r_cnn_cache, r_cache_mask) = outs

    jax.block_until_ready((log_probs, log_probs_idx, chunk_out, chunk_out_lens,
                           r_offset, r_att_cache, r_cache_mask))

    assert log_probs.shape == (B, CHUNK, BEAM)
    assert log_probs_idx.shape == (B, CHUNK, BEAM)
    assert chunk_out.shape == (B, CHUNK, D)
    assert r_att_cache.shape == att_cache.shape
    assert cache_from_kernel_layout(r_att_cache).shape == att_cache_ext.shape
    assert r_cache_mask.shape == cache_mask.shape
    assert bool(jnp.all(jnp.isfinite(log_probs)))
    assert bool(jnp.all(jnp.isfinite(chunk_out)))
    print("KERNEL_OK")
</pallas_src>

<mosaic_0001>
module attributes {stable_mosaic.version = 11 : i64} {
  func.func @_fused_encoder_kernel(%arg0: memref<432x16xf32, #tpu.memory_space<vmem>>, %arg1: memref<16x32xf32, #tpu.memory_space<vmem>>, %arg2: memref<64x24xf32, #tpu.memory_space<vmem>>, %arg3: memref<4x32x32xf32, #tpu.memory_space<vmem>>, %arg4: memref<752x128xf32, #tpu.memory_space<vmem>>, %arg5: memref<24x128xf32, #tpu.memory_space<vmem>>, %arg6: memref<16x128xf32, #tpu.memory_space<vmem>>, %arg7: memref<4x32x32xf32, #tpu.memory_space<vmem>>) attributes {dimension_semantics = [], scalar_prefetch = 0 : i64, scratch_operands = 0 : i64, tpu.core_type = #tpu.core_type<tc>} {
    %c0 = arith.constant 0 : index
    %c0_0 = arith.constant 0 : index
    %0 = vector.load %arg4[%c0, %c0_0] : memref<752x128xf32, #tpu.memory_space<vmem>>, vector<16x32xf32>
    %c0_1 = arith.constant 0 : index
    %c0_2 = arith.constant 0 : index
    %1 = vector.load %arg5[%c0_1, %c0_2] : memref<24x128xf32, #tpu.memory_space<vmem>>, vector<1x32xf32>
    %c1 = arith.constant 1 : index
    %c0_3 = arith.constant 0 : index
    %2 = vector.load %arg5[%c1, %c0_3] : memref<24x128xf32, #tpu.memory_space<vmem>>, vector<1x32xf32>
    %c0_4 = arith.constant 0 : index
    %c0_5 = arith.constant 0 : index
    %3 = vector.load %arg0[%c0_4, %c0_5] : memref<432x16xf32, #tpu.memory_space<vmem>>, vector<16x16xf32>
    %cst = arith.constant dense<0.000000e+00> : vector<16x32xf32>
    %4 = tpu.matmul %3, %0, %cst {dimension_numbers = #tpu.dot_dimension_numbers<[1], [0], [0], [1], [0, 0, 1, 1], [], []>} : vector<16x16xf32>, vector<16x32xf32>, vector<16x32xf32> -> vector<16x32xf32>
    %5 = vector.broadcast %1 : vector<1x32xf32> to vector<16x32xf32>
    %6 = arith.addf %4, %5 : vector<16x32xf32>
    %cst_6 = arith.constant 0.000000e+00 : f32
    %7 = vector.broadcast %cst_6 : f32 to vector<16x32xf32>
    %8 = arith.maximumf %6, %7 : vector<16x32xf32>
    %c16 = arith.constant 16 : index
    %c0_7 = arith.constant 0 : index
    %9 = vector.load %arg4[%c16, %c0_7] : memref<752x128xf32, #tpu.memory_space<vmem>>, vector<32x32xf32>
    %cst_8 = arith.constant dense<0.000000e+00> : vector<16x32xf32>
    %10 = tpu.matmul %8, %9, %cst_8 {dimension_numbers = #tpu.dot_dimension_numbers<[1], [0], [0], [1], [0, 0, 1, 1], [], []>} : vector<16x32xf32>, vector<32x32xf32>, vector<16x32xf32> -> vector<16x32xf32>
    %c48 = arith.constant 48 : index
    %c0_9 = arith.constant 0 : index
    %11 = vector.load %arg0[%c48, %c0_9] : memref<432x16xf32, #tpu.memory_space<vmem>>, vector<16x16xf32>
    %cst_10 = arith.constant dense<0.000000e+00> : vector<16x32xf32>
    %12 = tpu.matmul %11, %0, %cst_10 {dimension_numbers = #tpu.dot_dimension_numbers<[1], [0], [0], [1], [0, 0, 1, 1], [], []>} : vector<16x16xf32>, vector<16x32xf32>, vector<16x32xf32> -> vector<16x32xf32>
    %13 = vector.broadcast %1 : vector<1x32xf32> to vector<16x32xf32>
    %14 = arith.addf %12, %13 : vector<16x32xf32>
    %cst_11 = arith.constant 0.000000e+00 : f32
    %15 = vector.broadcast %cst_11 : f32 to vector<16x32xf32>
    %16 = arith.maximumf %14, %15 : vector<16x32xf32>
    %c48_12 = arith.constant 48 : index
    %c0_13 = arith.constant 0 : index
    %17 = vector.load %arg4[%c48_12, %c0_13] : memref<752x128xf32, #tpu.memory_space<vmem>>, vector<32x32xf32>
    %cst_14 = arith.constant dense<0.000000e+00> : vector<16x32xf32>
    %18 = tpu.matmul %16, %17, %cst_14 {dimension_numbers = #tpu.dot_dimension_numbers<[1], [0], [0], [1], [0, 0, 1, 1], [], []>} : vector<16x32xf32>, vector<32x32xf32>, vector<16x32xf32> -> vector<16x32xf32>
    %19 = arith.addf %10, %18 : vector<16x32xf32>
    %c96 = arith.constant 96 : index
    %c0_15 = arith.constant 0 : index
    %20 = vector.load %arg0[%c96, %c0_15] : memref<432x16xf32, #tpu.memory_space<vmem>>, vector<16x16xf32>
    %cst_16 = arith.constant dense<0.000000e+00> : vector<16x32xf32>
    %21 = tpu.matmul %20, %0, %cst_16 {dimension_numbers = #tpu.dot_dimension_numbers<[1], [0], [0], [1], [0, 0, 1, 1], [], []>} : vector<16x16xf32>, vector<16x32xf32>, vector<16x32xf32> -> vector<16x32xf32>
    %22 = vector.broadcast %1 : vector<1x32xf32> to vector<16x32xf32>
    %23 = arith.addf %21, %22 : vector<16x32xf32>
    %cst_17 = arith.constant 0.000000e+00 : f32
    %24 = vector.broadcast %cst_17 : f32 to vector<16x32xf32>
    %25 = arith.maximumf %23, %24 : vector<16x32xf32>
    %c80 = arith.constant 80 : index
    %c0_18 = arith.constant 0 : index
    %26 = vector.load %arg4[%c80, %c0_18] : memref<752x128xf32, #tpu.memory_space<vmem>>, vector<32x32xf32>
    %cst_19 = arith.constant dense<0.000000e+00> : vector<16x32xf32>
    %27 = tpu.matmul %25, %26, %cst_19 {dimension_numbers = #tpu.dot_dimension_numbers<[1], [0], [0], [1], [0, 0, 1, 1], [], []>} : vector<16x32xf32>, vector<32x32xf32>, vector<16x32xf32> -> vector<16x32xf32>
    %28 = arith.addf %19, %27 : vector<16x32xf32>
    %c144 = arith.constant 144 : index
    %c0_20 = arith.constant 0 : index
    %29 = vector.load %arg0[%c144, %c0_20] : memref<432x16xf32, #tpu.memory_space<vmem>>, vector<16x16xf32>
    %cst_21 = arith.constant dense<0.000000e+00> : vector<16x32xf32>
    %30 = tpu.matmul %29, %0, %cst_21 {dimension_numbers = #tpu.dot_dimension_numbers<[1], [0], [0], [1], [0, 0, 1, 1], [], []>} : vector<16x16xf32>, vector<16x32xf32>, vector<16x32xf32> -> vector<16x32xf32>
    %31 = vector.broadcast %1 : vector<1x32xf32> to vector<16x32xf32>
    %32 = arith.addf %30, %31 : vector<16x32xf32>
    %cst_22 = arith.constant 0.000000e+00 : f32
    %33 = vector.broadcast %cst_22 : f32 to vector<16x32xf32>
    %34 = arith.maximumf %32, %33 : vector<16x32xf32>
    %c112 = arith.constant 112 : index
    %c0_23 = arith.constant 0 : index
    %35 = vector.load %arg4[%c112, %c0_23] : memref<752x128xf32, #tpu.memory_space<vmem>>, vector<32x32xf32>
    %cst_24 = arith.constant dense<0.000000e+00> : vector<16x32xf32>
    %36 = tpu.matmul %34, %35, %cst_24 {dimension_numbers = #tpu.dot_dimension_numbers<[1], [0], [0], [1], [0, 0, 1, 1], [], []>} : vector<16x32xf32>, vector<32x32xf32>, vector<16x32xf32> -> vector<16x32xf32>
    %37 = arith.addf %28, %36 : vector<16x32xf32>
    %c192 = arith.constant 192 : index
    %c0_25 = arith.constant 0 : index
    %38 = vector.load %arg0[%c192, %c0_25] : memref<432x16xf32, #tpu.memory_space<vmem>>, vector<16x16xf32>
    %cst_26 = arith.constant dense<0.000000e+00> : vector<16x32xf32>
    %39 = tpu.matmul %38, %0, %cst_26 {dimension_numbers = #tpu.dot_dimension_numbers<[1], [0], [0], [1], [0, 0, 1, 1], [], []>} : vector<16x16xf32>, vector<16x32xf32>, vector<16x32xf32> -> vector<16x32xf32>
    %40 = vector.broadcast %1 : vector<1x32xf32> to vector<16x32xf32>
    %41 = arith.addf %39, %40 : vector<16x32xf32>
    %cst_27 = arith.constant 0.000000e+00 : f32
    %42 = vector.broadcast %cst_27 : f32 to vector<16x32xf32>
    %43 = arith.maximumf %41, %42 : vector<16x32xf32>
    %c144_28 = arith.constant 144 : index
    %c0_29 = arith.constant 0 : index
    %44 = vector.load %arg4[%c144_28, %c0_29] : memref<752x128xf32, #tpu.memory_space<vmem>>, vector<32x32xf32>
    %cst_30 = arith.constant dense<0.000000e+00> : vector<16x32xf32>
    %45 = tpu.matmul %43, %44, %cst_30 {dimension_numbers = #tpu.dot_dimension_numbers<[1], [0], [0], [1], [0, 0, 1, 1], [], []>} : vector<16x32xf32>, vector<32x32xf32>, vector<16x32xf32> -> vector<16x32xf32>
    %46 = arith.addf %37, %45 : vector<16x32xf32>
    %c240 = arith.constant 240 : index
    %c0_31 = arith.constant 0 : index
    %47 = vector.load %arg0[%c240, %c0_31] : memref<432x16xf32, #tpu.memory_space<vmem>>, vector<16x16xf32>
    %cst_32 = arith.constant dense<0.000000e+00> : vector<16x32xf32>
    %48 = tpu.matmul %47, %0, %cst_32 {dimension_numbers = #tpu.dot_dimension_numbers<[1], [0], [0], [1], [0, 0, 1, 1], [], []>} : vector<16x16xf32>, vector<16x32xf32>, vector<16x32xf32> -> vector<16x32xf32>
    %49 = vector.broadcast %1 : vector<1x32xf32> to vector<16x32xf32>
    %50 = arith.addf %48, %49 : vector<16x32xf32>
    %cst_33 = arith.constant 0.000000e+00 : f32
    %51 = vector.broadcast %cst_33 : f32 to vector<16x32xf32>
    %52 = arith.maximumf %50, %51 : vector<16x32xf32>
    %c176 = arith.constant 176 : index
    %c0_34 = arith.constant 0 : index
    %53 = vector.load %arg4[%c176, %c0_34] : memref<752x128xf32, #tpu.memory_space<vmem>>, vector<32x32xf32>
    %cst_35 = arith.constant dense<0.000000e+00> : vector<16x32xf32>
    %54 = tpu.matmul %52, %53, %cst_35 {dimension_numbers = #tpu.dot_dimension_numbers<[1], [0], [0], [1], [0, 0, 1, 1], [], []>} : vector<16x32xf32>, vector<32x32xf32>, vector<16x32xf32> -> vector<16x32xf32>
    %55 = arith.addf %46, %54 : vector<16x32xf32>
    %c288 = arith.constant 288 : index
    %c0_36 = arith.constant 0 : index
    %56 = vector.load %arg0[%c288, %c0_36] : memref<432x16xf32, #tpu.memory_space<vmem>>, vector<16x16xf32>
    %cst_37 = arith.constant dense<0.000000e+00> : vector<16x32xf32>
    %57 = tpu.matmul %56, %0, %cst_37 {dimension_numbers = #tpu.dot_dimension_numbers<[1], [0], [0], [1], [0, 0, 1, 1], [], []>} : vector<16x16xf32>, vector<16x32xf32>, vector<16x32xf32> -> vector<16x32xf32>
    %58 = vector.broadcast %1 : vector<1x32xf32> to vector<16x32xf32>
    %59 = arith.addf %57, %58 : vector<16x32xf32>
    %cst_38 = arith.constant 0.000000e+00 : f32
    %60 = vector.broadcast %cst_38 : f32 to vector<16x32xf32>
    %61 = arith.maximumf %59, %60 : vector<16x32xf32>
    %c208 = arith.constant 208 : index
    %c0_39 = arith.constant 0 : index
    %62 = vector.load %arg4[%c208, %c0_39] : memref<752x128xf32, #tpu.memory_space<vmem>>, vector<32x32xf32>
    %cst_40 = arith.constant dense<0.000000e+00> : vector<16x32xf32>
    %63 = tpu.matmul %61, %62, %cst_40 {dimension_numbers = #tpu.dot_dimension_numbers<[1], [0], [0], [1], [0, 0, 1, 1], [], []>} : vector<16x32xf32>, vector<32x32xf32>, vector<16x32xf32> -> vector<16x32xf32>
    %64 = arith.addf %55, %63 : vector<16x32xf32>
    %c336 = arith.constant 336 : index
    %c0_41 = arith.constant 0 : index
    %65 = vector.load %arg0[%c336, %c0_41] : memref<432x16xf32, #tpu.memory_space<vmem>>, vector<16x16xf32>
    %cst_42 = arith.constant dense<0.000000e+00> : vector<16x32xf32>
    %66 = tpu.matmul %65, %0, %cst_42 {dimension_numbers = #tpu.dot_dimension_numbers<[1], [0], [0], [1], [0, 0, 1, 1], [], []>} : vector<16x16xf32>, vector<16x32xf32>, vector<16x32xf32> -> vector<16x32xf32>
    %67 = vector.broadcast %1 : vector<1x32xf32> to vector<16x32xf32>
    %68 = arith.addf %66, %67 : vector<16x32xf32>
    %cst_43 = arith.constant 0.000000e+00 : f32
    %69 = vector.broadcast %cst_43 : f32 to vector<16x32xf32>
    %70 = arith.maximumf %68, %69 : vector<16x32xf32>
    %c240_44 = arith.constant 240 : index
    %c0_45 = arith.constant 0 : index
    %71 = vector.load %arg4[%c240_44, %c0_45] : memref<752x128xf32, #tpu.memory_space<vmem>>, vector<32x32xf32>
    %cst_46 = arith.constant dense<0.000000e+00> : vector<16x32xf32>
    %72 = tpu.matmul %70, %71, %cst_46 {dimension_numbers = #tpu.dot_dimension_numbers<[1], [0], [0], [1], [0, 0, 1, 1], [], []>} : vector<16x32xf32>, vector<32x32xf32>, vector<16x32xf32> -> vector<16x32xf32>
    %73 = arith.addf %64, %72 : vector<16x32xf32>
    %c384 = arith.constant 384 : index
    %c0_47 = arith.constant 0 : index
    %74 = vector.load %arg0[%c384, %c0_47] : memref<432x16xf32, #tpu.memory_space<vmem>>, vector<16x16xf32>
    %cst_48 = arith.constant dense<0.000000e+00> : vector<16x32xf32>
    %75 = tpu.matmul %74, %0, %cst_48 {dimension_numbers = #tpu.dot_dimension_numbers<[1], [0], [0], [1], [0, 0, 1, 1], [], []>} : vector<16x16xf32>, vector<16x32xf32>, vector<16x32xf32> -> vector<16x32xf32>
    %76 = vector.broadcast %1 : vector<1x32xf32> to vector<16x32xf32>
    %77 = arith.addf %75, %76 : vector<16x32xf32>
    %cst_49 = arith.constant 0.000000e+00 : f32
    %78 = vector.broadcast %cst_49 : f32 to vector<16x32xf32>
    %79 = arith.maximumf %77, %78 : vector<16x32xf32>
    %c272 = arith.constant 272 : index
    %c0_50 = arith.constant 0 : index
    %80 = vector.load %arg4[%c272, %c0_50] : memref<752x128xf32, #tpu.memory_space<vmem>>, vector<32x32xf32>
    %cst_51 = arith.constant dense<0.000000e+00> : vector<16x32xf32>
    %81 = tpu.matmul %79, %80, %cst_51 {dimension_numbers = #tpu.dot_dimension_numbers<[1], [0], [0], [1], [0, 0, 1, 1], [], []>} : vector<16x32xf32>, vector<32x32xf32>, vector<16x32xf32> -> vector<16x32xf32>
    %82 = arith.addf %73, %81 : vector<16x32xf32>
    %83 = vector.broadcast %2 : vector<1x32xf32> to vector<16x32xf32>
    %84 = arith.addf %82, %83 : vector<16x32xf32>
    %cst_52 = arith.constant 0.000000e+00 : f32
    %85 = vector.broadcast %cst_52 : f32 to vector<16x32xf32>
    %86 = arith.maximumf %84, %85 : vector<16x32xf32>
    %c304 = arith.constant 304 : index
    %c0_53 = arith.constant 0 : index
    %87 = vector.load %arg4[%c304, %c0_53] : memref<752x128xf32, #tpu.memory_space<vmem>>, vector<32x32xf32>
    %cst_54 = arith.constant dense<0.000000e+00> : vector<16x32xf32>
    %88 = tpu.matmul %86, %87, %cst_54 {dimension_numbers = #tpu.dot_dimension_numbers<[1], [0], [0], [1], [0, 0, 1, 1], [], []>} : vector<16x32xf32>, vector<32x32xf32>, vector<16x32xf32> -> vector<16x32xf32>
    %c16_55 = arith.constant 16 : index
    %c0_56 = arith.constant 0 : index
    %89 = vector.load %arg0[%c16_55, %c0_56] : memref<432x16xf32, #tpu.memory_space<vmem>>, vector<16x16xf32>
    %cst_57 = arith.constant dense<0.000000e+00> : vector<16x32xf32>
    %90 = tpu.matmul %89, %0, %cst_57 {dimension_numbers = #tpu.dot_dimension_numbers<[1], [0], [0], [1], [0, 0, 1, 1], [], []>} : vector<16x16xf32>, vector<16x32xf32>, vector<16x32xf32> -> vector<16x32xf32>
    %91 = vector.broadcast %1 : vector<1x32xf32> to vector<16x32xf32>
    %92 = arith.addf %90, %91 : vector<16x32xf32>
    %cst_58 = arith.constant 0.000000e+00 : f32
    %93 = vector.broadcast %cst_58 : f32 to vector<16x32xf32>
    %94 = arith.maximumf %92, %93 : vector<16x32xf32>
    %c16_59 = arith.constant 16 : index
    %c0_60 = arith.constant 0 : index
    %95 = vector.load %arg4[%c16_59, %c0_60] : memref<752x128xf32, #tpu.memory_space<vmem>>, vector<32x32xf32>
    %cst_61 = arith.constant dense<0.000000e+00> : vector<16x32xf32>
    %96 = tpu.matmul %94, %95, %cst_61 {dimension_numbers = #tpu.dot_dimension_numbers<[1], [0], [0], [1], [0, 0, 1, 1], [], []>} : vector<16x32xf32>, vector<32x32xf32>, vector<16x32xf32> -> vector<16x32xf32>
    %c64 = arith.constant 64 : index
    %c0_62 = arith.constant 0 : index
    %97 = vector.load %arg0[%c64, %c0_62] : memref<432x16xf32, #tpu.memory_space<vmem>>, vector<16x16xf32>
    %cst_63 = arith.constant dense<0.000000e+00> : vector<16x32xf32>
    %98 = tpu.matmul %97, %0, %cst_63 {dimension_numbers = #tpu.dot_dimension_numbers<[1], [0], [0], [1], [0, 0, 1, 1], [], []>} : vector<16x16xf32>, vector<16x32xf32>, vector<16x32xf32> -> vector<16x32xf32>
    %99 = vector.broadcast %1 : vector<1x32xf32> to vector<16x32xf32>
    %100 = arith.addf %98, %99 : vector<16x32xf32>
    %cst_64 = arith.constant 0.000000e+00 : f32
    %101 = vector.broadcast %cst_64 : f32 to vector<16x32xf32>
    %102 = arith.maximumf %100, %101 : vector<16x32xf32>
    %c48_65 = arith.constant 48 : index
    %c0_66 = arith.constant 0 : index
    %103 = vector.load %arg4[%c48_65, %c0_66] : memref<752x128xf32, #tpu.memory_space<vmem>>, vector<32x32xf32>
    %cst_67 = arith.constant dense<0.000000e+00> : vector<16x32xf32>
    %104 = tpu.matmul %102, %103, %cst_67 {dimension_numbers = #tpu.dot_dimension_numbers<[1], [0], [0], [1], [0, 0, 1, 1], [], []>} : vector<16x32xf32>, vector<32x32xf32>, vector<16x32xf32> -> vector<16x32xf32>
    %105 = arith.addf %96, %104 : vector<16x32xf32>
    %c112_68 = arith.constant 112 : index
    %c0_69 = arith.constant 0 : index
    %106 = vector.load %arg0[%c112_68, %c0_69] : memref<432x16xf32, #tpu.memory_space<vmem>>, vector<16x16xf32>
    %cst_70 = arith.constant dense<0.000000e+00> : vector<16x32xf32>
    %107 = tpu.matmul %106, %0, %cst_70 {dimension_numbers = #tpu.dot_dimension_numbers<[1], [0], [0], [1], [0, 0, 1, 1], [], []>} : vector<16x16xf32>, vector<16x32xf32>, vector<16x32xf32> -> vector<16x32xf32>
    %108 = vector.broadcast %1 : vector<1x32xf32> to vector<16x32xf32>
    %109 = arith.addf %107, %108 : vector<16x32xf32>
    %cst_71 = arith.constant 0.000000e+00 : f32
    %110 = vector.broadcast %cst_71 : f32 to vector<16x32xf32>
    %111 = arith.maximumf %109, %110 : vector<16x32xf32>
    %c80_72 = arith.constant 80 : index
    %c0_73 = arith.constant 0 : index
    %112 = vector.load %arg4[%c80_72, %c0_73] : memref<752x128xf32, #tpu.memory_space<vmem>>, vector<32x32xf32>
    %cst_74 = arith.constant dense<0.000000e+00> : vector<16x32xf32>
    %113 = tpu.matmul %111, %112, %cst_74 {dimension_numbers = #tpu.dot_dimension_numbers<[1], [0], [0], [1], [0, 0, 1, 1], [], []>} : vector<16x32xf32>, vector<32x32xf32>, vector<16x32xf32> -> vector<16x32xf32>
    %114 = arith.addf %105, %113 : vector<16x32xf32>
    %c160 = arith.constant 160 : index
    %c0_75 = arith.constant 0 : index
    %115 = vector.load %arg0[%c160, %c0_75] : memref<432x16xf32, #tpu.memory_space<vmem>>, vector<16x16xf32>
    %cst_76 = arith.constant dense<0.000000e+00> : vector<16x32xf32>
    %116 = tpu.matmul %115, %0, %cst_76 {dimension_numbers = #tpu.dot_dimension_numbers<[1], [0], [0], [1], [0, 0, 1, 1], [], []>} : vector<16x16xf32>, vector<16x32xf32>, vector<16x32xf32> -> vector<16x32xf32>
    %117 = vector.broadcast %1 : vector<1x32xf32> to vector<16x32xf32>
    %118 = arith.addf %116, %117 : vector<16x32xf32>
    %cst_77 = arith.constant 0.000000e+00 : f32
    %119 = vector.broadcast %cst_77 : f32 to vector<16x32xf32>
    %120 = arith.maximumf %118, %119 : vector<16x32xf32>
    %c112_78 = arith.constant 112 : index
    %c0_79 = arith.constant 0 : index
    %121 = vector.load %arg4[%c112_78, %c0_79] : memref<752x128xf32, #tpu.memory_space<vmem>>, vector<32x32xf32>
    %cst_80 = arith.constant dense<0.000000e+00> : vector<16x32xf32>
    %122 = tpu.matmul %120, %121, %cst_80 {dimension_numbers = #tpu.dot_dimension_numbers<[1], [0], [0], [1], [0, 0, 1, 1], [], []>} : vector<16x32xf32>, vector<32x32xf32>, vector<16x32xf32> -> vector<16x32xf32>
    %123 = arith.addf %114, %122 : vector<16x32xf32>
    %c208_81 = arith.constant 208 : index
    %c0_82 = arith.constant 0 : index
    %124 = vector.load %arg0[%c208_81, %c0_82] : memref<432x16xf32, #tpu.memory_space<vmem>>, vector<16x16xf32>
    %cst_83 = arith.constant dense<0.000000e+00> : vector<16x32xf32>
    %125 = tpu.matmul %124, %0, %cst_83 {dimension_numbers = #tpu.dot_dimension_numbers<[1], [0], [0], [1], [0, 0, 1, 1], [], []>} : vector<16x16xf32>, vector<16x32xf32>, vector<16x32xf32> -> vector<16x32xf32>
    %126 = vector.broadcast %1 : vector<1x32xf32> to vector<16x32xf32>
    %127 = arith.addf %125, %126 : vector<16x32xf32>
    %cst_84 = arith.constant 0.000000e+00 : f32
    %128 = vector.broadcast %cst_84 : f32 to vector<16x32xf32>
    %129 = arith.maximumf %127, %128 : vector<16x32xf32>
    %c144_85 = arith.constant 144 : index
    %c0_86 = arith.constant 0 : index
    %130 = vector.load %arg4[%c144_85, %c0_86] : memref<752x128xf32, #tpu.memory_space<vmem>>, vector<32x32xf32>
    %cst_87 = arith.constant dense<0.000000e+00> : vector<16x32xf32>
    %131 = tpu.matmul %129, %130, %cst_87 {dimension_numbers = #tpu.dot_dimension_numbers<[1], [0], [0], [1], [0, 0, 1, 1], [], []>} : vector<16x32xf32>, vector<32x32xf32>, vector<16x32xf32> -> vector<16x32xf32>
    %132 = arith.addf %123, %131 : vector<16x32xf32>
    %c256 = arith.constant 256 : index
    %c0_88 = arith.constant 0 : index
    %133 = vector.load %arg0[%c256, %c0_88] : memref<432x16xf32, #tpu.memory_space<vmem>>, vector<16x16xf32>
    %cst_89 = arith.constant dense<0.000000e+00> : vector<16x32xf32>
    %134 = tpu.matmul %133, %0, %cst_89 {dimension_numbers = #tpu.dot_dimension_numbers<[1], [0], [0], [1], [0, 0, 1, 1], [], []>} : vector<16x16xf32>, vector<16x32xf32>, vector<16x32xf32> -> vector<16x32xf32>
    %135 = vector.broadcast %1 : vector<1x32xf32> to vector<16x32xf32>
    %136 = arith.addf %134, %135 : vector<16x32xf32>
    %cst_90 = arith.constant 0.000000e+00 : f32
    %137 = vector.broadcast %cst_90 : f32 to vector<16x32xf32>
    %138 = arith.maximumf %136, %137 : vector<16x32xf32>
    %c176_91 = arith.constant 176 : index
    %c0_92 = arith.constant 0 : index
    %139 = vector.load %arg4[%c176_91, %c0_92] : memref<752x128xf32, #tpu.memory_space<vmem>>, vector<32x32xf32>
    %cst_93 = arith.constant dense<0.000000e+00> : vector<16x32xf32>
    %140 = tpu.matmul %138, %139, %cst_93 {dimension_numbers = #tpu.dot_dimension_numbers<[1], [0], [0], [1], [0, 0, 1, 1], [], []>} : vector<16x32xf32>, vector<32x32xf32>, vector<16x32xf32> -> vector<16x32xf32>
    %141 = arith.addf %132, %140 : vector<16x32xf32>
    %c304_94 = arith.constant 304 : index
    %c0_95 = arith.constant 0 : index
    %142 = vector.load %arg0[%c304_94, %c0_95] : memref<432x16xf32, #tpu.memory_space<vmem>>, vector<16x16xf32>
    %cst_96 = arith.constant dense<0.000000e+00> : vector<16x32xf32>
    %143 = tpu.matmul %142, %0, %cst_96 {dimension_numbers = #tpu.dot_dimension_numbers<[1], [0], [0], [1], [0, 0, 1, 1], [], []>} : vector<16x16xf32>, vector<16x32xf32>, vector<16x32xf32> -> vector<16x32xf32>
    %144 = vector.broadcast %1 : vector<1x32xf32> to vector<16x32xf32>
    %145 = arith.addf %143, %144 : vector<16x32xf32>
    %cst_97 = arith.constant 0.000000e+00 : f32
    %146 = vector.broadcast %cst_97 : f32 to vector<16x32xf32>
    %147 = arith.maximumf %145, %146 : vector<16x32xf32>
    %c208_98 = arith.constant 208 : index
    %c0_99 = arith.constant 0 : index
    %148 = vector.load %arg4[%c208_98, %c0_99] : memref<752x128xf32, #tpu.memory_space<vmem>>, vector<32x32xf32>
    %cst_100 = arith.constant dense<0.000000e+00> : vector<16x32xf32>
    %149 = tpu.matmul %147, %148, %cst_100 {dimension_numbers = #tpu.dot_dimension_numbers<[1], [0], [0], [1], [0, 0, 1, 1], [], []>} : vector<16x32xf32>, vector<32x32xf32>, vector<16x32xf32> -> vector<16x32xf32>
    %150 = arith.addf %141, %149 : vector<16x32xf32>
    %c352 = arith.constant 352 : index
    %c0_101 = arith.constant 0 : index
    %151 = vector.load %arg0[%c352, %c0_101] : memref<432x16xf32, #tpu.memory_space<vmem>>, vector<16x16xf32>
    %cst_102 = arith.constant dense<0.000000e+00> : vector<16x32xf32>
    %152 = tpu.matmul %151, %0, %cst_102 {dimension_numbers = #tpu.dot_dimension_numbers<[1], [0], [0], [1], [0, 0, 1, 1], [], []>} : vector<16x16xf32>, vector<16x32xf32>, vector<16x32xf32> -> vector<16x32xf32>
    %153 = vector.broadcast %1 : vector<1x32xf32> to vector<16x32xf32>
    %154 = arith.addf %152, %153 : vector<16x32xf32>
    %cst_103 = arith.constant 0.000000e+00 : f32
    %155 = vector.broadcast %cst_103 : f32 to vector<16x32xf32>
    %156 = arith.maximumf %154, %155 : vector<16x32xf32>
    %c240_104 = arith.constant 240 : index
    %c0_105 = arith.constant 0 : index
    %157 = vector.load %arg4[%c240_104, %c0_105] : memref<752x128xf32, #tpu.memory_space<vmem>>, vector<32x32xf32>
    %cst_106 = arith.constant dense<0.000000e+00> : vector<16x32xf32>
    %158 = tpu.matmul %156, %157, %cst_106 {dimension_numbers = #tpu.dot_dimension_numbers<[1], [0], [0], [1], [0, 0, 1, 1], [], []>} : vector<16x32xf32>, vector<32x32xf32>, vector<16x32xf32> -> vector<16x32xf32>
    %159 = arith.addf %150, %158 : vector<16x32xf32>
    %c400 = arith.constant 400 : index
    %c0_107 = arith.constant 0 : index
    %160 = vector.load %arg0[%c400, %c0_107] : memref<432x16xf32, #tpu.memory_space<vmem>>, vector<16x16xf32>
    %cst_108 = arith.constant dense<0.000000e+00> : vector<16x32xf32>
    %161 = tpu.matmul %160, %0, %cst_108 {dimension_numbers = #tpu.dot_dimension_numbers<[1], [0], [0], [1], [0, 0, 1, 1], [], []>} : vector<16x16xf32>, vector<16x32xf32>, vector<16x32xf32> -> vector<16x32xf32>
    %162 = vector.broadcast %1 : vector<1x32xf32> to vector<16x32xf32>
    %163 = arith.addf %161, %162 : vector<16x32xf32>
    %cst_109 = arith.constant 0.000000e+00 : f32
    %164 = vector.broadcast %cst_109 : f32 to vector<16x32xf32>
    %165 = arith.maximumf %163, %164 : vector<16x32xf32>
    %c272_110 = arith.constant 272 : index
    %c0_111 = arith.constant 0 : index
    %166 = vector.load %arg4[%c272_110, %c0_111] : memref<752x128xf32, #tpu.memory_space<vmem>>, vector<32x32xf32>
    %cst_112 = arith.constant dense<0.000000e+00> : vector<16x32xf32>
    %167 = tpu.matmul %165, %166, %cst_112 {dimension_numbers = #tpu.dot_dimension_numbers<[1], [0], [0], [1], [0, 0, 1, 1], [], []>} : vector<16x32xf32>, vector<32x32xf32>, vector<16x32xf32> -> vector<16x32xf32>
    %168 = arith.addf %159, %167 : vector<16x32xf32>
    %169 = vector.broadcast %2 : vector<1x32xf32> to vector<16x32xf32>
    %170 = arith.addf %168, %169 : vector<16x32xf32>
    %cst_113 = arith.constant 0.000000e+00 : f32
    %171 = vector.broadcast %cst_113 : f32 to vector<16x32xf32>
    %172 = arith.maximumf %170, %171 : vector<16x32xf32>
    %c336_114 = arith.constant 336 : index
    %c0_115 = arith.constant 0 : index
    %173 = vector.load %arg4[%c336_114, %c0_115] : memref<752x128xf32, #tpu.memory_space<vmem>>, vector<32x32xf32>
    %cst_116 = arith.constant dense<0.000000e+00> : vector<16x32xf32>
    %174 = tpu.matmul %172, %173, %cst_116 {dimension_numbers = #tpu.dot_dimension_numbers<[1], [0], [0], [1], [0, 0, 1, 1], [], []>} : vector<16x32xf32>, vector<32x32xf32>, vector<16x32xf32> -> vector<16x32xf32>
    %175 = arith.addf %88, %174 : vector<16x32xf32>
    %c32 = arith.constant 32 : index
    %c0_117 = arith.constant 0 : index
    %176 = vector.load %arg0[%c32, %c0_117] : memref<432x16xf32, #tpu.memory_space<vmem>>, vector<16x16xf32>
    %cst_118 = arith.constant dense<0.000000e+00> : vector<16x32xf32>
    %177 = tpu.matmul %176, %0, %cst_118 {dimension_numbers = #tpu.dot_dimension_numbers<[1], [0], [0], [1], [0, 0, 1, 1], [], []>} : vector<16x16xf32>, vector<16x32xf32>, vector<16x32xf32> -> vector<16x32xf32>
    %178 = vector.broadcast %1 : vector<1x32xf32> to vector<16x32xf32>
    %179 = arith.addf %177, %178 : vector<16x32xf32>
    %cst_119 = arith.constant 0.000000e+00 : f32
    %180 = vector.broadcast %cst_119 : f32 to vector<16x32xf32>
    %181 = arith.maximumf %179, %180 : vector<16x32xf32>
    %c16_120 = arith.constant 16 : index
    %c0_121 = arith.constant 0 : index
    %182 = vector.load %arg4[%c16_120, %c0_121] : memref<752x128xf32, #tpu.memory_space<vmem>>, vector<32x32xf32>
    %cst_122 = arith.constant dense<0.000000e+00> : vector<16x32xf32>
    %183 = tpu.matmul %181, %182, %cst_122 {dimension_numbers = #tpu.dot_dimension_numbers<[1], [0], [0], [1], [0, 0, 1, 1], [], []>} : vector<16x32xf32>, vector<32x32xf32>, vector<16x32xf32> -> vector<16x32xf32>
    %c80_123 = arith.constant 80 : index
    %c0_124 = arith.constant 0 : index
    %184 = vector.load %arg0[%c80_123, %c0_124] : memref<432x16xf32, #tpu.memory_space<vmem>>, vector<16x16xf32>
    %cst_125 = arith.constant dense<0.000000e+00> : vector<16x32xf32>
    %185 = tpu.matmul %184, %0, %cst_125 {dimension_numbers = #tpu.dot_dimension_numbers<[1], [0], [0], [1], [0, 0, 1, 1], [], []>} : vector<16x16xf32>, vector<16x32xf32>, vector<16x32xf32> -> vector<16x32xf32>
    %186 = vector.broadcast %1 : vector<1x32xf32> to vector<16x32xf32>
    %187 = arith.addf %185, %186 : vector<16x32xf32>
    %cst_126 = arith.constant 0.000000e+00 : f32
    %188 = vector.broadcast %cst_126 : f32 to vector<16x32xf32>
    %189 = arith.maximumf %187, %188 : vector<16x32xf32>
    %c48_127 = arith.constant 48 : index
    %c0_128 = arith.constant 0 : index
    %190 = vector.load %arg4[%c48_127, %c0_128] : memref<752x128xf32, #tpu.memory_space<vmem>>, vector<32x32xf32>
    %cst_129 = arith.constant dense<0.000000e+00> : vector<16x32xf32>
    %191 = tpu.matmul %189, %190, %cst_129 {dimension_numbers = #tpu.dot_dimension_numbers<[1], [0], [0], [1], [0, 0, 1, 1], [], []>} : vector<16x32xf32>, vector<32x32xf32>, vector<16x32xf32> -> vector<16x32xf32>
    %192 = arith.addf %183, %191 : vector<16x32xf32>
    %c128 = arith.constant 128 : index
    %c0_130 = arith.constant 0 : index
    %193 = vector.load %arg0[%c128, %c0_130] : memref<432x16xf32, #tpu.memory_space<vmem>>, vector<16x16xf32>
    %cst_131 = arith.constant dense<0.000000e+00> : vector<16x32xf32>
    %194 = tpu.matmul %193, %0, %cst_131 {dimension_numbers = #tpu.dot_dimension_numbers<[1], [0], [0], [1], [0, 0, 1, 1], [], []>} : vector<16x16xf32>, vector<16x32xf32>, vector<16x32xf32> -> vector<16x32xf32>
    %195 = vector.broadcast %1 : vector<1x32xf32> to vector<16x32xf32>
    %196 = arith.addf %194, %195 : vector<16x32xf32>
    %cst_132 = arith.constant 0.000000e+00 : f32
    %197 = vector.broadcast %cst_132 : f32 to vector<16x32xf32>
    %198 = arith.maximumf %196, %197 : vector<16x32xf32>
    %c80_133 = arith.constant 80 : index
    %c0_134 = arith.constant 0 : index
    %199 = vector.load %arg4[%c80_133, %c0_134] : memref<752x128xf32, #tpu.memory_space<vmem>>, vector<32x32xf32>
    %cst_135 = arith.constant dense<0.000000e+00> : vector<16x32xf32>
    %200 = tpu.matmul %198, %199, %cst_135 {dimension_numbers = #tpu.dot_dimension_numbers<[1], [0], [0], [1], [0, 0, 1, 1], [], []>} : vector<16x32xf32>, vector<32x32xf32>, vector<16x32xf32> -> vector<16x32xf32>
    %201 = arith.addf %192, %200 : vector<16x32xf32>
    %c176_136 = arith.constant 176 : index
    %c0_137 = arith.constant 0 : index
    %202 = vector.load %arg0[%c176_136, %c0_137] : memref<432x16xf32, #tpu.memory_space<vmem>>, vector<16x16xf32>
    %cst_138 = arith.constant dense<0.000000e+00> : vector<16x32xf32>
    %203 = tpu.matmul %202, %0, %cst_138 {dimension_numbers = #tpu.dot_dimension_numbers<[1], [0], [0], [1], [0, 0, 1, 1], [], []>} : vector<16x16xf32>, vector<16x32xf32>, vector<16x32xf32> -> vector<16x32xf32>
    %204 = vector.broadcast %1 : vector<1x32xf32> to vector<16x32xf32>
    %205 = arith.addf %203, %204 : vector<16x32xf32>
    %cst_139 = arith.constant 0.000000e+00 : f32
    %206 = vector.broadcast %cst_139 : f32 to vector<16x32xf32>
    %207 = arith.maximumf %205, %206 : vector<16x32xf32>
    %c112_140 = arith.constant 112 : index
    %c0_141 = arith.constant 0 : index
    %208 = vector.load %arg4[%c112_140, %c0_141] : memref<752x128xf32, #tpu.memory_space<vmem>>, vector<32x32xf32>
    %cst_142 = arith.constant dense<0.000000e+00> : vector<16x32xf32>
    %209 = tpu.matmul %207, %208, %cst_142 {dimension_numbers = #tpu.dot_dimension_numbers<[1], [0], [0], [1], [0, 0, 1, 1], [], []>} : vector<16x32xf32>, vector<32x32xf32>, vector<16x32xf32> -> vector<16x32xf32>
    %210 = arith.addf %201, %209 : vector<16x32xf32>
    %c224 = arith.constant 224 : index
    %c0_143 = arith.constant 0 : index
    %211 = vector.load %arg0[%c224, %c0_143] : memref<432x16xf32, #tpu.memory_space<vmem>>, vector<16x16xf32>
    %cst_144 = arith.constant dense<0.000000e+00> : vector<16x32xf32>
    %212 = tpu.matmul %211, %0, %cst_144 {dimension_numbers = #tpu.dot_dimension_numbers<[1], [0], [0], [1], [0, 0, 1, 1], [], []>} : vector<16x16xf32>, vector<16x32xf32>, vector<16x32xf32> -> vector<16x32xf32>
    %213 = vector.broadcast %1 : vector<1x32xf32> to vector<16x32xf32>
    %214 = arith.addf %212, %213 : vector<16x32xf32>
    %cst_145 = arith.constant 0.000000e+00 : f32
    %215 = vector.broadcast %cst_145 : f32 to vector<16x32xf32>
    %216 = arith.maximumf %214, %215 : vector<16x32xf32>
    %c144_146 = arith.constant 144 : index
    %c0_147 = arith.constant 0 : index
    %217 = vector.load %arg4[%c144_146, %c0_147] : memref<752x128xf32, #tpu.memory_space<vmem>>, vector<32x32xf32>
    %cst_148 = arith.constant dense<0.000000e+00> : vector<16x32xf32>
    %218 = tpu.matmul %216, %217, %cst_148 {dimension_numbers = #tpu.dot_dimension_numbers<[1], [0], [0], [1], [0, 0, 1, 1], [], []>} : vector<16x32xf32>, vector<32x32xf32>, vector<16x32xf32> -> vector<16x32xf32>
    %219 = arith.addf %210, %218 : vector<16x32xf32>
    %c272_149 = arith.constant 272 : index
    %c0_150 = arith.constant 0 : index
    %220 = vector.load %arg0[%c272_149, %c0_150] : memref<432x16xf32, #tpu.memory_space<vmem>>, vector<16x16xf32>
    %cst_151 = arith.constant dense<0.000000e+00> : vector<16x32xf32>
    %221 = tpu.matmul %220, %0, %cst_151 {dimension_numbers = #tpu.dot_dimension_numbers<[1], [0], [0], [1], [0, 0, 1, 1], [], []>} : vector<16x16xf32>, vector<16x32xf32>, vector<16x32xf32> -> vector<16x32xf32>
    %222 = vector.broadcast %1 : vector<1x32xf32> to vector<16x32xf32>
    %223 = arith.addf %221, %222 : vector<16x32xf32>
    %cst_152 = arith.constant 0.000000e+00 : f32
    %224 = vector.broadcast %cst_152 : f32 to vector<16x32xf32>
    %225 = arith.maximumf %223, %224 : vector<16x32xf32>
    %c176_153 = arith.constant 176 : index
    %c0_154 = arith.constant 0 : index
    %226 = vector.load %arg4[%c176_153, %c0_154] : memref<752x128xf32, #tpu.memory_space<vmem>>, vector<32x32xf32>
    %cst_155 = arith.constant dense<0.000000e+00> : vector<16x32xf32>
    %227 = tpu.matmul %225, %226, %cst_155 {dimension_numbers = #tpu.dot_dimension_numbers<[1], [0], [0], [1], [0, 0, 1, 1], [], []>} : vector<16x32xf32>, vector<32x32xf32>, vector<16x32xf32> -> vector<16x32xf32>
    %228 = arith.addf %219, %227 : vector<16x32xf32>
    %c320 = arith.constant 320 : index
    %c0_156 = arith.constant 0 : index
    %229 = vector.load %arg0[%c320, %c0_156] : memref<432x16xf32, #tpu.memory_space<vmem>>, vector<16x16xf32>
    %cst_157 = arith.constant dense<0.000000e+00> : vector<16x32xf32>
    %230 = tpu.matmul %229, %0, %cst_157 {dimension_numbers = #tpu.dot_dimension_numbers<[1], [0], [0], [1], [0, 0, 1, 1], [], []>} : vector<16x16xf32>, vector<16x32xf32>, vector<16x32xf32> -> vector<16x32xf32>
    %231 = vector.broadcast %1 : vector<1x32xf32> to vector<16x32xf32>
    %232 = arith.addf %230, %231 : vector<16x32xf32>
    %cst_158 = arith.constant 0.000000e+00 : f32
    %233 = vector.broadcast %cst_158 : f32 to vector<16x32xf32>
    %234 = arith.maximumf %232, %233 : vector<16x32xf32>
    %c208_159 = arith.constant 208 : index
    %c0_160 = arith.constant 0 : index
    %235 = vector.load %arg4[%c208_159, %c0_160] : memref<752x128xf32, #tpu.memory_space<vmem>>, vector<32x32xf32>
    %cst_161 = arith.constant dense<0.000000e+00> : vector<16x32xf32>
    %236 = tpu.matmul %234, %235, %cst_161 {dimension_numbers = #tpu.dot_dimension_numbers<[1], [0], [0], [1], [0, 0, 1, 1], [], []>} : vector<16x32xf32>, vector<32x32xf32>, vector<16x32xf32> -> vector<16x32xf32>
    %237 = arith.addf %228, %236 : vector<16x32xf32>
    %c368 = arith.constant 368 : index
    %c0_162 = arith.constant 0 : index
    %238 = vector.load %arg0[%c368, %c0_162] : memref<432x16xf32, #tpu.memory_space<vmem>>, vector<16x16xf32>
    %cst_163 = arith.constant dense<0.000000e+00> : vector<16x32xf32>
    %239 = tpu.matmul %238, %0, %cst_163 {dimension_numbers = #tpu.dot_dimension_numbers<[1], [0], [0], [1], [0, 0, 1, 1], [], []>} : vector<16x16xf32>, vector<16x32xf32>, vector<16x32xf32> -> vector<16x32xf32>
    %240 = vector.broadcast %1 : vector<1x32xf32> to vector<16x32xf32>
    %241 = arith.addf %239, %240 : vector<16x32xf32>
    %cst_164 = arith.constant 0.000000e+00 : f32
    %242 = vector.broadcast %cst_164 : f32 to vector<16x32xf32>
    %243 = arith.maximumf %241, %242 : vector<16x32xf32>
    %c240_165 = arith.constant 240 : index
    %c0_166 = arith.constant 0 : index
    %244 = vector.load %arg4[%c240_165, %c0_166] : memref<752x128xf32, #tpu.memory_space<vmem>>, vector<32x32xf32>
    %cst_167 = arith.constant dense<0.000000e+00> : vector<16x32xf32>
    %245 = tpu.matmul %243, %244, %cst_167 {dimension_numbers = #tpu.dot_dimension_numbers<[1], [0], [0], [1], [0, 0, 1, 1], [], []>} : vector<16x32xf32>, vector<32x32xf32>, vector<16x32xf32> -> vector<16x32xf32>
    %246 = arith.addf %237, %245 : vector<16x32xf32>
    %c416 = arith.constant 416 : index
    %c0_168 = arith.constant 0 : index
    %247 = vector.load %arg0[%c416, %c0_168] : memref<432x16xf32, #tpu.memory_space<vmem>>, vector<16x16xf32>
    %cst_169 = arith.constant dense<0.000000e+00> : vector<16x32xf32>
    %248 = tpu.matmul %247, %0, %cst_169 {dimension_numbers = #tpu.dot_dimension_numbers<[1], [0], [0], [1], [0, 0, 1, 1], [], []>} : vector<16x16xf32>, vector<16x32xf32>, vector<16x32xf32> -> vector<16x32xf32>
    %249 = vector.broadcast %1 : vector<1x32xf32> to vector<16x32xf32>
    %250 = arith.addf %248, %249 : vector<16x32xf32>
    %cst_170 = arith.constant 0.000000e+00 : f32
    %251 = vector.broadcast %cst_170 : f32 to vector<16x32xf32>
    %252 = arith.maximumf %250, %251 : vector<16x32xf32>
    %c272_171 = arith.constant 272 : index
    %c0_172 = arith.constant 0 : index
    %253 = vector.load %arg4[%c272_171, %c0_172] : memref<752x128xf32, #tpu.memory_space<vmem>>, vector<32x32xf32>
    %cst_173 = arith.constant dense<0.000000e+00> : vector<16x32xf32>
    %254 = tpu.matmul %252, %253, %cst_173 {dimension_numbers = #tpu.dot_dimension_numbers<[1], [0], [0], [1], [0, 0, 1, 1], [], []>} : vector<16x32xf32>, vector<32x32xf32>, vector<16x32xf32> -> vector<16x32xf32>
    %255 = arith.addf %246, %254 : vector<16x32xf32>
    %256 = vector.broadcast %2 : vector<1x32xf32> to vector<16x32xf32>
    %257 = arith.addf %255, %256 : vector<16x32xf32>
    %cst_174 = arith.constant 0.000000e+00 : f32
    %258 = vector.broadcast %cst_174 : f32 to vector<16x32xf32>
    %259 = arith.maximumf %257, %258 : vector<16x32xf32>
    %c368_175 = arith.constant 368 : index
    %c0_176 = arith.constant 0 : index
    %260 = vector.load %arg4[%c368_175, %c0_176] : memref<752x128xf32, #tpu.memory_space<vmem>>, vector<32x32xf32>
    %cst_177 = arith.constant dense<0.000000e+00> : vector<16x32xf32>
    %261 = tpu.matmul %259, %260, %cst_177 {dimension_numbers = #tpu.dot_dimension_numbers<[1], [0], [0], [1], [0, 0, 1, 1], [], []>} : vector<16x32xf32>, vector<32x32xf32>, vector<16x32xf32> -> vector<16x32xf32>
    %262 = arith.addf %175, %261 : vector<16x32xf32>
    %c2 = arith.constant 2 : index
    %c0_178 = arith.constant 0 : index
    %263 = vector.load %arg5[%c2, %c0_178] : memref<24x128xf32, #tpu.memory_space<vmem>>, vector<1x32xf32>
    %264 = vector.broadcast %263 : vector<1x32xf32> to vector<16x32xf32>
    %265 = arith.addf %262, %264 : vector<16x32xf32>
    %cst_179 = arith.constant 5.65685415 : f32
    %266 = vector.broadcast %cst_179 : f32 to vector<16x32xf32>
    %267 = arith.mulf %265, %266 : vector<16x32xf32>
    %c0_180 = arith.constant 0 : index
    %c0_181 = arith.constant 0 : index
    %268 = vector.load %arg1[%c0_180, %c0_181] : memref<16x32xf32, #tpu.memory_space<vmem>>, vector<16x32xf32>
    %269 = arith.addf %267, %268 : vector<16x32xf32>
    %c0_182 = arith.constant 0 : index
    %c0_183 = arith.constant 0 : index
    %270 = vector.load %arg2[%c0_182, %c0_183] : memref<64x24xf32, #tpu.memory_space<vmem>>, vector<64x24xf32>
    %c6 = arith.constant 6 : index
    %c0_184 = arith.constant 0 : index
    %271 = vector.load %arg5[%c6, %c0_184] : memref<24x128xf32, #tpu.memory_space<vmem>>, vector<1x32xf32>
    %c7 = arith.constant 7 : index
    %c0_185 = arith.constant 0 : index
    %272 = vector.load %arg5[%c7, %c0_185] : memref<24x128xf32, #tpu.memory_space<vmem>>, vector<1x32xf32>
    %cst_186 = arith.constant dense<0.000000e+00> : vector<16xf32>
    %273 = vector.multi_reduction <add>, %269, %cst_186 [1] : vector<16x32xf32> to vector<16xf32>
    %274 = vector.shape_cast %273 : vector<16xf32> to vector<16x1xf32>
    %cst_187 = arith.constant 3.200000e+01 : f32
    %275 = vector.broadcast %cst_187 : f32 to vector<16x1xf32>
    %276 = arith.divf %274, %275 : vector<16x1xf32>
    %277 = vector.broadcast %276 : vector<16x1xf32> to vector<16x32xf32>
    %278 = arith.subf %269, %277 : vector<16x32xf32>
    %279 = arith.mulf %278, %278 : vector<16x32xf32>
    %cst_188 = arith.constant dense<0.000000e+00> : vector<16xf32>
    %280 = vector.multi_reduction <add>, %279, %cst_188 [1] : vector<16x32xf32> to vector<16xf32>
    %281 = vector.shape_cast %280 : vector<16xf32> to vector<16x1xf32>
    %cst_189 = arith.constant 3.200000e+01 : f32
    %282 = vector.broadcast %cst_189 : f32 to vector<16x1xf32>
    %283 = arith.divf %281, %282 : vector<16x1xf32>
    %284 = vector.broadcast %276 : vector<16x1xf32> to vector<16x32xf32>
    %285 = arith.subf %269, %284 : vector<16x32xf32>
    %cst_190 = arith.constant 9.99999974E-6 : f32
    %286 = vector.broadcast %cst_190 : f32 to vector<16x1xf32>
    %287 = arith.addf %283, %286 : vector<16x1xf32>
    %288 = math.rsqrt %287 : vector<16x1xf32>
    %289 = vector.broadcast %288 : vector<16x1xf32> to vector<16x32xf32>
    %290 = arith.mulf %285, %289 : vector<16x32xf32>
    %291 = vector.broadcast %271 : vector<1x32xf32> to vector<16x32xf32>
    %292 = arith.mulf %290, %291 : vector<16x32xf32>
    %293 = vector.broadcast %272 : vector<1x32xf32> to vector<16x32xf32>
    %294 = arith.addf %292, %293 : vector<16x32xf32>
    %c400_191 = arith.constant 400 : index
    %c0_192 = arith.constant 0 : index
    %295 = vector.load %arg4[%c400_191, %c0_192] : memref<752x128xf32, #tpu.memory_space<vmem>>, vector<32x96xf32>
    %cst_193 = arith.constant dense<0.000000e+00> : vector<16x96xf32>
    %296 = tpu.matmul %294, %295, %cst_193 {dimension_numbers = #tpu.dot_dimension_numbers<[1], [0], [0], [1], [0, 0, 1, 1], [], []>} : vector<16x32xf32>, vector<32x96xf32>, vector<16x96xf32> -> vector<16x96xf32>
    %c8 = arith.constant 8 : index
    %c0_194 = arith.constant 0 : index
    %297 = vector.load %arg5[%c8, %c0_194] : memref<24x128xf32, #tpu.memory_space<vmem>>, vector<1x96xf32>
    %298 = vector.broadcast %297 : vector<1x96xf32> to vector<16x96xf32>
    %299 = arith.addf %296, %298 : vector<16x96xf32>
    %300 = vector.extract_strided_slice %299 {offsets = [0, 0], sizes = [16, 32], strides = [1, 1]} : vector<16x96xf32> to vector<16x32xf32>
    %cst_195 = arith.constant 0.353553385 : f32
    %301 = vector.broadcast %cst_195 : f32 to vector<16x32xf32>
    %302 = arith.mulf %300, %301 : vector<16x32xf32>
    %303 = vector.extract_strided_slice %299 {offsets = [0, 32], sizes = [16, 32], strides = [1, 1]} : vector<16x96xf32> to vector<16x32xf32>
    %304 = vector.extract_strided_slice %299 {offsets = [0, 64], sizes = [16, 32], strides = [1, 1]} : vector<16x96xf32> to vector<16x32xf32>
    %c0_196 = arith.constant 0 : index
    %c0_197 = arith.constant 0 : index
    %c0_198 = arith.constant 0 : index
    %305 = vector.load %arg3[%c0_196, %c0_197, %c0_198] : memref<4x32x32xf32, #tpu.memory_space<vmem>>, vector<1x32x32xf32>
    %306 = vector.shape_cast %305 : vector<1x32x32xf32> to vector<32x32xf32>
    %c1_199 = arith.constant 1 : index
    %c0_200 = arith.constant 0 : index
    %c0_201 = arith.constant 0 : index
    %307 = vector.load %arg3[%c1_199, %c0_200, %c0_201] : memref<4x32x32xf32, #tpu.memory_space<vmem>>, vector<1x32x32xf32>
    %308 = vector.shape_cast %307 : vector<1x32x32xf32> to vector<32x32xf32>
    %309 = vector.extract_strided_slice %306 {offsets = [0, 0], sizes = [16, 32], strides = [1, 1]} : vector<32x32xf32> to vector<16x32xf32>
    %310 = vector.extract_strided_slice %303 {offsets = [0, 0], sizes = [8, 32], strides = [1, 1]} : vector<16x32xf32> to vector<8x32xf32>
    %311 = tpu.concatenate %309, %310 in 0 : vector<16x32xf32>, vector<8x32xf32> -> vector<24x32xf32>
    %312 = vector.extract_strided_slice %308 {offsets = [0, 0], sizes = [16, 32], strides = [1, 1]} : vector<32x32xf32> to vector<16x32xf32>
    %313 = vector.extract_strided_slice %304 {offsets = [0, 0], sizes = [8, 32], strides = [1, 1]} : vector<16x32xf32> to vector<8x32xf32>
    %314 = tpu.concatenate %312, %313 in 0 : vector<16x32xf32>, vector<8x32xf32> -> vector<24x32xf32>
    %315 = vector.extract_strided_slice %311 {offsets = [8, 0], sizes = [16, 32], strides = [1, 1]} : vector<24x32xf32> to vector<16x32xf32>
    %316 = vector.extract_strided_slice %314 {offsets = [8, 0], sizes = [16, 32], strides = [1, 1]} : vector<24x32xf32> to vector<16x32xf32>
    %317 = vector.extract_strided_slice %306 {offsets = [16, 0], sizes = [16, 32], strides = [1, 1]} : vector<32x32xf32> to vector<16x32xf32>
    %318 = vector.extract_strided_slice %303 {offsets = [8, 0], sizes = [8, 32], strides = [1, 1]} : vector<16x32xf32> to vector<8x32xf32>
    %319 = tpu.concatenate %317, %318 in 0 : vector<16x32xf32>, vector<8x32xf32> -> vector<24x32xf32>
    %320 = vector.extract_strided_slice %308 {offsets = [16, 0], sizes = [16, 32], strides = [1, 1]} : vector<32x32xf32> to vector<16x32xf32>
    %321 = vector.extract_strided_slice %304 {offsets = [8, 0], sizes = [8, 32], strides = [1, 1]} : vector<16x32xf32> to vector<8x32xf32>
    %322 = tpu.concatenate %320, %321 in 0 : vector<16x32xf32>, vector<8x32xf32> -> vector<24x32xf32>
    %323 = vector.extract_strided_slice %319 {offsets = [8, 0], sizes = [16, 32], strides = [1, 1]} : vector<24x32xf32> to vector<16x32xf32>
    %324 = vector.extract_strided_slice %322 {offsets = [8, 0], sizes = [16, 32], strides = [1, 1]} : vector<24x32xf32> to vector<16x32xf32>
    %325 = tpu.concatenate %315, %323 in 0 : vector<16x32xf32>, vector<16x32xf32> -> vector<32x32xf32>
    %c0_202 = arith.constant 0 : index
    %c0_203 = arith.constant 0 : index
    %c0_204 = arith.constant 0 : index
    %326 = vector.load %arg7[%c0_202, %c0_203, %c0_204] : memref<4x32x32xf32, #tpu.memory_space<vmem>>, vector<1x32x32xf32>
    %327 = vector.shape_cast %326 : vector<1x32x32xf32> to vector<32x32xf32>
    %328 = vector.shape_cast %325 : vector<32x32xf32> to vector<1x32x32xf32>
    tpu.vector_store %arg7[%c0_202, %c0_203, %c0_204], %328 {strides = array<i32>} : memref<4x32x32xf32, #tpu.memory_space<vmem>>, vector<1x32x32xf32>,
    %329 = tpu.concatenate %316, %324 in 0 : vector<16x32xf32>, vector<16x32xf32> -> vector<32x32xf32>
    %c1_205 = arith.constant 1 : index
    %c0_206 = arith.constant 0 : index
    %c0_207 = arith.constant 0 : index
    %330 = vector.load %arg7[%c1_205, %c0_206, %c0_207] : memref<4x32x32xf32, #tpu.memory_space<vmem>>, vector<1x32x32xf32>
    %331 = vector.shape_cast %330 : vector<1x32x32xf32> to vector<32x32xf32>
    %332 = vector.shape_cast %329 : vector<32x32xf32> to vector<1x32x32xf32>
    tpu.vector_store %arg7[%c1_205, %c0_206, %c0_207], %332 {strides = array<i32>} : memref<4x32x32xf32, #tpu.memory_space<vmem>>, vector<1x32x32xf32>,
    %333 = vector.extract_strided_slice %302 {offsets = [0, 0], sizes = [8, 8], strides = [1, 1]} : vector<16x32xf32> to vector<8x8xf32>
    %334 = vector.extract_strided_slice %311 {offsets = [0, 0], sizes = [24, 8], strides = [1, 1]} : vector<24x32xf32> to vector<24x8xf32>
    %cst_208 = arith.constant dense<0.000000e+00> : vector<8x24xf32>
    %335 = tpu.matmul %333, %334, %cst_208 {dimension_numbers = #tpu.dot_dimension_numbers<[1], [1], [0], [0], [0, 0, 1, 0], [], []>} : vector<8x8xf32>, vector<24x8xf32>, vector<8x24xf32> -> vector<8x24xf32>
    %336 = vector.extract_strided_slice %302 {offsets = [0, 8], sizes = [8, 8], strides = [1, 1]} : vector<16x32xf32> to vector<8x8xf32>
    %337 = vector.extract_strided_slice %311 {offsets = [0, 8], sizes = [24, 8], strides = [1, 1]} : vector<24x32xf32> to vector<24x8xf32>
    %cst_209 = arith.constant dense<0.000000e+00> : vector<8x24xf32>
    %338 = tpu.matmul %336, %337, %cst_209 {dimension_numbers = #tpu.dot_dimension_numbers<[1], [1], [0], [0], [0, 0, 1, 0], [], []>} : vector<8x8xf32>, vector<24x8xf32>, vector<8x24xf32> -> vector<8x24xf32>
    %339 = vector.extract_strided_slice %302 {offsets = [0, 16], sizes = [8, 8], strides = [1, 1]} : vector<16x32xf32> to vector<8x8xf32>
    %340 = vector.extract_strided_slice %311 {offsets = [0, 16], sizes = [24, 8], strides = [1, 1]} : vector<24x32xf32> to vector<24x8xf32>
    %cst_210 = arith.constant dense<0.000000e+00> : vector<8x24xf32>
    %341 = tpu.matmul %339, %340, %cst_210 {dimension_numbers = #tpu.dot_dimension_numbers<[1], [1], [0], [0], [0, 0, 1, 0], [], []>} : vector<8x8xf32>, vector<24x8xf32>, vector<8x24xf32> -> vector<8x24xf32>
    %342 = vector.extract_strided_slice %302 {offsets = [0, 24], sizes = [8, 8], strides = [1, 1]} : vector<16x32xf32> to vector<8x8xf32>
    %343 = vector.extract_strided_slice %311 {offsets = [0, 24], sizes = [24, 8], strides = [1, 1]} : vector<24x32xf32> to vector<24x8xf32>
    %cst_211 = arith.constant dense<0.000000e+00> : vector<8x24xf32>
    %344 = tpu.matmul %342, %343, %cst_211 {dimension_numbers = #tpu.dot_dimension_numbers<[1], [1], [0], [0], [0, 0, 1, 0], [], []>} : vector<8x8xf32>, vector<24x8xf32>, vector<8x24xf32> -> vector<8x24xf32>
    %345 = vector.extract_strided_slice %302 {offsets = [8, 0], sizes = [8, 8], strides = [1, 1]} : vector<16x32xf32> to vector<8x8xf32>
    %346 = vector.extract_strided_slice %319 {offsets = [0, 0], sizes = [24, 8], strides = [1, 1]} : vector<24x32xf32> to vector<24x8xf32>
    %cst_212 = arith.constant dense<0.000000e+00> : vector<8x24xf32>
    %347 = tpu.matmul %345, %346, %cst_212 {dimension_numbers = #tpu.dot_dimension_numbers<[1], [1], [0], [0], [0, 0, 1, 0], [], []>} : vector<8x8xf32>, vector<24x8xf32>, vector<8x24xf32> -> vector<8x24xf32>
    %348 = vector.extract_strided_slice %302 {offsets = [8, 8], sizes = [8, 8], strides = [1, 1]} : vector<16x32xf32> to vector<8x8xf32>
    %349 = vector.extract_strided_slice %319 {offsets = [0, 8], sizes = [24, 8], strides = [1, 1]} : vector<24x32xf32> to vector<24x8xf32>
    %cst_213 = arith.constant dense<0.000000e+00> : vector<8x24xf32>
    %350 = tpu.matmul %348, %349, %cst_213 {dimension_numbers = #tpu.dot_dimension_numbers<[1], [1], [0], [0], [0, 0, 1, 0], [], []>} : vector<8x8xf32>, vector<24x8xf32>, vector<8x24xf32> -> vector<8x24xf32>
    %351 = vector.extract_strided_slice %302 {offsets = [8, 16], sizes = [8, 8], strides = [1, 1]} : vector<16x32xf32> to vector<8x8xf32>
    %352 = vector.extract_strided_slice %319 {offsets = [0, 16], sizes = [24, 8], strides = [1, 1]} : vector<24x32xf32> to vector<24x8xf32>
    %cst_214 = arith.constant dense<0.000000e+00> : vector<8x24xf32>
    %353 = tpu.matmul %351, %352, %cst_214 {dimension_numbers = #tpu.dot_dimension_numbers<[1], [1], [0], [0], [0, 0, 1, 0], [], []>} : vector<8x8xf32>, vector<24x8xf32>, vector<8x24xf32> -> vector<8x24xf32>
    %354 = vector.extract_strided_slice %302 {offsets = [8, 24], sizes = [8, 8], strides = [1, 1]} : vector<16x32xf32> to vector<8x8xf32>
    %355 = vector.extract_strided_slice %319 {offsets = [0, 24], sizes = [24, 8], strides = [1, 1]} : vector<24x32xf32> to vector<24x8xf32>
    %cst_215 = arith.constant dense<0.000000e+00> : vector<8x24xf32>
    %356 = tpu.matmul %354, %355, %cst_215 {dimension_numbers = #tpu.dot_dimension_numbers<[1], [1], [0], [0], [0, 0, 1, 0], [], []>} : vector<8x8xf32>, vector<24x8xf32>, vector<8x24xf32> -> vector<8x24xf32>
    %357 = tpu.concatenate %335, %338, %341, %344, %347, %350, %353, %356 in 0 : vector<8x24xf32>, vector<8x24xf32>, vector<8x24xf32>, vector<8x24xf32>, vector<8x24xf32>, vector<8x24xf32>, vector<8x24xf32>, vector<8x24xf32> -> vector<64x24xf32>
    %358 = arith.addf %357, %270 : vector<64x24xf32>
    %cst_216 = arith.constant dense<0xFF800000> : vector<64xf32>
    %359 = vector.multi_reduction <maximumf>, %358, %cst_216 [1] : vector<64x24xf32> to vector<64xf32>
    %360 = vector.shape_cast %359 : vector<64xf32> to vector<64x1xf32>
    %361 = vector.broadcast %360 : vector<64x1xf32> to vector<64x24xf32>
    %362 = arith.subf %358, %361 : vector<64x24xf32>
    %363 = math.exp %362 : vector<64x24xf32>
    %cst_217 = arith.constant dense<0.000000e+00> : vector<64xf32>
    %364 = vector.multi_reduction <add>, %363, %cst_217 [1] : vector<64x24xf32> to vector<64xf32>
    %365 = vector.shape_cast %364 : vector<64xf32> to vector<64x1xf32>
    %366 = tpu.reciprocal %365 {approx = true} : vector<64x1xf32> -> vector<64x1xf32>
    %367 = vector.broadcast %366 : vector<64x1xf32> to vector<64x24xf32>
    %368 = arith.mulf %363, %367 : vector<64x24xf32>
    %369 = vector.extract_strided_slice %368 {offsets = [0, 0], sizes = [8, 24], strides = [1, 1]} : vector<64x24xf32> to vector<8x24xf32>
    %370 = vector.extract_strided_slice %314 {offsets = [0, 0], sizes = [24, 8], strides = [1, 1]} : vector<24x32xf32> to vector<24x8xf32>
    %cst_218 = arith.constant dense<0.000000e+00> : vector<8x8xf32>
    %371 = tpu.matmul %369, %370, %cst_218 {dimension_numbers = #tpu.dot_dimension_numbers<[1], [0], [0], [1], [0, 0, 1, 1], [], []>} : vector<8x24xf32>, vector<24x8xf32>, vector<8x8xf32> -> vector<8x8xf32>
    %c432 = arith.constant 432 : index
    %c0_219 = arith.constant 0 : index
    %372 = vector.load %arg4[%c432, %c0_219] : memref<752x128xf32, #tpu.memory_space<vmem>>, vector<8x32xf32>
    %cst_220 = arith.constant dense<0.000000e+00> : vector<8x32xf32>
    %373 = tpu.matmul %371, %372, %cst_220 {dimension_numbers = #tpu.dot_dimension_numbers<[1], [0], [0], [1], [0, 0, 1, 1], [], []>} : vector<8x8xf32>, vector<8x32xf32>, vector<8x32xf32> -> vector<8x32xf32>
    %374 = vector.extract_strided_slice %368 {offsets = [8, 0], sizes = [8, 24], strides = [1, 1]} : vector<64x24xf32> to vector<8x24xf32>
    %375 = vector.extract_strided_slice %314 {offsets = [0, 8], sizes = [24, 8], strides = [1, 1]} : vector<24x32xf32> to vector<24x8xf32>
    %cst_221 = arith.constant dense<0.000000e+00> : vector<8x8xf32>
    %376 = tpu.matmul %374, %375, %cst_221 {dimension_numbers = #tpu.dot_dimension_numbers<[1], [0], [0], [1], [0, 0, 1, 1], [], []>} : vector<8x24xf32>, vector<24x8xf32>, vector<8x8xf32> -> vector<8x8xf32>
    %c440 = arith.constant 440 : index
    %c0_222 = arith.constant 0 : index
    %377 = vector.load %arg4[%c440, %c0_222] : memref<752x128xf32, #tpu.memory_space<vmem>>, vector<8x32xf32>
    %cst_223 = arith.constant dense<0.000000e+00> : vector<8x32xf32>
    %378 = tpu.matmul %376, %377, %cst_223 {dimension_numbers = #tpu.dot_dimension_numbers<[1], [0], [0], [1], [0, 0, 1, 1], [], []>} : vector<8x8xf32>, vector<8x32xf32>, vector<8x32xf32> -> vector<8x32xf32>
    %379 = arith.addf %373, %378 : vector<8x32xf32>
    %380 = vector.extract_strided_slice %368 {offsets = [16, 0], sizes = [8, 24], strides = [1, 1]} : vector<64x24xf32> to vector<8x24xf32>
    %381 = vector.extract_strided_slice %314 {offsets = [0, 16], sizes = [24, 8], strides = [1, 1]} : vector<24x32xf32> to vector<24x8xf32>
    %cst_224 = arith.constant dense<0.000000e+00> : vector<8x8xf32>
    %382 = tpu.matmul %380, %381, %cst_224 {dimension_numbers = #tpu.dot_dimension_numbers<[1], [0], [0], [1], [0, 0, 1, 1], [], []>} : vector<8x24xf32>, vector<24x8xf32>, vector<8x8xf32> -> vector<8x8xf32>
    %c448 = arith.constant 448 : index
    %c0_225 = arith.constant 0 : index
    %383 = vector.load %arg4[%c448, %c0_225] : memref<752x128xf32, #tpu.memory_space<vmem>>, vector<8x32xf32>
    %cst_226 = arith.constant dense<0.000000e+00> : vector<8x32xf32>
    %384 = tpu.matmul %382, %383, %cst_226 {dimension_numbers = #tpu.dot_dimension_numbers<[1], [0], [0], [1], [0, 0, 1, 1], [], []>} : vector<8x8xf32>, vector<8x32xf32>, vector<8x32xf32> -> vector<8x32xf32>
    %385 = arith.addf %379, %384 : vector<8x32xf32>
    %386 = vector.extract_strided_slice %368 {offsets = [24, 0], sizes = [8, 24], strides = [1, 1]} : vector<64x24xf32> to vector<8x24xf32>
    %387 = vector.extract_strided_slice %314 {offsets = [0, 24], sizes = [24, 8], strides = [1, 1]} : vector<24x32xf32> to vector<24x8xf32>
    %cst_227 = arith.constant dense<0.000000e+00> : vector<8x8xf32>
    %388 = tpu.matmul %386, %387, %cst_227 {dimension_numbers = #tpu.dot_dimension_numbers<[1], [0], [0], [1], [0, 0, 1, 1], [], []>} : vector<8x24xf32>, vector<24x8xf32>, vector<8x8xf32> -> vector<8x8xf32>
    %c456 = arith.constant 456 : index
    %c0_228 = arith.constant 0 : index
    %389 = vector.load %arg4[%c456, %c0_228] : memref<752x128xf32, #tpu.memory_space<vmem>>, vector<8x32xf32>
    %cst_229 = arith.constant dense<0.000000e+00> : vector<8x32xf32>
    %390 = tpu.matmul %388, %389, %cst_229 {dimension_numbers = #tpu.dot_dimension_numbers<[1], [0], [0], [1], [0, 0, 1, 1], [], []>} : vector<8x8xf32>, vector<8x32xf32>, vector<8x32xf32> -> vector<8x32xf32>
    %391 = arith.addf %385, %390 : vector<8x32xf32>
    %392 = vector.extract_strided_slice %368 {offsets = [32, 0], sizes = [8, 24], strides = [1, 1]} : vector<64x24xf32> to vector<8x24xf32>
    %393 = vector.extract_strided_slice %322 {offsets = [0, 0], sizes = [24, 8], strides = [1, 1]} : vector<24x32xf32> to vector<24x8xf32>
    %cst_230 = arith.constant dense<0.000000e+00> : vector<8x8xf32>
    %394 = tpu.matmul %392, %393, %cst_230 {dimension_numbers = #tpu.dot_dimension_numbers<[1], [0], [0], [1], [0, 0, 1, 1], [], []>} : vector<8x24xf32>, vector<24x8xf32>, vector<8x8xf32> -> vector<8x8xf32>
    %c432_231 = arith.constant 432 : index
    %c0_232 = arith.constant 0 : index
    %395 = vector.load %arg4[%c432_231, %c0_232] : memref<752x128xf32, #tpu.memory_space<vmem>>, vector<8x32xf32>
    %cst_233 = arith.constant dense<0.000000e+00> : vector<8x32xf32>
    %396 = tpu.matmul %394, %395, %cst_233 {dimension_numbers = #tpu.dot_dimension_numbers<[1], [0], [0], [1], [0, 0, 1, 1], [], []>} : vector<8x8xf32>, vector<8x32xf32>, vector<8x32xf32> -> vector<8x32xf32>
    %397 = vector.extract_strided_slice %368 {offsets = [40, 0], sizes = [8, 24], strides = [1, 1]} : vector<64x24xf32> to vector<8x24xf32>
    %398 = vector.extract_strided_slice %322 {offsets = [0, 8], sizes = [24, 8], strides = [1, 1]} : vector<24x32xf32> to vector<24x8xf32>
    %cst_234 = arith.constant dense<0.000000e+00> : vector<8x8xf32>
    %399 = tpu.matmul %397, %398, %cst_234 {dimension_numbers = #tpu.dot_dimension_numbers<[1], [0], [0], [1], [0, 0, 1, 1], [], []>} : vector<8x24xf32>, vector<24x8xf32>, vector<8x8xf32> -> vector<8x8xf32>
    %c440_235 = arith.constant 440 : index
    %c0_236 = arith.constant 0 : index
    %400 = vector.load %arg4[%c440_235, %c0_236] : memref<752x128xf32, #tpu.memory_space<vmem>>, vector<8x32xf32>
    %cst_237 = arith.constant dense<0.000000e+00> : vector<8x32xf32>
    %401 = tpu.matmul %399, %400, %cst_237 {dimension_numbers = #tpu.dot_dimension_numbers<[1], [0], [0], [1], [0, 0, 1, 1], [], []>} : vector<8x8xf32>, vector<8x32xf32>, vector<8x32xf32> -> vector<8x32xf32>
    %402 = arith.addf %396, %401 : vector<8x32xf32>
    %403 = vector.extract_strided_slice %368 {offsets = [48, 0], sizes = [8, 24], strides = [1, 1]} : vector<64x24xf32> to vector<8x24xf32>
    %404 = vector.extract_strided_slice %322 {offsets = [0, 16], sizes = [24, 8], strides = [1, 1]} : vector<24x32xf32> to vector<24x8xf32>
    %cst_238 = arith.constant dense<0.000000e+00> : vector<8x8xf32>
    %405 = tpu.matmul %403, %404, %cst_238 {dimension_numbers = #tpu.dot_dimension_numbers<[1], [0], [0], [1], [0, 0, 1, 1], [], []>} : vector<8x24xf32>, vector<24x8xf32>, vector<8x8xf32> -> vector<8x8xf32>
    %c448_239 = arith.constant 448 : index
    %c0_240 = arith.constant 0 : index
    %406 = vector.load %arg4[%c448_239, %c0_240] : memref<752x128xf32, #tpu.memory_space<vmem>>, vector<8x32xf32>
    %cst_241 = arith.constant dense<0.000000e+00> : vector<8x32xf32>
    %407 = tpu.matmul %405, %406, %cst_241 {dimension_numbers = #tpu.dot_dimension_numbers<[1], [0], [0], [1], [0, 0, 1, 1], [], []>} : vector<8x8xf32>, vector<8x32xf32>, vector<8x32xf32> -> vector<8x32xf32>
    %408 = arith.addf %402, %407 : vector<8x32xf32>
    %409 = vector.extract_strided_slice %368 {offsets = [56, 0], sizes = [8, 24], strides = [1, 1]} : vector<64x24xf32> to vector<8x24xf32>
    %410 = vector.extract_strided_slice %322 {offsets = [0, 24], sizes = [24, 8], strides = [1, 1]} : vector<24x32xf32> to vector<24x8xf32>
    %cst_242 = arith.constant dense<0.000000e+00> : vector<8x8xf32>
    %411 = tpu.matmul %409, %410, %cst_242 {dimension_numbers = #tpu.dot_dimension_numbers<[1], [0], [0], [1], [0, 0, 1, 1], [], []>} : vector<8x24xf32>, vector<24x8xf32>, vector<8x8xf32> -> vector<8x8xf32>
    %c456_243 = arith.constant 456 : index
    %c0_244 = arith.constant 0 : index
    %412 = vector.load %arg4[%c456_243, %c0_244] : memref<752x128xf32, #tpu.memory_space<vmem>>, vector<8x32xf32>
    %cst_245 = arith.constant dense<0.000000e+00> : vector<8x32xf32>
    %413 = tpu.matmul %411, %412, %cst_245 {dimension_numbers = #tpu.dot_dimension_numbers<[1], [0], [0], [1], [0, 0, 1, 1], [], []>} : vector<8x8xf32>, vector<8x32xf32>, vector<8x32xf32> -> vector<8x32xf32>
    %414 = arith.addf %408, %413 : vector<8x32xf32>
    %415 = tpu.concatenate %391, %414 in 0 : vector<8x32xf32>, vector<8x32xf32> -> vector<16x32xf32>
    %416 = arith.addf %269, %415 : vector<16x32xf32>
    %c9 = arith.constant 9 : index
    %c0_246 = arith.constant 0 : index
    %417 = vector.load %arg5[%c9, %c0_246] : memref<24x128xf32, #tpu.memory_space<vmem>>, vector<1x32xf32>
    %418 = vector.broadcast %417 : vector<1x32xf32> to vector<16x32xf32>
    %419 = arith.addf %416, %418 : vector<16x32xf32>
    %c10 = arith.constant 10 : index
    %c0_247 = arith.constant 0 : index
    %420 = vector.load %arg5[%c10, %c0_247] : memref<24x128xf32, #tpu.memory_space<vmem>>, vector<1x32xf32>
    %c11 = arith.constant 11 : index
    %c0_248 = arith.constant 0 : index
    %421 = vector.load %arg5[%c11, %c0_248] : memref<24x128xf32, #tpu.memory_space<vmem>>, vector<1x32xf32>
    %cst_249 = arith.constant dense<0.000000e+00> : vector<16xf32>
    %422 = vector.multi_reduction <add>, %419, %cst_249 [1] : vector<16x32xf32> to vector<16xf32>
    %423 = vector.shape_cast %422 : vector<16xf32> to vector<16x1xf32>
    %cst_250 = arith.constant 3.200000e+01 : f32
    %424 = vector.broadcast %cst_250 : f32 to vector<16x1xf32>
    %425 = arith.divf %423, %424 : vector<16x1xf32>
    %426 = vector.broadcast %425 : vector<16x1xf32> to vector<16x32xf32>
    %427 = arith.subf %419, %426 : vector<16x32xf32>
    %428 = arith.mulf %427, %427 : vector<16x32xf32>
    %cst_251 = arith.constant dense<0.000000e+00> : vector<16xf32>
    %429 = vector.multi_reduction <add>, %428, %cst_251 [1] : vector<16x32xf32> to vector<16xf32>
    %430 = vector.shape_cast %429 : vector<16xf32> to vector<16x1xf32>
    %cst_252 = arith.constant 3.200000e+01 : f32
    %431 = vector.broadcast %cst_252 : f32 to vector<16x1xf32>
    %432 = arith.divf %430, %431 : vector<16x1xf32>
    %433 = vector.broadcast %425 : vector<16x1xf32> to vector<16x32xf32>
    %434 = arith.subf %419, %433 : vector<16x32xf32>
    %cst_253 = arith.constant 9.99999974E-6 : f32
    %435 = vector.broadcast %cst_253 : f32 to vector<16x1xf32>
    %436 = arith.addf %432, %435 : vector<16x1xf32>
    %437 = math.rsqrt %436 : vector<16x1xf32>
    %438 = vector.broadcast %437 : vector<16x1xf32> to vector<16x32xf32>
    %439 = arith.mulf %434, %438 : vector<16x32xf32>
    %440 = vector.broadcast %420 : vector<1x32xf32> to vector<16x32xf32>
    %441 = arith.mulf %439, %440 : vector<16x32xf32>
    %442 = vector.broadcast %421 : vector<1x32xf32> to vector<16x32xf32>
    %443 = arith.addf %441, %442 : vector<16x32xf32>
    %c464 = arith.constant 464 : index
    %c0_254 = arith.constant 0 : index
    %444 = vector.load %arg4[%c464, %c0_254] : memref<752x128xf32, #tpu.memory_space<vmem>>, vector<32x64xf32>
    %cst_255 = arith.constant dense<0.000000e+00> : vector<16x64xf32>
    %445 = tpu.matmul %443, %444, %cst_255 {dimension_numbers = #tpu.dot_dimension_numbers<[1], [0], [0], [1], [0, 0, 1, 1], [], []>} : vector<16x32xf32>, vector<32x64xf32>, vector<16x64xf32> -> vector<16x64xf32>
    %c12 = arith.constant 12 : index
    %c0_256 = arith.constant 0 : index
    %446 = vector.load %arg5[%c12, %c0_256] : memref<24x128xf32, #tpu.memory_space<vmem>>, vector<1x64xf32>
    %447 = vector.broadcast %446 : vector<1x64xf32> to vector<16x64xf32>
    %448 = arith.addf %445, %447 : vector<16x64xf32>
    %cst_257 = arith.constant 0.000000e+00 : f32
    %449 = vector.broadcast %cst_257 : f32 to vector<16x64xf32>
    %450 = arith.maximumf %448, %449 : vector<16x64xf32>
    %c496 = arith.constant 496 : index
    %c0_258 = arith.constant 0 : index
    %451 = vector.load %arg4[%c496, %c0_258] : memref<752x128xf32, #tpu.memory_space<vmem>>, vector<64x32xf32>
    %cst_259 = arith.constant dense<0.000000e+00> : vector<16x32xf32>
    %452 = tpu.matmul %450, %451, %cst_259 {dimension_numbers = #tpu.dot_dimension_numbers<[1], [0], [0], [1], [0, 0, 1, 1], [], []>} : vector<16x64xf32>, vector<64x32xf32>, vector<16x32xf32> -> vector<16x32xf32>
    %453 = arith.addf %419, %452 : vector<16x32xf32>
    %c13 = arith.constant 13 : index
    %c0_260 = arith.constant 0 : index
    %454 = vector.load %arg5[%c13, %c0_260] : memref<24x128xf32, #tpu.memory_space<vmem>>, vector<1x32xf32>
    %455 = vector.broadcast %454 : vector<1x32xf32> to vector<16x32xf32>
    %456 = arith.addf %453, %455 : vector<16x32xf32>
    %c14 = arith.constant 14 : index
    %c0_261 = arith.constant 0 : index
    %457 = vector.load %arg5[%c14, %c0_261] : memref<24x128xf32, #tpu.memory_space<vmem>>, vector<1x32xf32>
    %c15 = arith.constant 15 : index
    %c0_262 = arith.constant 0 : index
    %458 = vector.load %arg5[%c15, %c0_262] : memref<24x128xf32, #tpu.memory_space<vmem>>, vector<1x32xf32>
    %cst_263 = arith.constant dense<0.000000e+00> : vector<16xf32>
    %459 = vector.multi_reduction <add>, %456, %cst_263 [1] : vector<16x32xf32> to vector<16xf32>
    %460 = vector.shape_cast %459 : vector<16xf32> to vector<16x1xf32>
    %cst_264 = arith.constant 3.200000e+01 : f32
    %461 = vector.broadcast %cst_264 : f32 to vector<16x1xf32>
    %462 = arith.divf %460, %461 : vector<16x1xf32>
    %463 = vector.broadcast %462 : vector<16x1xf32> to vector<16x32xf32>
    %464 = arith.subf %456, %463 : vector<16x32xf32>
    %465 = arith.mulf %464, %464 : vector<16x32xf32>
    %cst_265 = arith.constant dense<0.000000e+00> : vector<16xf32>
    %466 = vector.multi_reduction <add>, %465, %cst_265 [1] : vector<16x32xf32> to vector<16xf32>
    %467 = vector.shape_cast %466 : vector<16xf32> to vector<16x1xf32>
    %cst_266 = arith.constant 3.200000e+01 : f32
    %468 = vector.broadcast %cst_266 : f32 to vector<16x1xf32>
    %469 = arith.divf %467, %468 : vector<16x1xf32>
    %470 = vector.broadcast %462 : vector<16x1xf32> to vector<16x32xf32>
    %471 = arith.subf %456, %470 : vector<16x32xf32>
    %cst_267 = arith.constant 9.99999974E-6 : f32
    %472 = vector.broadcast %cst_267 : f32 to vector<16x1xf32>
    %473 = arith.addf %469, %472 : vector<16x1xf32>
    %474 = math.rsqrt %473 : vector<16x1xf32>
    %475 = vector.broadcast %474 : vector<16x1xf32> to vector<16x32xf32>
    %476 = arith.mulf %471, %475 : vector<16x32xf32>
    %477 = vector.broadcast %457 : vector<1x32xf32> to vector<16x32xf32>
    %478 = arith.mulf %476, %477 : vector<16x32xf32>
    %479 = vector.broadcast %458 : vector<1x32xf32> to vector<16x32xf32>
    %480 = arith.addf %478, %479 : vector<16x32xf32>
    %c560 = arith.constant 560 : index
    %c0_268 = arith.constant 0 : index
    %481 = vector.load %arg4[%c560, %c0_268] : memref<752x128xf32, #tpu.memory_space<vmem>>, vector<32x96xf32>
    %cst_269 = arith.constant dense<0.000000e+00> : vector<16x96xf32>
    %482 = tpu.matmul %480, %481, %cst_269 {dimension_numbers = #tpu.dot_dimension_numbers<[1], [0], [0], [1], [0, 0, 1, 1], [], []>} : vector<16x32xf32>, vector<32x96xf32>, vector<16x96xf32> -> vector<16x96xf32>
    %c16_270 = arith.constant 16 : index
    %c0_271 = arith.constant 0 : index
    %483 = vector.load %arg5[%c16_270, %c0_271] : memref<24x128xf32, #tpu.memory_space<vmem>>, vector<1x96xf32>
    %484 = vector.broadcast %483 : vector<1x96xf32> to vector<16x96xf32>
    %485 = arith.addf %482, %484 : vector<16x96xf32>
    %486 = vector.extract_strided_slice %485 {offsets = [0, 0], sizes = [16, 32], strides = [1, 1]} : vector<16x96xf32> to vector<16x32xf32>
    %cst_272 = arith.constant 0.353553385 : f32
    %487 = vector.broadcast %cst_272 : f32 to vector<16x32xf32>
    %488 = arith.mulf %486, %487 : vector<16x32xf32>
    %489 = vector.extract_strided_slice %485 {offsets = [0, 32], sizes = [16, 32], strides = [1, 1]} : vector<16x96xf32> to vector<16x32xf32>
    %490 = vector.extract_strided_slice %485 {offsets = [0, 64], sizes = [16, 32], strides = [1, 1]} : vector<16x96xf32> to vector<16x32xf32>
    %c2_273 = arith.constant 2 : index
    %c0_274 = arith.constant 0 : index
    %c0_275 = arith.constant 0 : index
    %491 = vector.load %arg3[%c2_273, %c0_274, %c0_275] : memref<4x32x32xf32, #tpu.memory_space<vmem>>, vector<1x32x32xf32>
    %492 = vector.shape_cast %491 : vector<1x32x32xf32> to vector<32x32xf32>
    %c3 = arith.constant 3 : index
    %c0_276 = arith.constant 0 : index
    %c0_277 = arith.constant 0 : index
    %493 = vector.load %arg3[%c3, %c0_276, %c0_277] : memref<4x32x32xf32, #tpu.memory_space<vmem>>, vector<1x32x32xf32>
    %494 = vector.shape_cast %493 : vector<1x32x32xf32> to vector<32x32xf32>
    %495 = vector.extract_strided_slice %492 {offsets = [0, 0], sizes = [16, 32], strides = [1, 1]} : vector<32x32xf32> to vector<16x32xf32>
    %496 = vector.extract_strided_slice %489 {offsets = [0, 0], sizes = [8, 32], strides = [1, 1]} : vector<16x32xf32> to vector<8x32xf32>
    %497 = tpu.concatenate %495, %496 in 0 : vector<16x32xf32>, vector<8x32xf32> -> vector<24x32xf32>
    %498 = vector.extract_strided_slice %494 {offsets = [0, 0], sizes = [16, 32], strides = [1, 1]} : vector<32x32xf32> to vector<16x32xf32>
    %499 = vector.extract_strided_slice %490 {offsets = [0, 0], sizes = [8, 32], strides = [1, 1]} : vector<16x32xf32> to vector<8x32xf32>
    %500 = tpu.concatenate %498, %499 in 0 : vector<16x32xf32>, vector<8x32xf32> -> vector<24x32xf32>
    %501 = vector.extract_strided_slice %497 {offsets = [8, 0], sizes = [16, 32], strides = [1, 1]} : vector<24x32xf32> to vector<16x32xf32>
    %502 = vector.extract_strided_slice %500 {offsets = [8, 0], sizes = [16, 32], strides = [1, 1]} : vector<24x32xf32> to vector<16x32xf32>
    %503 = vector.extract_strided_slice %492 {offsets = [16, 0], sizes = [16, 32], strides = [1, 1]} : vector<32x32xf32> to vector<16x32xf32>
    %504 = vector.extract_strided_slice %489 {offsets = [8, 0], sizes = [8, 32], strides = [1, 1]} : vector<16x32xf32> to vector<8x32xf32>
    %505 = tpu.concatenate %503, %504 in 0 : vector<16x32xf32>, vector<8x32xf32> -> vector<24x32xf32>
    %506 = vector.extract_strided_slice %494 {offsets = [16, 0], sizes = [16, 32], strides = [1, 1]} : vector<32x32xf32> to vector<16x32xf32>
    %507 = vector.extract_strided_slice %490 {offsets = [8, 0], sizes = [8, 32], strides = [1, 1]} : vector<16x32xf32> to vector<8x32xf32>
    %508 = tpu.concatenate %506, %507 in 0 : vector<16x32xf32>, vector<8x32xf32> -> vector<24x32xf32>
    %509 = vector.extract_strided_slice %505 {offsets = [8, 0], sizes = [16, 32], strides = [1, 1]} : vector<24x32xf32> to vector<16x32xf32>
    %510 = vector.extract_strided_slice %508 {offsets = [8, 0], sizes = [16, 32], strides = [1, 1]} : vector<24x32xf32> to vector<16x32xf32>
    %511 = tpu.concatenate %501, %509 in 0 : vector<16x32xf32>, vector<16x32xf32> -> vector<32x32xf32>
    %c2_278 = arith.constant 2 : index
    %c0_279 = arith.constant 0 : index
    %c0_280 = arith.constant 0 : index
    %512 = vector.load %arg7[%c2_278, %c0_279, %c0_280] : memref<4x32x32xf32, #tpu.memory_space<vmem>>, vector<1x32x32xf32>
    %513 = vector.shape_cast %512 : vector<1x32x32xf32> to vector<32x32xf32>
    %514 = vector.shape_cast %511 : vector<32x32xf32> to vector<1x32x32xf32>
    tpu.vector_store %arg7[%c2_278, %c0_279, %c0_280], %514 {strides = array<i32>} : memref<4x32x32xf32, #tpu.memory_space<vmem>>, vector<1x32x32xf32>,
    %515 = tpu.concatenate %502, %510 in 0 : vector<16x32xf32>, vector<16x32xf32> -> vector<32x32xf32>
    %c3_281 = arith.constant 3 : index
    %c0_282 = arith.constant 0 : index
    %c0_283 = arith.constant 0 : index
    %516 = vector.load %arg7[%c3_281, %c0_282, %c0_283] : memref<4x32x32xf32, #tpu.memory_space<vmem>>, vector<1x32x32xf32>
    %517 = vector.shape_cast %516 : vector<1x32x32xf32> to vector<32x32xf32>
    %518 = vector.shape_cast %515 : vector<32x32xf32> to vector<1x32x32xf32>
    tpu.vector_store %arg7[%c3_281, %c0_282, %c0_283], %518 {strides = array<i32>} : memref<4x32x32xf32, #tpu.memory_space<vmem>>, vector<1x32x32xf32>,
    %519 = vector.extract_strided_slice %488 {offsets = [0, 0], sizes = [8, 8], strides = [1, 1]} : vector<16x32xf32> to vector<8x8xf32>
    %520 = vector.extract_strided_slice %497 {offsets = [0, 0], sizes = [24, 8], strides = [1, 1]} : vector<24x32xf32> to vector<24x8xf32>
    %cst_284 = arith.constant dense<0.000000e+00> : vector<8x24xf32>
    %521 = tpu.matmul %519, %520, %cst_284 {dimension_numbers = #tpu.dot_dimension_numbers<[1], [1], [0], [0], [0, 0, 1, 0], [], []>} : vector<8x8xf32>, vector<24x8xf32>, vector<8x24xf32> -> vector<8x24xf32>
    %522 = vector.extract_strided_slice %488 {offsets = [0, 8], sizes = [8, 8], strides = [1, 1]} : vector<16x32xf32> to vector<8x8xf32>
    %523 = vector.extract_strided_slice %497 {offsets = [0, 8], sizes = [24, 8], strides = [1, 1]} : vector<24x32xf32> to vector<24x8xf32>
    %cst_285 = arith.constant dense<0.000000e+00> : vector<8x24xf32>
    %524 = tpu.matmul %522, %523, %cst_285 {dimension_numbers = #tpu.dot_dimension_numbers<[1], [1], [0], [0], [0, 0, 1, 0], [], []>} : vector<8x8xf32>, vector<24x8xf32>, vector<8x24xf32> -> vector<8x24xf32>
    %525 = vector.extract_strided_slice %488 {offsets = [0, 16], sizes = [8, 8], strides = [1, 1]} : vector<16x32xf32> to vector<8x8xf32>
    %526 = vector.extract_strided_slice %497 {offsets = [0, 16], sizes = [24, 8], strides = [1, 1]} : vector<24x32xf32> to vector<24x8xf32>
    %cst_286 = arith.constant dense<0.000000e+00> : vector<8x24xf32>
    %527 = tpu.matmul %525, %526, %cst_286 {dimension_numbers = #tpu.dot_dimension_numbers<[1], [1], [0], [0], [0, 0, 1, 0], [], []>} : vector<8x8xf32>, vector<24x8xf32>, vector<8x24xf32> -> vector<8x24xf32>
    %528 = vector.extract_strided_slice %488 {offsets = [0, 24], sizes = [8, 8], strides = [1, 1]} : vector<16x32xf32> to vector<8x8xf32>
    %529 = vector.extract_strided_slice %497 {offsets = [0, 24], sizes = [24, 8], strides = [1, 1]} : vector<24x32xf32> to vector<24x8xf32>
    %cst_287 = arith.constant dense<0.000000e+00> : vector<8x24xf32>
    %530 = tpu.matmul %528, %529, %cst_287 {dimension_numbers = #tpu.dot_dimension_numbers<[1], [1], [0], [0], [0, 0, 1, 0], [], []>} : vector<8x8xf32>, vector<24x8xf32>, vector<8x24xf32> -> vector<8x24xf32>
    %531 = vector.extract_strided_slice %488 {offsets = [8, 0], sizes = [8, 8], strides = [1, 1]} : vector<16x32xf32> to vector<8x8xf32>
    %532 = vector.extract_strided_slice %505 {offsets = [0, 0], sizes = [24, 8], strides = [1, 1]} : vector<24x32xf32> to vector<24x8xf32>
    %cst_288 = arith.constant dense<0.000000e+00> : vector<8x24xf32>
    %533 = tpu.matmul %531, %532, %cst_288 {dimension_numbers = #tpu.dot_dimension_numbers<[1], [1], [0], [0], [0, 0, 1, 0], [], []>} : vector<8x8xf32>, vector<24x8xf32>, vector<8x24xf32> -> vector<8x24xf32>
    %534 = vector.extract_strided_slice %488 {offsets = [8, 8], sizes = [8, 8], strides = [1, 1]} : vector<16x32xf32> to vector<8x8xf32>
    %535 = vector.extract_strided_slice %505 {offsets = [0, 8], sizes = [24, 8], strides = [1, 1]} : vector<24x32xf32> to vector<24x8xf32>
    %cst_289 = arith.constant dense<0.000000e+00> : vector<8x24xf32>
    %536 = tpu.matmul %534, %535, %cst_289 {dimension_numbers = #tpu.dot_dimension_numbers<[1], [1], [0], [0], [0, 0, 1, 0], [], []>} : vector<8x8xf32>, vector<24x8xf32>, vector<8x24xf32> -> vector<8x24xf32>
    %537 = vector.extract_strided_slice %488 {offsets = [8, 16], sizes = [8, 8], strides = [1, 1]} : vector<16x32xf32> to vector<8x8xf32>
    %538 = vector.extract_strided_slice %505 {offsets = [0, 16], sizes = [24, 8], strides = [1, 1]} : vector<24x32xf32> to vector<24x8xf32>
    %cst_290 = arith.constant dense<0.000000e+00> : vector<8x24xf32>
    %539 = tpu.matmul %537, %538, %cst_290 {dimension_numbers = #tpu.dot_dimension_numbers<[1], [1], [0], [0], [0, 0, 1, 0], [], []>} : vector<8x8xf32>, vector<24x8xf32>, vector<8x24xf32> -> vector<8x24xf32>
    %540 = vector.extract_strided_slice %488 {offsets = [8, 24], sizes = [8, 8], strides = [1, 1]} : vector<16x32xf32> to vector<8x8xf32>
    %541 = vector.extract_strided_slice %505 {offsets = [0, 24], sizes = [24, 8], strides = [1, 1]} : vector<24x32xf32> to vector<24x8xf32>
    %cst_291 = arith.constant dense<0.000000e+00> : vector<8x24xf32>
    %542 = tpu.matmul %540, %541, %cst_291 {dimension_numbers = #tpu.dot_dimension_numbers<[1], [1], [0], [0], [0, 0, 1, 0], [], []>} : vector<8x8xf32>, vector<24x8xf32>, vector<8x24xf32> -> vector<8x24xf32>
    %543 = tpu.concatenate %521, %524, %527, %530, %533, %536, %539, %542 in 0 : vector<8x24xf32>, vector<8x24xf32>, vector<8x24xf32>, vector<8x24xf32>, vector<8x24xf32>, vector<8x24xf32>, vector<8x24xf32>, vector<8x24xf32> -> vector<64x24xf32>
    %544 = arith.addf %543, %270 : vector<64x24xf32>
    %cst_292 = arith.constant dense<0xFF800000> : vector<64xf32>
    %545 = vector.multi_reduction <maximumf>, %544, %cst_292 [1] : vector<64x24xf32> to vector<64xf32>
    %546 = vector.shape_cast %545 : vector<64xf32> to vector<64x1xf32>
    %547 = vector.broadcast %546 : vector<64x1xf32> to vector<64x24xf32>
    %548 = arith.subf %544, %547 : vector<64x24xf32>
    %549 = math.exp %548 : vector<64x24xf32>
    %cst_293 = arith.constant dense<0.000000e+00> : vector<64xf32>
    %550 = vector.multi_reduction <add>, %549, %cst_293 [1] : vector<64x24xf32> to vector<64xf32>
    %551 = vector.shape_cast %550 : vector<64xf32> to vector<64x1xf32>
    %552 = tpu.reciprocal %551 {approx = true} : vector<64x1xf32> -> vector<64x1xf32>
    %553 = vector.broadcast %552 : vector<64x1xf32> to vector<64x24xf32>
    %554 = arith.mulf %549, %553 : vector<64x24xf32>
    %555 = vector.extract_strided_slice %554 {offsets = [0, 0], sizes = [8, 24], strides = [1, 1]} : vector<64x24xf32> to vector<8x24xf32>
    %556 = vector.extract_strided_slice %500 {offsets = [0, 0], sizes = [24, 8], strides = [1, 1]} : vector<24x32xf32> to vector<24x8xf32>
    %cst_294 = arith.constant dense<0.000000e+00> : vector<8x8xf32>
    %557 = tpu.matmul %555, %556, %cst_294 {dimension_numbers = #tpu.dot_dimension_numbers<[1], [0], [0], [1], [0, 0, 1, 1], [], []>} : vector<8x24xf32>, vector<24x8xf32>, vector<8x8xf32> -> vector<8x8xf32>
    %c592 = arith.constant 592 : index
    %c0_295 = arith.constant 0 : index
    %558 = vector.load %arg4[%c592, %c0_295] : memref<752x128xf32, #tpu.memory_space<vmem>>, vector<8x32xf32>
    %cst_296 = arith.constant dense<0.000000e+00> : vector<8x32xf32>
    %559 = tpu.matmul %557, %558, %cst_296 {dimension_numbers = #tpu.dot_dimension_numbers<[1], [0], [0], [1], [0, 0, 1, 1], [], []>} : vector<8x8xf32>, vector<8x32xf32>, vector<8x32xf32> -> vector<8x32xf32>
    %560 = vector.extract_strided_slice %554 {offsets = [8, 0], sizes = [8, 24], strides = [1, 1]} : vector<64x24xf32> to vector<8x24xf32>
    %561 = vector.extract_strided_slice %500 {offsets = [0, 8], sizes = [24, 8], strides = [1, 1]} : vector<24x32xf32> to vector<24x8xf32>
    %cst_297 = arith.constant dense<0.000000e+00> : vector<8x8xf32>
    %562 = tpu.matmul %560, %561, %cst_297 {dimension_numbers = #tpu.dot_dimension_numbers<[1], [0], [0], [1], [0, 0, 1, 1], [], []>} : vector<8x24xf32>, vector<24x8xf32>, vector<8x8xf32> -> vector<8x8xf32>
    %c600 = arith.constant 600 : index
    %c0_298 = arith.constant 0 : index
    %563 = vector.load %arg4[%c600, %c0_298] : memref<752x128xf32, #tpu.memory_space<vmem>>, vector<8x32xf32>
    %cst_299 = arith.constant dense<0.000000e+00> : vector<8x32xf32>
    %564 = tpu.matmul %562, %563, %cst_299 {dimension_numbers = #tpu.dot_dimension_numbers<[1], [0], [0], [1], [0, 0, 1, 1], [], []>} : vector<8x8xf32>, vector<8x32xf32>, vector<8x32xf32> -> vector<8x32xf32>
    %565 = arith.addf %559, %564 : vector<8x32xf32>
    %566 = vector.extract_strided_slice %554 {offsets = [16, 0], sizes = [8, 24], strides = [1, 1]} : vector<64x24xf32> to vector<8x24xf32>
    %567 = vector.extract_strided_slice %500 {offsets = [0, 16], sizes = [24, 8], strides = [1, 1]} : vector<24x32xf32> to vector<24x8xf32>
    %cst_300 = arith.constant dense<0.000000e+00> : vector<8x8xf32>
    %568 = tpu.matmul %566, %567, %cst_300 {dimension_numbers = #tpu.dot_dimension_numbers<[1], [0], [0], [1], [0, 0, 1, 1], [], []>} : vector<8x24xf32>, vector<24x8xf32>, vector<8x8xf32> -> vector<8x8xf32>
    %c608 = arith.constant 608 : index
    %c0_301 = arith.constant 0 : index
    %569 = vector.load %arg4[%c608, %c0_301] : memref<752x128xf32, #tpu.memory_space<vmem>>, vector<8x32xf32>
    %cst_302 = arith.constant dense<0.000000e+00> : vector<8x32xf32>
    %570 = tpu.matmul %568, %569, %cst_302 {dimension_numbers = #tpu.dot_dimension_numbers<[1], [0], [0], [1], [0, 0, 1, 1], [], []>} : vector<8x8xf32>, vector<8x32xf32>, vector<8x32xf32> -> vector<8x32xf32>
    %571 = arith.addf %565, %570 : vector<8x32xf32>
    %572 = vector.extract_strided_slice %554 {offsets = [24, 0], sizes = [8, 24], strides = [1, 1]} : vector<64x24xf32> to vector<8x24xf32>
    %573 = vector.extract_strided_slice %500 {offsets = [0, 24], sizes = [24, 8], strides = [1, 1]} : vector<24x32xf32> to vector<24x8xf32>
    %cst_303 = arith.constant dense<0.000000e+00> : vector<8x8xf32>
    %574 = tpu.matmul %572, %573, %cst_303 {dimension_numbers = #tpu.dot_dimension_numbers<[1], [0], [0], [1], [0, 0, 1, 1], [], []>} : vector<8x24xf32>, vector<24x8xf32>, vector<8x8xf32> -> vector<8x8xf32>
    %c616 = arith.constant 616 : index
    %c0_304 = arith.constant 0 : index
    %575 = vector.load %arg4[%c616, %c0_304] : memref<752x128xf32, #tpu.memory_space<vmem>>, vector<8x32xf32>
    %cst_305 = arith.constant dense<0.000000e+00> : vector<8x32xf32>
    %576 = tpu.matmul %574, %575, %cst_305 {dimension_numbers = #tpu.dot_dimension_numbers<[1], [0], [0], [1], [0, 0, 1, 1], [], []>} : vector<8x8xf32>, vector<8x32xf32>, vector<8x32xf32> -> vector<8x32xf32>
    %577 = arith.addf %571, %576 : vector<8x32xf32>
    %578 = vector.extract_strided_slice %554 {offsets = [32, 0], sizes = [8, 24], strides = [1, 1]} : vector<64x24xf32> to vector<8x24xf32>
    %579 = vector.extract_strided_slice %508 {offsets = [0, 0], sizes = [24, 8], strides = [1, 1]} : vector<24x32xf32> to vector<24x8xf32>
    %cst_306 = arith.constant dense<0.000000e+00> : vector<8x8xf32>
    %580 = tpu.matmul %578, %579, %cst_306 {dimension_numbers = #tpu.dot_dimension_numbers<[1], [0], [0], [1], [0, 0, 1, 1], [], []>} : vector<8x24xf32>, vector<24x8xf32>, vector<8x8xf32> -> vector<8x8xf32>
    %c592_307 = arith.constant 592 : index
    %c0_308 = arith.constant 0 : index
    %581 = vector.load %arg4[%c592_307, %c0_308] : memref<752x128xf32, #tpu.memory_space<vmem>>, vector<8x32xf32>
    %cst_309 = arith.constant dense<0.000000e+00> : vector<8x32xf32>
    %582 = tpu.matmul %580, %581, %cst_309 {dimension_numbers = #tpu.dot_dimension_numbers<[1], [0], [0], [1], [0, 0, 1, 1], [], []>} : vector<8x8xf32>, vector<8x32xf32>, vector<8x32xf32> -> vector<8x32xf32>
    %583 = vector.extract_strided_slice %554 {offsets = [40, 0], sizes = [8, 24], strides = [1, 1]} : vector<64x24xf32> to vector<8x24xf32>
    %584 = vector.extract_strided_slice %508 {offsets = [0, 8], sizes = [24, 8], strides = [1, 1]} : vector<24x32xf32> to vector<24x8xf32>
    %cst_310 = arith.constant dense<0.000000e+00> : vector<8x8xf32>
    %585 = tpu.matmul %583, %584, %cst_310 {dimension_numbers = #tpu.dot_dimension_numbers<[1], [0], [0], [1], [0, 0, 1, 1], [], []>} : vector<8x24xf32>, vector<24x8xf32>, vector<8x8xf32> -> vector<8x8xf32>
    %c600_311 = arith.constant 600 : index
    %c0_312 = arith.constant 0 : index
    %586 = vector.load %arg4[%c600_311, %c0_312] : memref<752x128xf32, #tpu.memory_space<vmem>>, vector<8x32xf32>
    %cst_313 = arith.constant dense<0.000000e+00> : vector<8x32xf32>
    %587 = tpu.matmul %585, %586, %cst_313 {dimension_numbers = #tpu.dot_dimension_numbers<[1], [0], [0], [1], [0, 0, 1, 1], [], []>} : vector<8x8xf32>, vector<8x32xf32>, vector<8x32xf32> -> vector<8x32xf32>
    %588 = arith.addf %582, %587 : vector<8x32xf32>
    %589 = vector.extract_strided_slice %554 {offsets = [48, 0], sizes = [8, 24], strides = [1, 1]} : vector<64x24xf32> to vector<8x24xf32>
    %590 = vector.extract_strided_slice %508 {offsets = [0, 16], sizes = [24, 8], strides = [1, 1]} : vector<24x32xf32> to vector<24x8xf32>
    %cst_314 = arith.constant dense<0.000000e+00> : vector<8x8xf32>
    %591 = tpu.matmul %589, %590, %cst_314 {dimension_numbers = #tpu.dot_dimension_numbers<[1], [0], [0], [1], [0, 0, 1, 1], [], []>} : vector<8x24xf32>, vector<24x8xf32>, vector<8x8xf32> -> vector<8x8xf32>
    %c608_315 = arith.constant 608 : index
    %c0_316 = arith.constant 0 : index
    %592 = vector.load %arg4[%c608_315, %c0_316] : memref<752x128xf32, #tpu.memory_space<vmem>>, vector<8x32xf32>
    %cst_317 = arith.constant dense<0.000000e+00> : vector<8x32xf32>
    %593 = tpu.matmul %591, %592, %cst_317 {dimension_numbers = #tpu.dot_dimension_numbers<[1], [0], [0], [1], [0, 0, 1, 1], [], []>} : vector<8x8xf32>, vector<8x32xf32>, vector<8x32xf32> -> vector<8x32xf32>
    %594 = arith.addf %588, %593 : vector<8x32xf32>
    %595 = vector.extract_strided_slice %554 {offsets = [56, 0], sizes = [8, 24], strides = [1, 1]} : vector<64x24xf32> to vector<8x24xf32>
    %596 = vector.extract_strided_slice %508 {offsets = [0, 24], sizes = [24, 8], strides = [1, 1]} : vector<24x32xf32> to vector<24x8xf32>
    %cst_318 = arith.constant dense<0.000000e+00> : vector<8x8xf32>
    %597 = tpu.matmul %595, %596, %cst_318 {dimension_numbers = #tpu.dot_dimension_numbers<[1], [0], [0], [1], [0, 0, 1, 1], [], []>} : vector<8x24xf32>, vector<24x8xf32>, vector<8x8xf32> -> vector<8x8xf32>
    %c616_319 = arith.constant 616 : index
    %c0_320 = arith.constant 0 : index
    %598 = vector.load %arg4[%c616_319, %c0_320] : memref<752x128xf32, #tpu.memory_space<vmem>>, vector<8x32xf32>
    %cst_321 = arith.constant dense<0.000000e+00> : vector<8x32xf32>
    %599 = tpu.matmul %597, %598, %cst_321 {dimension_numbers = #tpu.dot_dimension_numbers<[1], [0], [0], [1], [0, 0, 1, 1], [], []>} : vector<8x8xf32>, vector<8x32xf32>, vector<8x32xf32> -> vector<8x32xf32>
    %600 = arith.addf %594, %599 : vector<8x32xf32>
    %601 = tpu.concatenate %577, %600 in 0 : vector<8x32xf32>, vector<8x32xf32> -> vector<16x32xf32>
    %602 = arith.addf %456, %601 : vector<16x32xf32>
    %c17 = arith.constant 17 : index
    %c0_322 = arith.constant 0 : index
    %603 = vector.load %arg5[%c17, %c0_322] : memref<24x128xf32, #tpu.memory_space<vmem>>, vector<1x32xf32>
    %604 = vector.broadcast %603 : vector<1x32xf32> to vector<16x32xf32>
    %605 = arith.addf %602, %604 : vector<16x32xf32>
    %c18 = arith.constant 18 : index
    %c0_323 = arith.constant 0 : index
    %606 = vector.load %arg5[%c18, %c0_323] : memref<24x128xf32, #tpu.memory_space<vmem>>, vector<1x32xf32>
    %c19 = arith.constant 19 : index
    %c0_324 = arith.constant 0 : index
    %607 = vector.load %arg5[%c19, %c0_324] : memref<24x128xf32, #tpu.memory_space<vmem>>, vector<1x32xf32>
    %cst_325 = arith.constant dense<0.000000e+00> : vector<16xf32>
    %608 = vector.multi_reduction <add>, %605, %cst_325 [1] : vector<16x32xf32> to vector<16xf32>
    %609 = vector.shape_cast %608 : vector<16xf32> to vector<16x1xf32>
    %cst_326 = arith.constant 3.200000e+01 : f32
    %610 = vector.broadcast %cst_326 : f32 to vector<16x1xf32>
    %611 = arith.divf %609, %610 : vector<16x1xf32>
    %612 = vector.broadcast %611 : vector<16x1xf32> to vector<16x32xf32>
    %613 = arith.subf %605, %612 : vector<16x32xf32>
    %614 = arith.mulf %613, %613 : vector<16x32xf32>
    %cst_327 = arith.constant dense<0.000000e+00> : vector<16xf32>
    %615 = vector.multi_reduction <add>, %614, %cst_327 [1] : vector<16x32xf32> to vector<16xf32>
    %616 = vector.shape_cast %615 : vector<16xf32> to vector<16x1xf32>
    %cst_328 = arith.constant 3.200000e+01 : f32
    %617 = vector.broadcast %cst_328 : f32 to vector<16x1xf32>
    %618 = arith.divf %616, %617 : vector<16x1xf32>
    %619 = vector.broadcast %611 : vector<16x1xf32> to vector<16x32xf32>
    %620 = arith.subf %605, %619 : vector<16x32xf32>
    %cst_329 = arith.constant 9.99999974E-6 : f32
    %621 = vector.broadcast %cst_329 : f32 to vector<16x1xf32>
    %622 = arith.addf %618, %621 : vector<16x1xf32>
    %623 = math.rsqrt %622 : vector<16x1xf32>
    %624 = vector.broadcast %623 : vector<16x1xf32> to vector<16x32xf32>
    %625 = arith.mulf %620, %624 : vector<16x32xf32>
    %626 = vector.broadcast %606 : vector<1x32xf32> to vector<16x32xf32>
    %627 = arith.mulf %625, %626 : vector<16x32xf32>
    %628 = vector.broadcast %607 : vector<1x32xf32> to vector<16x32xf32>
    %629 = arith.addf %627, %628 : vector<16x32xf32>
    %c624 = arith.constant 624 : index
    %c0_330 = arith.constant 0 : index
    %630 = vector.load %arg4[%c624, %c0_330] : memref<752x128xf32, #tpu.memory_space<vmem>>, vector<32x64xf32>
    %cst_331 = arith.constant dense<0.000000e+00> : vector<16x64xf32>
    %631 = tpu.matmul %629, %630, %cst_331 {dimension_numbers = #tpu.dot_dimension_numbers<[1], [0], [0], [1], [0, 0, 1, 1], [], []>} : vector<16x32xf32>, vector<32x64xf32>, vector<16x64xf32> -> vector<16x64xf32>
    %c20 = arith.constant 20 : index
    %c0_332 = arith.constant 0 : index
    %632 = vector.load %arg5[%c20, %c0_332] : memref<24x128xf32, #tpu.memory_space<vmem>>, vector<1x64xf32>
    %633 = vector.broadcast %632 : vector<1x64xf32> to vector<16x64xf32>
    %634 = arith.addf %631, %633 : vector<16x64xf32>
    %cst_333 = arith.constant 0.000000e+00 : f32
    %635 = vector.broadcast %cst_333 : f32 to vector<16x64xf32>
    %636 = arith.maximumf %634, %635 : vector<16x64xf32>
    %c656 = arith.constant 656 : index
    %c0_334 = arith.constant 0 : index
    %637 = vector.load %arg4[%c656, %c0_334] : memref<752x128xf32, #tpu.memory_space<vmem>>, vector<64x32xf32>
    %cst_335 = arith.constant dense<0.000000e+00> : vector<16x32xf32>
    %638 = tpu.matmul %636, %637, %cst_335 {dimension_numbers = #tpu.dot_dimension_numbers<[1], [0], [0], [1], [0, 0, 1, 1], [], []>} : vector<16x64xf32>, vector<64x32xf32>, vector<16x32xf32> -> vector<16x32xf32>
    %639 = arith.addf %605, %638 : vector<16x32xf32>
    %c21 = arith.constant 21 : index
    %c0_336 = arith.constant 0 : index
    %640 = vector.load %arg5[%c21, %c0_336] : memref<24x128xf32, #tpu.memory_space<vmem>>, vector<1x32xf32>
    %641 = vector.broadcast %640 : vector<1x32xf32> to vector<16x32xf32>
    %642 = arith.addf %639, %641 : vector<16x32xf32>
    %c3_337 = arith.constant 3 : index
    %c0_338 = arith.constant 0 : index
    %643 = vector.load %arg5[%c3_337, %c0_338] : memref<24x128xf32, #tpu.memory_space<vmem>>, vector<1x32xf32>
    %c4 = arith.constant 4 : index
    %c0_339 = arith.constant 0 : index
    %644 = vector.load %arg5[%c4, %c0_339] : memref<24x128xf32, #tpu.memory_space<vmem>>, vector<1x32xf32>
    %cst_340 = arith.constant dense<0.000000e+00> : vector<16xf32>
    %645 = vector.multi_reduction <add>, %642, %cst_340 [1] : vector<16x32xf32> to vector<16xf32>
    %646 = vector.shape_cast %645 : vector<16xf32> to vector<16x1xf32>
    %cst_341 = arith.constant 3.200000e+01 : f32
    %647 = vector.broadcast %cst_341 : f32 to vector<16x1xf32>
    %648 = arith.divf %646, %647 : vector<16x1xf32>
    %649 = vector.broadcast %648 : vector<16x1xf32> to vector<16x32xf32>
    %650 = arith.subf %642, %649 : vector<16x32xf32>
    %651 = arith.mulf %650, %650 : vector<16x32xf32>
    %cst_342 = arith.constant dense<0.000000e+00> : vector<16xf32>
    %652 = vector.multi_reduction <add>, %651, %cst_342 [1] : vector<16x32xf32> to vector<16xf32>
    %653 = vector.shape_cast %652 : vector<16xf32> to vector<16x1xf32>
    %cst_343 = arith.constant 3.200000e+01 : f32
    %654 = vector.broadcast %cst_343 : f32 to vector<16x1xf32>
    %655 = arith.divf %653, %654 : vector<16x1xf32>
    %656 = vector.broadcast %648 : vector<16x1xf32> to vector<16x32xf32>
    %657 = arith.subf %642, %656 : vector<16x32xf32>
    %cst_344 = arith.constant 9.99999974E-6 : f32
    %658 = vector.broadcast %cst_344 : f32 to vector<16x1xf32>
    %659 = arith.addf %655, %658 : vector<16x1xf32>
    %660 = math.rsqrt %659 : vector<16x1xf32>
    %661 = vector.broadcast %660 : vector<16x1xf32> to vector<16x32xf32>
    %662 = arith.mulf %657, %661 : vector<16x32xf32>
    %663 = vector.broadcast %643 : vector<1x32xf32> to vector<16x32xf32>
    %664 = arith.mulf %662, %663 : vector<16x32xf32>
    %665 = vector.broadcast %644 : vector<1x32xf32> to vector<16x32xf32>
    %666 = arith.addf %664, %665 : vector<16x32xf32>
    %c0_345 = arith.constant 0 : index
    %c0_346 = arith.constant 0 : index
    %667 = vector.load %arg6[%c0_345, %c0_346] : memref<16x128xf32, #tpu.memory_space<vmem>>, vector<16x32xf32>
    tpu.vector_store %arg6[%c0_345, %c0_346], %666 {strides = array<i32>} : memref<16x128xf32, #tpu.memory_space<vmem>>, vector<16x32xf32>,
    %c720 = arith.constant 720 : index
    %c0_347 = arith.constant 0 : index
    %668 = vector.load %arg4[%c720, %c0_347] : memref<752x128xf32, #tpu.memory_space<vmem>>, vector<32x40xf32>
    %cst_348 = arith.constant dense<0.000000e+00> : vector<16x40xf32>
    %669 = tpu.matmul %666, %668, %cst_348 {dimension_numbers = #tpu.dot_dimension_numbers<[1], [0], [0], [1], [0, 0, 1, 1], [], []>} : vector<16x32xf32>, vector<32x40xf32>, vector<16x40xf32> -> vector<16x40xf32>
    %c5 = arith.constant 5 : index
    %c0_349 = arith.constant 0 : index
    %670 = vector.load %arg5[%c5, %c0_349] : memref<24x128xf32, #tpu.memory_space<vmem>>, vector<1x40xf32>
    %671 = vector.broadcast %670 : vector<1x40xf32> to vector<16x40xf32>
    %672 = arith.addf %669, %671 : vector<16x40xf32>
    %cst_350 = arith.constant dense<0xFF800000> : vector<16xf32>
    %673 = vector.multi_reduction <maximumf>, %672, %cst_350 [1] : vector<16x40xf32> to vector<16xf32>
    %674 = vector.shape_cast %673 : vector<16xf32> to vector<16x1xf32>
    %675 = vector.broadcast %674 : vector<16x1xf32> to vector<16x40xf32>
    %676 = arith.subf %672, %675 : vector<16x40xf32>
    %677 = math.exp %676 : vector<16x40xf32>
    %cst_351 = arith.constant dense<0.000000e+00> : vector<16xf32>
    %678 = vector.multi_reduction <add>, %677, %cst_351 [1] : vector<16x40xf32> to vector<16xf32>
    %679 = vector.shape_cast %678 : vector<16xf32> to vector<16x1xf32>
    %680 = math.log %679 : vector<16x1xf32>
    %681 = vector.broadcast %680 : vector<16x1xf32> to vector<16x40xf32>
    %682 = arith.subf %676, %681 : vector<16x40xf32>
    %c0_352 = arith.constant 0 : index
    %c32_353 = arith.constant 32 : index
    %683 = vector.load %arg6[%c0_352, %c32_353] : memref<16x128xf32, #tpu.memory_space<vmem>>, vector<16x40xf32>
    tpu.vector_store %arg6[%c0_352, %c32_353], %682 {strides = array<i32>} : memref<16x128xf32, #tpu.memory_space<vmem>>, vector<16x40xf32>,
    return
  }
}

</mosaic_0001>

<bundles_post_ra>
// kernel: streaming_encoder_forward.1
= control target key start
LH: loop header
LB: loop body
LE: loop exit
PB: predicated region body
PF: predicated region fallthrough
CT: control target
= control target key end

     0   :  { %vm33_vm0 = vcmask 130048   ;;  %s6238_s0 = inlined_call_operand.vmem [shape: f32[432,16], index: 0, kind: input, shape index: {}]   ;;  %s6239_s1 = inlined_call_operand.vmem [shape: f32[16,32], index: 1, kind: input, shape index: {}]   ;;  %s6240_s2 = inlined_call_operand.vmem [shape: f32[64,24], index: 2, kind: input, shape index: {}]   ;;  %s6241_s3 = inlined_call_operand.vmem [shape: f32[4,32,32], index: 3, kind: input, shape index: {}]   ;;  %s6242_s4 = inlined_call_operand.vmem [shape: f32[752,128], index: 4, kind: input, shape index: {}]   ;;  %s6243_s5 = inlined_call_operand.vmem [shape: f32[24,128], index: 5, kind: input, shape index: {}]   ;;  %s6244_s6 = inlined_call_operand.vmem [shape: f32[16,128], index: 6, kind: output, shape index: {0}]   ;;  %s6245_s7 = inlined_call_operand.hbm [shape: f32[4,32,32], index: 7, kind: output, shape index: {1}]  }
   0x1   :  { %v4721_v0 = vld [vmem:[%s6242_s4 + $0x8] sm:$0xff]  ;;  %v4726_v1 = vld [vmem:[%s6242_s4] sm:$0xff]  ;;  %v69_v3 = vld [vmem:[%s6238_s0 + $0x30] sm:$0xff] }
   0x2   :  { %54 = vmatpush.msra.mxu2 %v4721_v0  ;;  %91 = vmatpush.msra.mxu0 %v4721_v0  ;;  %v30_v2 = vld [vmem:[%s6238_s0] sm:$0xff]  ;;  %v70_v4 = vld [vmem:[%s6238_s0 + $0x38] sm:$0xff]  ;;  %v4745_v5 = vld [vmem:[%s6242_s4 + $0x48] sm:$0xff] }
   0x3   :  { %4446 = vmatpush.msra.mxu1 %v4721_v0  ;;  %v4750_v6 = vld [vmem:[%s6242_s4 + $0x40] sm:$0xff]  ;;  %v31_v7 = vld [vmem:[%s6238_s0 + $0x8] sm:$0xff] }
   0x4   :  { %55 = vmatpush.msra.mxu2 %v4726_v1  ;;  %92 = vmatpush.msra.mxu0 %v4726_v1  ;;  %v165_v8 = vld [vmem:[%s6238_s0 + $0x60] sm:$0xff] }
   0x5   :  { %4210 = vmatmul.msk.f32.vlgmr.msra.gmra.mxu2 %vm33_vm0, %v30_v2  ;;  %4212 = vmatmul.msk.f32.vlgmr.msra.gmra.mxu0 %vm33_vm0, %v69_v3 }
   0x6   :  { %4447 = vmatpush.msra.mxu1 %v4726_v1  ;;  %187 = vmatpush.msrb.mxu0 %v4721_v0 }
   0x7   :  { %4213 = vmatmul.msk.f32.vlgmr.msra.gmra.mxu1 %vm33_vm0, %v70_v4  ;;  %125 = vmatpush.msrb.mxu2 %v4745_v5 }
   0x8   :  { %188 = vmatpush.msrb.mxu0 %v4726_v1 }
   0x9   :  { %126 = vmatpush.msrb.mxu2 %v4750_v6 }
   0xa   :  { %323 = vmatpush.msra.mxu0 %v4721_v0 }
   0xc   :  { %324 = vmatpush.msra.mxu0 %v4726_v1 }
   0xd   :  { %13 = vsyncpa [#allocation3], 0  ;;  %4211 = vmatmul.msk.f32.gmra.mxu2 %vm33_vm0, %v31_v7  ;;  %4218 = vmatmul.msk.f32.vlgmr.msrb.gmra.mxu0 %vm33_vm0, %v165_v8  ;;  %v166_v9 = vld [vmem:[%s6238_s0 + $0x68] sm:$0xff]  ;;  %v4779_v10 = vld [vmem:[%s6242_s4 + $0x38] sm:$0xff]  ;;  %vm106_vm1 = vcmask 261120   ;;  %s4669_s29 = smov 120  }
   0xe   :  { %459 = vmatpush.msrb.mxu0 %v4721_v0  ;;  %127 = vmatpush.msrb.mxu2 %v4779_v10  ;;  %v4785_v11 = vld [vmem:[%s6242_s4 + $0x30] sm:$0xff]  ;;  %v4790_v12 = vld [vmem:[%s6242_s4 + $0x28] sm:$0xff]  ;;  %v4797_v13 = vld [vmem:[%s6242_s4 + $0x20] sm:$0xff]  ;;  %s4670_s9 = smov 112   ;;  %s4671_s12 = smov 96   ;;  %vm2045_vm9 = vcmask 64512  }
   0xf   :  { %154 = vmatpush.msra.mxu3 %v4790_v12  ;;  %v4804_v14 = vld [vmem:[%s6242_s4 + $0x18] sm:$0xff]  ;;  %v4811_v15 = vld [vmem:[%s6242_s4 + $0x10] sm:$0xff]  ;;  %v4817_v16 = vld [vmem:[%s6242_s4 + $0x68] sm:$0xff]  ;;  %s4672_s13 = smov 104   ;;  %s4673_s17 = smov 64   ;;  %vm2332_vm10 = vcmask 195584  }
  0x10   :  { %460 = vmatpush.msrb.mxu0 %v4726_v1  ;;  %128 = vmatpush.msrb.mxu2 %v4785_v11  ;;  %v4823_v17 = vld [vmem:[%s6242_s4 + $0x60] sm:$0xff]  ;;  %v4829_v18 = vld [vmem:[%s6242_s4 + $0x58] sm:$0xff]  ;;  %v4835_v19 = vld [vmem:[%s6242_s4 + $0x50] sm:$0xff]  ;;  %vm2958_vm14 = vcmask 523264   ;;  %s4196_s26 = sshll.u32 %s6245_s7, 4  ;;  %s4197_s26 = int_to_ptr.hbm [resolvable:$true] %s4196_s26 }
  0x11   :  { %155 = vmatpush.msra.mxu3 %v4797_v13  ;;  %220 = vmatpush.msrb.mxu1 %v4817_v16  ;;  %v4841_v20 = vld [vmem:[%s6243_s5] ss:$0 sm:$0xff]  ;;  %v302_v27 = vld [vmem:[%s6238_s0 + $0xc8] sm:$0xff]  ;;  %v233_v41 = vld [vmem:[%s6238_s0 + $0x90] sm:$0xff] }
  0x12   :  { %255 = vmatpush.msra.mxu2 %v4721_v0  ;;  %v301_v21 = vld [vmem:[%s6238_s0 + $0xc0] sm:$0xff]  ;;  %v438_v43 = vld [vmem:[%s6238_s0 + $0x128] sm:$0xff]  ;;  %v234_v44 = vld [vmem:[%s6238_s0 + $0x98] sm:$0xff] }
  0x13   :  { %156 = vmatpush.msra.mxu3 %v4804_v14  ;;  %221 = vmatpush.msrb.mxu1 %v4823_v17  ;;  %v437_v35 = vld [vmem:[%s6238_s0 + $0x120] sm:$0xff]  ;;  %v369_v46 = vld [vmem:[%s6238_s0 + $0xf0] sm:$0xff]  ;;  %v574_v47 = vld [vmem:[%s6238_s0 + $0x188] sm:$0xff] }
  0x14   :  { %256 = vmatpush.msra.mxu2 %v4726_v1  ;;  %v573_v45 = vld [vmem:[%s6238_s0 + $0x180] sm:$0xff]  ;;  %v370_v48 = vld [vmem:[%s6238_s0 + $0xf8] sm:$0xff]  ;;  %v505_v49 = vld [vmem:[%s6238_s0 + $0x150] sm:$0xff] }
  0x15   :  { %4219 = vmatmul.msk.f32.gmra.mxu0 %vm33_vm0, %v166_v9  ;;  %157 = vmatpush.msra.mxu3 %v4811_v15  ;;  %v506_v50 = vld [vmem:[%s6238_s0 + $0x158] sm:$0xff]  ;;  %v4922_v51 = vld [vmem:[%s6242_s4 + $0x88] sm:$0xff]  ;;  %v4928_v52 = vld [vmem:[%s6242_s4 + $0x80] sm:$0xff] }
  0x16   :  { %222 = vmatpush.msrb.mxu1 %v4829_v18  ;;  %v4934_v53 = vld [vmem:[%s6242_s4 + $0x78] sm:$0xff]  ;;  %v4940_v54 = vld [vmem:[%s6242_s4 + $0x70] sm:$0xff]  ;;  %v4946_v55 = vld [vmem:[%s6242_s4 + $0xa8] sm:$0xff] }
  0x17   :  { %288 = vmatpush.msrb.mxu3 %v4922_v51  ;;  %v4952_v56 = vld [vmem:[%s6242_s4 + $0xa0] sm:$0xff]  ;;  %v4959_v59 = vld [vmem:[%s6242_s4 + $0x98] sm:$0xff]  ;;  %v4965_v61 = vld [vmem:[%s6242_s4 + $0xc8] sm:$0xff] }
  0x18   :  { %223 = vmatpush.msrb.mxu1 %v4835_v19  ;;  %v4970_v62 = vld [vmem:[%s6242_s4 + $0x90] sm:$0xff]  ;;  %v4978_v63 = vld [vmem:[%s6242_s4 + $0xc0] sm:$0xff]  ;;  %v4987_v7 = vld [vmem:[%s6242_s4 + $0xb8] sm:$0xff] }
  0x19   :  { %289 = vmatpush.msrb.mxu3 %v4928_v52  ;;  %v4993_v9 = vld [vmem:[%s6242_s4 + $0xb0] sm:$0xff] }
  0x1a   :  { %356 = vmatpush.msra.mxu1 %v4946_v55 }
  0x1b   :  { %290 = vmatpush.msrb.mxu3 %v4934_v53 }
  0x1c   :  { %357 = vmatpush.msra.mxu1 %v4952_v56 }
  0x1d   :  { %4226 = vmatmul.msk.f32.vlgmr.msra.gmra.mxu0 %vm33_vm0, %v301_v21  ;;  %291 = vmatpush.msrb.mxu3 %v4940_v54  ;;  %v5000_v21 = vld [vmem:[%s6242_s4 + $0xe8] sm:$0xff] }
  0x1e   :  { %595 = vmatpush.msra.mxu0 %v4721_v0  ;;  %358 = vmatpush.msra.mxu1 %v4959_v59 }
  0x20   :  { %596 = vmatpush.msra.mxu0 %v4726_v1  ;;  %359 = vmatpush.msra.mxu1 %v4970_v62 }
  0x25   :  { %4227 = vmatmul.msk.f32.gmra.mxu0 %vm33_vm0, %v302_v27 }
  0x2d   :  { %4234 = vmatmul.msk.f32.vlgmr.msrb.gmra.mxu0 %vm33_vm0, %v437_v35  ;;  %v5035_v35 = vld [vmem:[%s6242_s4 + $0x108] sm:$0xff] }
  0x2e   :  { %734 = vmatpush.msrb.mxu0 %v4745_v5 }
  0x30   :  { %735 = vmatpush.msrb.mxu0 %v4750_v6 }
  0x32   :  { %736 = vmatpush.msrb.mxu0 %v4779_v10 }
  0x34   :  { %737 = vmatpush.msrb.mxu0 %v4785_v11 }
  0x35   :  { %4235 = vmatmul.msk.f32.gmra.mxu0 %vm33_vm0, %v438_v43  ;;  %v651_v43 = vld [vmem:[%s6238_s0 + $0x18] sm:$0xff] }
  0x3d   :  { %4242 = vmatmul.msk.f32.vlgmr.msra.gmra.mxu0 %vm33_vm0, %v573_v45  ;;  %v5071_v45 = vld [vmem:[%s6242_s4 + $0xf0] sm:$0xff] }
  0x3e   :  { %860 = vmatpush.msra.mxu0 %v4721_v0 }
  0x40   :  { %861 = vmatpush.msra.mxu0 %v4726_v1 }
  0x45   :  { %4243 = vmatmul.msk.f32.gmra.mxu0 %vm33_vm0, %v574_v47  ;;  %v5078_v47 = vld [vmem:[%s6242_s4 + $0x118] sm:$0xff] }
  0x82   :  { %v94_v22 = vpop.f32.mrf.mxu0 }
  0x83   :  { %v95_v23 = vadd.f32 %v4841_v20, %v94_v22  ;;  %v5006_v22 = vld [vmem:[%s6242_s4 + $0xe0] sm:$0xff] }
  0x84   :  { %v97_v24 = vpop.f32.mrf.mxu1 }
  0x85   :  { %v100_v25 = vmax.f32 %v95_v23, 0.0  ;;  %v98_v26 = vadd.f32 %v4841_v20, %v97_v24 }
  0x87   :  { %4214 = vmatmul.msk.f32.vlgmr.msrb.gmra.mxu2 %vm106_vm1, %v100_v25  ;;  %v101_v32 = vmax.f32 %v98_v26, 0.0  ;;  %v5015_v26 = vld [vmem:[%s6242_s4 + $0xd8] sm:$0xff] }
  0x88   :  { %v57_v28 = vpop.f32.mrf.mxu2  ;;  %391 = vmatpush.msrb.mxu2 %v4721_v0 }
  0x89   :  { %v58_v29 = vadd.f32 %v4841_v20, %v57_v28  ;;  %v5021_v28 = vld [vmem:[%s6242_s4 + $0xd0] sm:$0xff] }
  0x8a   :  { %v190_v30 = vpop.f32.mrf.mxu0  ;;  %392 = vmatpush.msrb.mxu2 %v4726_v1 }
  0x8b   :  { %v63_v31 = vmax.f32 %v58_v29, 0.0  ;;  %v191_v33 = vadd.f32 %v4841_v20, %v190_v30 }
  0x8d   :  { %4216 = vmatmul.msk.f32.vlgmr.msra.gmra.mxu3 %vm106_vm1, %v63_v31  ;;  %v196_v34 = vmax.f32 %v191_v33, 0.0  ;;  %v650_v31 = vld [vmem:[%s6238_s0 + $0x10] sm:$0xff] }
  0x8e   :  { %424 = vmatpush.msra.mxu3 %v4965_v61 }
  0x8f   :  { %4215 = vmatmul.msk.f32.gmra.mxu2 %vm106_vm1, %v101_v32  ;;  %4220 = vmatmul.msk.f32.vlgmr.msrb.gmra.mxu1 %vm106_vm1, %v196_v34 }
  0x90   :  { %v60_v36 = vpop.f32.mrf.mxu2  ;;  %425 = vmatpush.msra.mxu3 %v4978_v63  ;;  %492 = vmatpush.msrb.mxu1 %v5000_v21 }
  0x91   :  { %v61_v37 = vadd.f32 %v4841_v20, %v60_v36 }
  0x92   :  { %v193_v38 = vpop.f32.mrf.mxu0  ;;  %426 = vmatpush.msra.mxu3 %v4987_v7  ;;  %493 = vmatpush.msrb.mxu1 %v5006_v22 }
  0x93   :  { %v64_v39 = vmax.f32 %v61_v37, 0.0  ;;  %v194_v40 = vadd.f32 %v4841_v20, %v193_v38  ;;  %v5042_v37 = vld [vmem:[%s6242_s4 + $0x100] sm:$0xff]  ;;  %v5048_v38 = vld [vmem:[%s6242_s4 + $0x128] sm:$0xff] }
  0x94   :  { %427 = vmatpush.msra.mxu3 %v4993_v9  ;;  %494 = vmatpush.msrb.mxu1 %v5015_v26 }
  0x95   :  { %4217 = vmatmul.msk.f32.gmra.mxu3 %vm106_vm1, %v64_v39  ;;  %v197_v42 = vmax.f32 %v194_v40, 0.0  ;;  %v5055_v39 = vld [vmem:[%s6242_s4 + $0xf8] sm:$0xff]  ;;  %v5060_v40 = vld [vmem:[%s6242_s4 + $0x120] sm:$0xff] }
  0x96   :  { %495 = vmatpush.msrb.mxu1 %v5021_v28 }
  0x97   :  { %4222 = vmatmul.msk.f32.vlgmr.msra.gmra.mxu2 %vm33_vm0, %v233_v41  ;;  %4221 = vmatmul.msk.f32.gmra.mxu1 %vm106_vm1, %v197_v42 }
  0x98   :  { %527 = vmatpush.msra.mxu2 %v4721_v0 }
  0x9a   :  { %528 = vmatpush.msra.mxu2 %v4726_v1  ;;  %v326_v57 = vpop.f32.mrf.mxu0 }
  0x9b   :  { %v327_v58 = vadd.f32 %v4841_v20, %v326_v57  ;;  %v774_v57 = vld [vmem:[%s6238_s0 + $0x70] sm:$0xff] }
  0x9d   :  { %v332_v60 = vmax.f32 %v327_v58, 0.0 }
  0x9f   :  { %4223 = vmatmul.msk.f32.gmra.mxu2 %vm33_vm0, %v234_v44  ;;  %4228 = vmatmul.msk.f32.vlgmr.msra.gmra.mxu1 %vm106_vm1, %v332_v60 }
  0xa0   :  { %628 = vmatpush.msra.mxu1 %v5048_v38 }
  0xa2   :  { %v329_v3 = vpop.f32.mrf.mxu0  ;;  %629 = vmatpush.msra.mxu1 %v5060_v40 }
  0xa3   :  { %v330_v4 = vadd.f32 %v4841_v20, %v329_v3 }
  0xa4   :  { %630 = vmatpush.msra.mxu1 %v5078_v47 }
  0xa5   :  { %v333_v8 = vmax.f32 %v330_v4, 0.0 }
  0xa7   :  { %4230 = vmatmul.msk.f32.vlgmr.msrb.gmra.mxu2 %vm33_vm0, %v369_v46  ;;  %4229 = vmatmul.msk.f32.gmra.mxu1 %vm106_vm1, %v333_v8 }
  0xa8   :  { %672 = vmatpush.msrb.mxu2 %v4721_v0 }
  0xaa   :  { %673 = vmatpush.msrb.mxu2 %v4726_v1  ;;  %v462_v24 = vpop.f32.mrf.mxu0 }
  0xab   :  { %v463_v25 = vadd.f32 %v4841_v20, %v462_v24 }
  0xad   :  { %v468_v27 = vmax.f32 %v463_v25, 0.0  ;;  %v775_v25 = vld [vmem:[%s6238_s0 + $0x78] sm:$0xff] }
  0xaf   :  { %4231 = vmatmul.msk.f32.gmra.mxu2 %vm33_vm0, %v370_v48  ;;  %4236 = vmatmul.msk.f32.vlgmr.msrb.gmra.mxu1 %vm106_vm1, %v468_v27 }
  0xb2   :  { %v465_v30 = vpop.f32.mrf.mxu0 }
  0xb3   :  { %v466_v33 = vadd.f32 %v4841_v20, %v465_v30 }
  0xb5   :  { %v469_v36 = vmax.f32 %v466_v33, 0.0 }
  0xb7   :  { %4238 = vmatmul.msk.f32.vlgmr.msra.gmra.mxu2 %vm33_vm0, %v505_v49  ;;  %4237 = vmatmul.msk.f32.gmra.mxu1 %vm106_vm1, %v469_v36 }
  0xb8   :  { %796 = vmatpush.msra.mxu2 %v4721_v0 }
  0xba   :  { %797 = vmatpush.msra.mxu2 %v4726_v1  ;;  %v598_v42 = vpop.f32.mrf.mxu0 }
  0xbb   :  { %v599_v46 = vadd.f32 %v4841_v20, %v598_v42  ;;  %v683_v42 = vld [vmem:[%s6238_s0 + $0x40] sm:$0xff] }
  0xbd   :  { %v604_v49 = vmax.f32 %v599_v46, 0.0 }
  0xbf   :  { %4239 = vmatmul.msk.f32.gmra.mxu2 %vm33_vm0, %v506_v50  ;;  %v5085_v50 = vld [vmem:[%s6242_s4 + $0x110] sm:$0xff] }
  0xc0   :  { %631 = vmatpush.msra.mxu1 %v5085_v50 }
  0xc1   :  { %4244 = vmatmul.msk.f32.vlgmr.msra.gmra.mxu1 %vm106_vm1, %v604_v49 }
  0xc2   :  { %763 = vmatpush.msrb.mxu1 %v4790_v12  ;;  %v601_v60 = vpop.f32.mrf.mxu0 }
  0xc3   :  { %v602_v4 = vadd.f32 %v4841_v20, %v601_v60 }
  0xc4   :  { %764 = vmatpush.msrb.mxu1 %v4797_v13 }
  0xc5   :  { %v605_v24 = vmax.f32 %v602_v4, 0.0 }
  0xc6   :  { %765 = vmatpush.msrb.mxu1 %v4804_v14 }
  0xc7   :  { %4246 = vmatmul.msk.f32.vlgmr.msrb.gmra.mxu2 %vm33_vm0, %v650_v31 }
  0xc8   :  { %924 = vmatpush.msrb.mxu2 %v4721_v0  ;;  %766 = vmatpush.msrb.mxu1 %v4811_v15 }
  0xc9   :  { %4245 = vmatmul.msk.f32.gmra.mxu1 %vm106_vm1, %v605_v24 }
  0xca   :  { %925 = vmatpush.msrb.mxu2 %v4726_v1  ;;  %889 = vmatpush.msra.mxu1 %v4922_v51 }
  0xcc   :  { %890 = vmatpush.msra.mxu1 %v4928_v52 }
  0xce   :  { %891 = vmatpush.msra.mxu1 %v4934_v53 }
  0xcf   :  { %4247 = vmatmul.msk.f32.gmra.mxu2 %vm33_vm0, %v651_v43  ;;  %v684_v43 = vld [vmem:[%s6238_s0 + $0x48] sm:$0xff] }
  0xd0   :  { %892 = vmatpush.msra.mxu1 %v4940_v54 }
  0xd7   :  { %4254 = vmatmul.msk.f32.vlgmr.msra.gmra.mxu2 %vm33_vm0, %v774_v57 }
  0xd8   :  { %1052 = vmatpush.msra.mxu2 %v4721_v0 }
  0xda   :  { %1053 = vmatpush.msra.mxu2 %v4726_v1 }
  0xdf   :  { %4255 = vmatmul.msk.f32.gmra.mxu2 %vm33_vm0, %v775_v25 }
 0x10a   :  { %v4981_v2 = vpop.f32.mrf.mxu2 }
 0x112   :  { %v5008_v23 = vpop.f32.mrf.mxu2 }
 0x11a   :  { %v258_v29 = vpop.f32.mrf.mxu2 }
 0x11b   :  { %v259_v32 = vadd.f32 %v4841_v20, %v258_v29 }
 0x11d   :  { %v264_v34 = vmax.f32 %v259_v32, 0.0 }
 0x11f   :  { %4224 = vmatmul.msk.f32.vlgmr.msrb.gmra.mxu3 %vm106_vm1, %v264_v34 }
 0x120   :  { %560 = vmatpush.msrb.mxu3 %v5035_v35 }
 0x122   :  { %v261_v41 = vpop.f32.mrf.mxu2  ;;  %561 = vmatpush.msrb.mxu3 %v5042_v37 }
 0x123   :  { %v262_v44 = vadd.f32 %v4841_v20, %v261_v41 }
 0x124   :  { %562 = vmatpush.msrb.mxu3 %v5055_v39 }
 0x125   :  { %v265_v48 = vmax.f32 %v262_v44, 0.0  ;;  %v5137_v44 = vpop.f32.mrf.mxu3 }
 0x126   :  { %563 = vmatpush.msrb.mxu3 %v5071_v45 }
 0x127   :  { %4225 = vmatmul.msk.f32.gmra.mxu3 %vm106_vm1, %v265_v48 }
 0x12a   :  { %v394_v58 = vpop.f32.mrf.mxu2 }
 0x12b   :  { %v395_v3 = vadd.f32 %v4841_v20, %v394_v58 }
 0x12d   :  { %v400_v8 = vmax.f32 %v395_v3, 0.0  ;;  %v5139_v46 = vpop.f32.mrf.mxu3 }
 0x12f   :  { %4232 = vmatmul.msk.f32.vlgmr.msra.gmra.mxu3 %vm106_vm1, %v400_v8 }
 0x130   :  { %705 = vmatpush.msra.mxu3 %v4721_v0 }
 0x132   :  { %v397_v27 = vpop.f32.mrf.mxu2  ;;  %706 = vmatpush.msra.mxu3 %v4726_v1 }
 0x133   :  { %v398_v29 = vadd.f32 %v4841_v20, %v397_v27 }
 0x135   :  { %v401_v30 = vmax.f32 %v398_v29, 0.0 }
 0x137   :  { %4233 = vmatmul.msk.f32.gmra.mxu3 %vm106_vm1, %v401_v30 }
 0x13a   :  { %v530_v31 = vpop.f32.mrf.mxu2 }
 0x13b   :  { %v531_v32 = vadd.f32 %v4841_v20, %v530_v31 }
 0x13d   :  { %v536_v33 = vmax.f32 %v531_v32, 0.0 }
 0x13f   :  { %4240 = vmatmul.msk.f32.vlgmr.msrb.gmra.mxu3 %vm106_vm1, %v536_v33 }
 0x140   :  { %825 = vmatpush.msrb.mxu3 %v4817_v16 }
 0x142   :  { %v533_v34 = vpop.f32.mrf.mxu2  ;;  %826 = vmatpush.msrb.mxu3 %v4823_v17 }
 0x143   :  { %v534_v36 = vadd.f32 %v4841_v20, %v533_v34  ;;  %v902_v34 = vld [vmem:[%s6238_s0 + $0xd0] sm:$0xff] }
 0x144   :  { %827 = vmatpush.msrb.mxu3 %v4829_v18  ;;  %4262 = vmatmul.msk.f32.vlgmr.msrb.gmra.mxu2 %vm33_vm0, %v902_v34  ;;  %v967_v34 = vld [vmem:[%s6238_s0 + $0x108] sm:$0xff] }
 0x145   :  { %v537_v41 = vmax.f32 %v534_v36, 0.0  ;;  %1180 = vmatpush.msrb.mxu2 %v4721_v0 }
 0x146   :  { %828 = vmatpush.msrb.mxu3 %v4835_v19 }
 0x147   :  { %4241 = vmatmul.msk.f32.gmra.mxu3 %vm106_vm1, %v537_v41  ;;  %1181 = vmatpush.msrb.mxu2 %v4726_v1  ;;  %v903_v41 = vld [vmem:[%s6238_s0 + $0xd8] sm:$0xff] }
 0x14a   :  { %v675_v48 = vpop.f32.mrf.mxu2 }
 0x14b   :  { %v676_v49 = vadd.f32 %v4841_v20, %v675_v48 }
 0x14c   :  { %4263 = vmatmul.msk.f32.gmra.mxu2 %vm33_vm0, %v903_v41  ;;  %v1094_v41 = vld [vmem:[%s6238_s0 + $0x160] sm:$0xff] }
 0x14d   :  { %v681_v57 = vmax.f32 %v676_v49, 0.0  ;;  %v1031_v49 = vld [vmem:[%s6238_s0 + $0x138] sm:$0xff] }
 0x14f   :  { %4248 = vmatmul.msk.f32.vlgmr.msra.gmra.mxu3 %vm33_vm0, %v683_v42  ;;  %4252 = vmatmul.msk.f32.vlgmr.msrb.gmra.mxu1 %vm106_vm1, %v681_v57 }
 0x150   :  { %953 = vmatpush.msra.mxu3 %v4946_v55  ;;  %1017 = vmatpush.msrb.mxu1 %v4965_v61 }
 0x152   :  { %954 = vmatpush.msra.mxu3 %v4952_v56  ;;  %v678_v60 = vpop.f32.mrf.mxu2  ;;  %1018 = vmatpush.msrb.mxu1 %v4978_v63 }
 0x153   :  { %v679_v3 = vadd.f32 %v4841_v20, %v678_v60 }
 0x154   :  { %955 = vmatpush.msra.mxu3 %v4959_v59  ;;  %1019 = vmatpush.msrb.mxu1 %v4987_v7 }
 0x155   :  { %v682_v8 = vmax.f32 %v679_v3, 0.0 }
 0x156   :  { %956 = vmatpush.msra.mxu3 %v4970_v62  ;;  %1020 = vmatpush.msrb.mxu1 %v4993_v9 }
 0x157   :  { %4249 = vmatmul.msk.f32.gmra.mxu3 %vm33_vm0, %v684_v43  ;;  %4253 = vmatmul.msk.f32.gmra.mxu1 %vm106_vm1, %v682_v8  ;;  %v1030_v43 = vld [vmem:[%s6238_s0 + $0x130] sm:$0xff] }
 0x158   :  { %4270 = vmatmul.msk.f32.vlgmr.msra.gmra.mxu2 %vm33_vm0, %v1030_v43  ;;  %v1158_v8 = vld [vmem:[%s6238_s0 + $0x190] sm:$0xff]  ;;  %v1095_v43 = vld [vmem:[%s6238_s0 + $0x168] sm:$0xff] }
 0x159   :  { %1310 = vmatpush.msra.mxu2 %v4721_v0 }
 0x15a   :  { %v799_v24 = vpop.f32.mrf.mxu2 }
 0x15b   :  { %v800_v25 = vadd.f32 %v4841_v20, %v799_v24  ;;  %1311 = vmatpush.msra.mxu2 %v4726_v1 }
 0x15d   :  { %v805_v27 = vmax.f32 %v800_v25, 0.0 }
 0x15f   :  { %4256 = vmatmul.msk.f32.vlgmr.msrb.gmra.mxu3 %vm106_vm1, %v805_v27  ;;  %v1159_v27 = vld [vmem:[%s6238_s0 + $0x198] sm:$0xff] }
 0x160   :  { %1081 = vmatpush.msrb.mxu3 %v5000_v21  ;;  %4271 = vmatmul.msk.f32.gmra.mxu2 %vm33_vm0, %v1031_v49 }
 0x162   :  { %v802_v30 = vpop.f32.mrf.mxu2  ;;  %1082 = vmatpush.msrb.mxu3 %v5006_v22 }
 0x163   :  { %v803_v31 = vadd.f32 %v4841_v20, %v802_v30  ;;  %v838_v30 = vld [vmem:[%s6238_s0 + $0xa0] sm:$0xff] }
 0x164   :  { %1083 = vmatpush.msrb.mxu3 %v5015_v26 }
 0x165   :  { %v806_v32 = vmax.f32 %v803_v31, 0.0  ;;  %v839_v31 = vld [vmem:[%s6238_s0 + $0xa8] sm:$0xff] }
 0x166   :  { %1084 = vmatpush.msrb.mxu3 %v5021_v28 }
 0x167   :  { %4257 = vmatmul.msk.f32.gmra.mxu3 %vm106_vm1, %v806_v32  ;;  %v966_v32 = vld [vmem:[%s6238_s0 + $0x100] sm:$0xff] }
 0x168   :  { %4278 = vmatmul.msk.f32.vlgmr.msrb.gmra.mxu2 %vm33_vm0, %v1158_v8 }
 0x169   :  { %1434 = vmatpush.msrb.mxu2 %v4721_v0 }
 0x16b   :  { %1435 = vmatpush.msrb.mxu2 %v4726_v1 }
 0x170   :  { %4279 = vmatmul.msk.f32.gmra.mxu2 %vm33_vm0, %v1159_v27 }
 0x1a2   :  { %v5142_v58 = vpop.f32.mrf.mxu3 }
 0x1aa   :  { %v5149_v4 = vpop.f32.mrf.mxu3 }
 0x1b2   :  { %v5154_v29 = vpop.f32.mrf.mxu3 }
 0x1ba   :  { %v5161_v33 = vpop.f32.mrf.mxu3 }
 0x1c2   :  { %v5171_v36 = vpop.f32.mrf.mxu3 }
 0x1ca   :  { %v5177_v42 = vpop.f32.mrf.mxu3 }
 0x1d2   :  { %v708_v48 = vpop.f32.mrf.mxu3 }
 0x1d3   :  { %v709_v57 = vadd.f32 %v4841_v20, %v708_v48  ;;  %v927_v48 = vpop.f32.mrf.mxu2 }
 0x1d4   :  { %v928_v49 = vadd.f32 %v4841_v20, %v927_v48 }
 0x1d5   :  { %v714_v60 = vmax.f32 %v709_v57, 0.0 }
 0x1d6   :  { %v933_v57 = vmax.f32 %v928_v49, 0.0 }
 0x1d7   :  { %4250 = vmatmul.msk.f32.vlgmr.msrb.gmra.mxu0 %vm106_vm1, %v714_v60 }
 0x1d8   :  { %988 = vmatpush.msrb.mxu0 %v4721_v0  ;;  %4264 = vmatmul.msk.f32.vlgmr.msra.gmra.mxu3 %vm106_vm1, %v933_v57 }
 0x1d9   :  { %1209 = vmatpush.msra.mxu3 %v5048_v38 }
 0x1da   :  { %v711_v3 = vpop.f32.mrf.mxu3  ;;  %989 = vmatpush.msrb.mxu0 %v4726_v1 }
 0x1db   :  { %v712_v24 = vadd.f32 %v4841_v20, %v711_v3  ;;  %v930_v60 = vpop.f32.mrf.mxu2  ;;  %1210 = vmatpush.msra.mxu3 %v5060_v40 }
 0x1dc   :  { %v931_v3 = vadd.f32 %v4841_v20, %v930_v60  ;;  %v1288_v60 = vld [vmem:[%s6238_s0 + $0x20] sm:$0xff] }
 0x1dd   :  { %v715_v25 = vmax.f32 %v712_v24, 0.0  ;;  %1211 = vmatpush.msra.mxu3 %v5078_v47  ;;  %v5239_v24 = vpop.f32.mrf.mxu1  ;;  %4286 = vmatmul.msk.f32.vlgmr.msra.gmra.mxu2 %vm33_vm0, %v1288_v60 }
 0x1de   :  { %v934_v8 = vmax.f32 %v931_v3, 0.0  ;;  %1562 = vmatpush.msra.mxu2 %v4721_v0 }
 0x1df   :  { %4251 = vmatmul.msk.f32.gmra.mxu0 %vm106_vm1, %v715_v25  ;;  %1212 = vmatpush.msra.mxu3 %v5085_v50 }
 0x1e0   :  { %4265 = vmatmul.msk.f32.gmra.mxu3 %vm106_vm1, %v934_v8  ;;  %1563 = vmatpush.msra.mxu2 %v4726_v1 }
 0x1e3   :  { %v1055_v25 = vpop.f32.mrf.mxu2 }
 0x1e4   :  { %v1056_v27 = vadd.f32 %v4841_v20, %v1055_v25 }
 0x1e7   :  { %4258 = vmatmul.msk.f32.vlgmr.msra.gmra.mxu0 %vm33_vm0, %v838_v30  ;;  %v1061_v30 = vmax.f32 %v1056_v27, 0.0 }
 0x1e8   :  { %1116 = vmatpush.msra.mxu0 %v4721_v0 }
 0x1e9   :  { %4272 = vmatmul.msk.f32.vlgmr.msrb.gmra.mxu3 %vm106_vm1, %v1061_v30 }
 0x1ea   :  { %1117 = vmatpush.msra.mxu0 %v4726_v1  ;;  %1343 = vmatpush.msrb.mxu3 %v4721_v0 }
 0x1ec   :  { %1344 = vmatpush.msrb.mxu3 %v4726_v1 }
 0x1ef   :  { %4259 = vmatmul.msk.f32.gmra.mxu0 %vm33_vm0, %v839_v31 }
 0x1f7   :  { %4266 = vmatmul.msk.f32.vlgmr.msrb.gmra.mxu0 %vm33_vm0, %v966_v32  ;;  %v1058_v32 = vpop.f32.mrf.mxu2 }
 0x1ff   :  { %4267 = vmatmul.msk.f32.gmra.mxu0 %vm33_vm0, %v967_v34  ;;  %v1059_v34 = vadd.f32 %v4841_v20, %v1058_v32  ;;  %v1183_v49 = vpop.f32.mrf.mxu2 }
 0x200   :  { %v1184_v57 = vadd.f32 %v4841_v20, %v1183_v49 }
 0x202   :  { %v1189_v8 = vmax.f32 %v1184_v57, 0.0 }
 0x207   :  { %4274 = vmatmul.msk.f32.vlgmr.msra.gmra.mxu0 %vm33_vm0, %v1094_v41  ;;  %v5248_v41 = vpop.f32.mrf.mxu1  ;;  %v1186_v32 = vpop.f32.mrf.mxu2 }
 0x20f   :  { %4275 = vmatmul.msk.f32.gmra.mxu0 %vm33_vm0, %v1095_v43  ;;  %v1062_v43 = vmax.f32 %v1059_v34, 0.0  ;;  %v5257_v3 = vpop.f32.mrf.mxu1  ;;  %v1187_v34 = vadd.f32 %v4841_v20, %v1186_v32  ;;  %v649_v32 = vld [vmem:[%s6242_s4 + $0x148] sm:$0xff] }
 0x211   :  { %4273 = vmatmul.msk.f32.gmra.mxu3 %vm106_vm1, %v1062_v43  ;;  %v1289_v43 = vld [vmem:[%s6238_s0 + $0x28] sm:$0xff]  ;;  %v1190_v49 = vmax.f32 %v1187_v34, 0.0  ;;  %v648_v34 = vld [vmem:[%s6242_s4 + $0x140] sm:$0xff] }
 0x212   :  { %4287 = vmatmul.msk.f32.gmra.mxu2 %vm33_vm0, %v1289_v43 }
 0x219   :  { %4280 = vmatmul.msk.f32.vlgmr.msra.gmra.mxu3 %vm106_vm1, %v1189_v8  ;;  %v1321_v8 = vld [vmem:[%s6238_s0 + $0x50] sm:$0xff] }
 0x21a   :  { %1463 = vmatpush.msra.mxu3 %v4817_v16  ;;  %v364_v16 = vpop.f32.mrf.mxu1 }
 0x21c   :  { %1464 = vmatpush.msra.mxu3 %v4823_v17 }
 0x21e   :  { %1465 = vmatpush.msra.mxu3 %v4829_v18  ;;  %v1412_v18 = vld [vmem:[%s6238_s0 + $0x80] sm:$0xff] }
 0x21f   :  { %4294 = vmatmul.msk.f32.vlgmr.msrb.gmra.mxu2 %vm33_vm0, %v1412_v18 }
 0x220   :  { %1466 = vmatpush.msra.mxu3 %v4835_v19  ;;  %1690 = vmatpush.msrb.mxu2 %v4721_v0  ;;  %v160_v0 = vadd.f32 %v5137_v44, %v4981_v2 }
 0x221   :  { %4281 = vmatmul.msk.f32.gmra.mxu3 %vm106_vm1, %v1190_v49  ;;  %v646_v49 = vld [vmem:[%s6242_s4 + $0x130] sm:$0xff] }
 0x222   :  { %1691 = vmatpush.msrb.mxu2 %v4726_v1  ;;  %v1413_v1 = vld [vmem:[%s6238_s0 + $0x88] sm:$0xff]  ;;  %v231_v44 = vadd.f32 %v5239_v24, %v160_v0 }
 0x227   :  { %4295 = vmatmul.msk.f32.gmra.mxu2 %vm33_vm0, %v1413_v1  ;;  %v830_v1 = vpop.f32.mrf.mxu3 }
 0x229   :  { %4288 = vmatmul.msk.f32.vlgmr.msrb.gmra.mxu3 %vm33_vm0, %v1321_v8 }
 0x22a   :  { %1591 = vmatpush.msrb.mxu3 %v4946_v55  ;;  %v1322_v55 = vld [vmem:[%s6238_s0 + $0x58] sm:$0xff] }
 0x22c   :  { %1592 = vmatpush.msrb.mxu3 %v4952_v56  ;;  %v647_v56 = vld [vmem:[%s6242_s4 + $0x138] sm:$0xff] }
 0x22e   :  { %1593 = vmatpush.msrb.mxu3 %v4959_v59  ;;  %v163_v59 = vadd.f32 %v5139_v46, %v5008_v23 }
 0x230   :  { %1594 = vmatpush.msrb.mxu3 %v4970_v62  ;;  %v232_v8 = vadd.f32 %v5248_v41, %v163_v59 }
 0x231   :  { %4289 = vmatmul.msk.f32.gmra.mxu3 %vm33_vm0, %v1322_v55 }
 0x232   :  { %v300_v62 = vadd.f32 %v5149_v4, %v232_v8 }
 0x234   :  { %v368_v23 = vadd.f32 %v364_v16, %v300_v62 }
 0x236   :  { %v436_v41 = vadd.f32 %v5161_v33, %v368_v23 }
 0x254   :  { %v5242_v31 = vpop.f32.mrf.mxu0 }
 0x25c   :  { %v5250_v48 = vpop.f32.mrf.mxu0 }
 0x264   :  { %v863_v25 = vpop.f32.mrf.mxu0 }
 0x265   :  { %v864_v27 = vadd.f32 %v4841_v20, %v863_v25 }
 0x267   :  { %v869_v30 = vmax.f32 %v864_v27, 0.0  ;;  %v497_v27 = vpop.f32.mrf.mxu1 }
 0x269   :  { %4260 = vmatmul.msk.f32.vlgmr.msra.gmra.mxu1 %vm106_vm1, %v869_v30 }
 0x26a   :  { %1145 = vmatpush.msra.mxu1 %v5035_v35 }
 0x26c   :  { %v866_v57 = vpop.f32.mrf.mxu0  ;;  %1146 = vmatpush.msra.mxu1 %v5042_v37 }
 0x26d   :  { %v867_v17 = vadd.f32 %v4841_v20, %v866_v57  ;;  %v299_v57 = vadd.f32 %v5142_v58, %v231_v44 }
 0x26e   :  { %1147 = vmatpush.msra.mxu1 %v5055_v39 }
 0x26f   :  { %v870_v60 = vmax.f32 %v867_v17, 0.0  ;;  %v367_v24 = vadd.f32 %v5257_v3, %v299_v57 }
 0x270   :  { %1148 = vmatpush.msra.mxu1 %v5071_v45 }
 0x271   :  { %4261 = vmatmul.msk.f32.gmra.mxu1 %vm106_vm1, %v870_v60  ;;  %v500_v60 = vpop.f32.mrf.mxu1 }
 0x274   :  { %v991_v25 = vpop.f32.mrf.mxu0 }
 0x275   :  { %v992_v19 = vadd.f32 %v4841_v20, %v991_v25  ;;  %v435_v25 = vadd.f32 %v5154_v29, %v367_v24 }
 0x277   :  { %v997_v30 = vmax.f32 %v992_v19, 0.0 }
 0x279   :  { %4268 = vmatmul.msk.f32.vlgmr.msrb.gmra.mxu1 %vm106_vm1, %v997_v30  ;;  %v503_v30 = vadd.f32 %v497_v27, %v435_v25  ;;  %v5340_v27 = vld [vmem:[%s6243_s5 + $0x1] ss:$0 sm:$0xff] }
 0x27a   :  { %1277 = vmatpush.msrb.mxu1 %v649_v32  ;;  %v633_v32 = vpop.f32.mrf.mxu1 }
 0x27b   :  { %v571_v46 = vadd.f32 %v5171_v36, %v503_v30  ;;  %v1540_v30 = vld [vmem:[%s6238_s0 + $0xe0] sm:$0xff] }
 0x27c   :  { %v994_v2 = vpop.f32.mrf.mxu0  ;;  %1278 = vmatpush.msrb.mxu1 %v648_v34  ;;  %4302 = vmatmul.msk.f32.vlgmr.msra.gmra.mxu2 %vm33_vm0, %v1540_v30 }
 0x27d   :  { %v995_v43 = vadd.f32 %v4841_v20, %v994_v2  ;;  %v639_v4 = vadd.f32 %v633_v32, %v571_v46 }
 0x27e   :  { %1279 = vmatpush.msrb.mxu1 %v647_v56 }
 0x27f   :  { %v998_v17 = vmax.f32 %v995_v43, 0.0 }
 0x280   :  { %1280 = vmatpush.msrb.mxu1 %v646_v49 }
 0x281   :  { %4269 = vmatmul.msk.f32.gmra.mxu1 %vm106_vm1, %v998_v17  ;;  %v1227_v17 = vld [vmem:[%s6242_s4 + $0x158] sm:$0xff] }
 0x282   :  { %v636_v36 = vpop.f32.mrf.mxu1 }
 0x284   :  { %v1119_v18 = vpop.f32.mrf.mxu0 }
 0x285   :  { %v1120_v19 = vadd.f32 %v4841_v20, %v1119_v18 }
 0x287   :  { %v1125_v58 = vmax.f32 %v1120_v19, 0.0 }
 0x289   :  { %4276 = vmatmul.msk.f32.vlgmr.msra.gmra.mxu1 %vm106_vm1, %v1125_v58 }
 0x28a   :  { %1401 = vmatpush.msra.mxu1 %v4790_v12  ;;  %v504_v12 = vadd.f32 %v500_v60, %v436_v41  ;;  %v768_v55 = vpop.f32.mrf.mxu1  ;;  %v1226_v60 = vld [vmem:[%s6242_s4 + $0x150] sm:$0xff] }
 0x28c   :  { %v1122_v3 = vpop.f32.mrf.mxu0  ;;  %1402 = vmatpush.msra.mxu1 %v4797_v13  ;;  %v642_v13 = vadd.f32 %v5340_v27, %v639_v4  ;;  %v572_v33 = vadd.f32 %v5177_v42, %v504_v12  ;;  %v833_v42 = vpop.f32.mrf.mxu3 }
 0x28d   :  { %v1123_v29 = vadd.f32 %v4841_v20, %v1122_v3  ;;  %v4635_v3 = vld [vmem:[%s6242_s4] sm:$0xff] }
 0x28e   :  { %1403 = vmatpush.msra.mxu1 %v4804_v14  ;;  %v644_v16 = vmax.f32 %v642_v13, 0.0  ;;  %v640_v34 = vadd.f32 %v636_v36, %v572_v33 }
 0x28f   :  { %v1126_v0 = vmax.f32 %v1123_v29, 0.0 }
 0x290   :  { %1404 = vmatpush.msra.mxu1 %v4811_v15  ;;  %v643_v14 = vadd.f32 %v5340_v27, %v640_v34 }
 0x291   :  { %4277 = vmatmul.msk.f32.gmra.mxu1 %vm106_vm1, %v1126_v0  ;;  %v1541_v0 = vld [vmem:[%s6238_s0 + $0xe8] sm:$0xff] }
 0x292   :  { %v645_v15 = vmax.f32 %v643_v14, 0.0  ;;  %v771_v2 = vpop.f32.mrf.mxu1  ;;  %4303 = vmatmul.msk.f32.gmra.mxu2 %vm33_vm0, %v1541_v0 }
 0x294   :  { %v958_v56 = vpop.f32.mrf.mxu3 }
 0x299   :  { %4284 = vmatmul.msk.f32.vlgmr.msrb.gmra.mxu1 %vm106_vm1, %v644_v16 }
 0x29a   :  { %1527 = vmatpush.msrb.mxu1 %v4922_v51  ;;  %v1229_v51 = vld [vmem:[%s6242_s4 + $0x168] sm:$0xff] }
 0x29b   :  { %1248 = vmatpush.msrb.mxu0 %v1229_v51 }
 0x29c   :  { %1528 = vmatpush.msrb.mxu1 %v4928_v52  ;;  %v961_v44 = vpop.f32.mrf.mxu3  ;;  %v1313_v52 = vpop.f32.mrf.mxu2 }
 0x29e   :  { %1529 = vmatpush.msrb.mxu1 %v4934_v53  ;;  %v1314_v53 = vadd.f32 %v4841_v20, %v1313_v52 }
 0x2a0   :  { %1530 = vmatpush.msrb.mxu1 %v4940_v54  ;;  %v1319_v49 = vmax.f32 %v1314_v53, 0.0  ;;  %v1228_v54 = vld [vmem:[%s6242_s4 + $0x160] sm:$0xff] }
 0x2a1   :  { %4285 = vmatmul.msk.f32.gmra.mxu1 %vm106_vm1, %v645_v15  ;;  %1249 = vmatpush.msrb.mxu0 %v1228_v54  ;;  %v1668_v15 = vld [vmem:[%s6238_s0 + $0x140] sm:$0xff]  ;;  %v1797_v54 = vld [vmem:[%s6238_s0 + $0x1a8] sm:$0xff] }
 0x2a2   :  { %4310 = vmatmul.msk.f32.vlgmr.msrb.gmra.mxu2 %vm33_vm0, %v1668_v15  ;;  %v1796_v53 = vld [vmem:[%s6238_s0 + $0x1a0] sm:$0xff] }
 0x2a3   :  { %1250 = vmatpush.msrb.mxu0 %v1227_v17  ;;  %v1604_v17 = vld [vmem:[%s6238_s0 + $0x110] sm:$0xff] }
 0x2a4   :  { %v1086_v57 = vpop.f32.mrf.mxu3  ;;  %v1316_v24 = vpop.f32.mrf.mxu2 }
 0x2a5   :  { %1251 = vmatpush.msrb.mxu0 %v1226_v60  ;;  %v1317_v18 = vadd.f32 %v4841_v20, %v1316_v24  ;;  %v1605_v60 = vld [vmem:[%s6238_s0 + $0x118] sm:$0xff] }
 0x2a6   :  { %v1733_v24 = vld [vmem:[%s6238_s0 + $0x178] sm:$0xff] }
 0x2a7   :  { %1372 = vmatpush.msra.mxu0 %v4745_v5  ;;  %v1320_v8 = vmax.f32 %v1317_v18, 0.0 }
 0x2a9   :  { %4292 = vmatmul.msk.f32.vlgmr.msra.gmra.mxu1 %vm106_vm1, %v1319_v49  ;;  %1373 = vmatpush.msra.mxu0 %v4750_v6  ;;  %v772_v6 = vadd.f32 %v771_v2, %v5250_v48  ;;  %v4634_v48 = vld [vmem:[%s6242_s4 + $0x8] sm:$0xff] }
 0x2aa   :  { %1655 = vmatpush.msra.mxu1 %v4965_v61  ;;  %v769_v61 = vadd.f32 %v768_v55, %v5242_v31  ;;  %1818 = vmatpush.msra.mxu2 %v4634_v48 }
 0x2ab   :  { %1374 = vmatpush.msra.mxu0 %v4779_v10  ;;  %v837_v23 = vadd.f32 %v833_v42, %v772_v6 }
 0x2ac   :  { %1656 = vmatpush.msra.mxu1 %v4978_v63  ;;  %v1089_v25 = vpop.f32.mrf.mxu3  ;;  %v1437_v19 = vpop.f32.mrf.mxu2  ;;  %v836_v62 = vadd.f32 %v830_v1, %v769_v61  ;;  %1819 = vmatpush.msra.mxu2 %v4635_v3 }
 0x2ad   :  { %1375 = vmatpush.msra.mxu0 %v4785_v11  ;;  %v1438_v5 = vadd.f32 %v4841_v20, %v1437_v19 }
 0x2ae   :  { %1657 = vmatpush.msra.mxu1 %v4987_v7 }
 0x2af   :  { %v1443_v7 = vmax.f32 %v1438_v5, 0.0 }
 0x2b0   :  { %1658 = vmatpush.msra.mxu1 %v4993_v9 }
 0x2b1   :  { %4293 = vmatmul.msk.f32.gmra.mxu1 %vm106_vm1, %v1320_v8  ;;  %4296 = vmatmul.msk.f32.vlgmr.msra.gmra.mxu3 %vm106_vm1, %v1443_v7  ;;  %v4636_v8 = vld [vmem:[%s6243_s5] ss:$0 sm:$0xff] }
 0x2b2   :  { %1719 = vmatpush.msra.mxu3 %v5000_v21 }
 0x2b4   :  { %v1440_v9 = vpop.f32.mrf.mxu2  ;;  %1720 = vmatpush.msra.mxu3 %v5006_v22  ;;  %v1214_v32 = vpop.f32.mrf.mxu3 }
 0x2b5   :  { %v1441_v11 = vadd.f32 %v4841_v20, %v1440_v9 }
 0x2b6   :  { %1721 = vmatpush.msra.mxu3 %v5015_v26 }
 0x2b7   :  { %v1444_v46 = vmax.f32 %v1441_v11, 0.0 }
 0x2b8   :  { %1722 = vmatpush.msra.mxu3 %v5021_v28 }
 0x2b9   :  { %4297 = vmatmul.msk.f32.gmra.mxu3 %vm106_vm1, %v1444_v46 }
 0x2bc   :  { %v1217_v13 = vpop.f32.mrf.mxu3 }
 0x2c4   :  { %v1346_v42 = vpop.f32.mrf.mxu3 }
 0x2c5   :  { %v1347_v2 = vadd.f32 %v4841_v20, %v1346_v42 }
 0x2c7   :  { %v1352_v51 = vmax.f32 %v1347_v2, 0.0 }
 0x2e6   :  { %v894_v43 = vpop.f32.mrf.mxu1 }
 0x2e7   :  { %v900_v58 = vadd.f32 %v894_v43, %v836_v62  ;;  %v1349_v43 = vpop.f32.mrf.mxu3 }
 0x2e8   :  { %v1350_v52 = vadd.f32 %v4841_v20, %v1349_v43  ;;  %v1476_v20 = vld [vmem:[%s6238_s0 + $0xb0] sm:$0xff]  ;;  %v1865_v43 = vld [vmem:[%s6242_s4 + $0x178] sm:$0xff] }
 0x2e9   :  { %v964_v31 = vadd.f32 %v958_v56, %v900_v58 }
 0x2ea   :  { %v1353_v49 = vmax.f32 %v1350_v52, 0.0  ;;  %v1864_v52 = vld [vmem:[%s6242_s4 + $0x170] sm:$0xff] }
 0x2ee   :  { %v897_v59 = vpop.f32.mrf.mxu1 }
 0x2ef   :  { %v901_v22 = vadd.f32 %v897_v59, %v837_v23  ;;  %v1732_v59 = vld [vmem:[%s6238_s0 + $0x170] sm:$0xff] }
 0x2f1   :  { %v965_v29 = vadd.f32 %v961_v44, %v901_v22  ;;  %v1669_v44 = vld [vmem:[%s6238_s0 + $0x148] sm:$0xff] }
 0x2f2   :  { %4311 = vmatmul.msk.f32.gmra.mxu2 %vm33_vm0, %v1669_v44 }
 0x2f6   :  { %v1022_v63 = vpop.f32.mrf.mxu1 }
 0x2f7   :  { %v1028_v21 = vadd.f32 %v1022_v63, %v964_v31 }
 0x2f9   :  { %v1092_v41 = vadd.f32 %v1086_v57, %v1028_v21  ;;  %v1477_v57 = vld [vmem:[%s6238_s0 + $0xb8] sm:$0xff]  ;;  %s4676_s0 = smov 128  }
 0x2fa   :  { %4318 = vmatmul.msk.f32.vlgmr.msra.gmra.mxu2 %vm33_vm0, %v1796_v53 }
 0x2fe   :  { %v1025_v10 = vpop.f32.mrf.mxu1 }
 0x2ff   :  { %v1029_v12 = vadd.f32 %v1025_v10, %v965_v29  ;;  %v1565_v18 = vpop.f32.mrf.mxu2 }
 0x300   :  { %v1566_v61 = vadd.f32 %v4636_v8, %v1565_v18 }
 0x301   :  { %v1093_v36 = vadd.f32 %v1089_v25, %v1029_v12 }
 0x302   :  { %4319 = vmatmul.msk.f32.gmra.mxu2 %vm33_vm0, %v1797_v54  ;;  %v1571_v25 = vmax.f32 %v1566_v61, 0.0 }
 0x304   :  { %4304 = vmatmul.msk.f32.vlgmr.msrb.gmra.mxu3 %vm106_vm1, %v1571_v25 }
 0x305   :  { %1847 = vmatpush.msrb.mxu3 %v5048_v38 }
 0x306   :  { %v1150_v26 = vpop.f32.mrf.mxu1 }
 0x307   :  { %v1156_v4 = vadd.f32 %v1150_v26, %v1092_v41  ;;  %1848 = vmatpush.msrb.mxu3 %v5060_v40 }
 0x309   :  { %v1220_v28 = vadd.f32 %v1214_v32, %v1156_v4  ;;  %1849 = vmatpush.msrb.mxu3 %v5078_v47 }
 0x30b   :  { %v1222_v33 = vadd.f32 %v5340_v27, %v1220_v28  ;;  %1850 = vmatpush.msrb.mxu3 %v5085_v50 }
 0x30d   :  { %v1224_v16 = vmax.f32 %v1222_v33, 0.0 }
 0x30e   :  { %v1153_v34 = vpop.f32.mrf.mxu1 }
 0x30f   :  { %v1157_v14 = vadd.f32 %v1153_v34, %v1093_v36  ;;  %4282 = vmatmul.msk.f32.vlgmr.msrb.gmra.mxu0 %vm106_vm1, %v1224_v16 }
 0x310   :  { %1498 = vmatpush.msrb.mxu0 %v4634_v48 }
 0x311   :  { %v1221_v1 = vadd.f32 %v1217_v13, %v1157_v14 }
 0x312   :  { %1499 = vmatpush.msrb.mxu0 %v4635_v3 }
 0x313   :  { %v1223_v55 = vadd.f32 %v5340_v27, %v1221_v1 }
 0x315   :  { %v1225_v56 = vmax.f32 %v1223_v55, 0.0  ;;  %v1568_v19 = vpop.f32.mrf.mxu2 }
 0x316   :  { %v1569_v5 = vadd.f32 %v4636_v8, %v1568_v19  ;;  %v1282_v16 = vpop.f32.mrf.mxu1 }
 0x317   :  { %4283 = vmatmul.msk.f32.gmra.mxu0 %vm106_vm1, %v1225_v56  ;;  %v1867_v56 = vld [vmem:[%s6242_s4 + $0x188] sm:$0xff] }
 0x318   :  { %v1572_v62 = vmax.f32 %v1569_v5, 0.0 }
 0x31a   :  { %4305 = vmatmul.msk.f32.gmra.mxu3 %vm106_vm1, %v1572_v62 }
 0x31e   :  { %v1285_v14 = vpop.f32.mrf.mxu1 }
 0x31f   :  { %4290 = vmatmul.msk.f32.vlgmr.msra.gmra.mxu0 %vm106_vm1, %v1352_v51  ;;  %v1866_v51 = vld [vmem:[%s6242_s4 + $0x180] sm:$0xff] }
 0x320   :  { %1626 = vmatpush.msra.mxu0 %v4634_v48 }
 0x322   :  { %1627 = vmatpush.msra.mxu0 %v4635_v3 }
 0x325   :  { %v1693_v58 = vpop.f32.mrf.mxu2 }
 0x326   :  { %v1694_v6 = vadd.f32 %v4636_v8, %v1693_v58  ;;  %v1406_v15 = vpop.f32.mrf.mxu1 }
 0x327   :  { %4291 = vmatmul.msk.f32.gmra.mxu0 %vm106_vm1, %v1353_v49 }
 0x328   :  { %v1699_v10 = vmax.f32 %v1694_v6, 0.0 }
 0x32a   :  { %4312 = vmatmul.msk.f32.vlgmr.msra.gmra.mxu3 %vm106_vm1, %v1699_v10 }
 0x32e   :  { %v1409_v55 = vpop.f32.mrf.mxu1 }
 0x32f   :  { %4298 = vmatmul.msk.f32.vlgmr.msrb.gmra.mxu0 %vm33_vm0, %v1476_v20 }
 0x330   :  { %1754 = vmatpush.msrb.mxu0 %v4634_v48 }
 0x332   :  { %1755 = vmatpush.msrb.mxu0 %v4635_v3 }
 0x334   :  { %v1468_v34 = vpop.f32.mrf.mxu3 }
 0x337   :  { %4299 = vmatmul.msk.f32.gmra.mxu0 %vm33_vm0, %v1477_v57 }
 0x33c   :  { %v1471_v1 = vpop.f32.mrf.mxu3 }
 0x33f   :  { %4306 = vmatmul.msk.f32.vlgmr.msra.gmra.mxu0 %vm33_vm0, %v1604_v17 }
 0x340   :  { %1886 = vmatpush.msra.mxu0 %v1867_v56 }
 0x342   :  { %1887 = vmatpush.msra.mxu0 %v1866_v51 }
 0x344   :  { %1888 = vmatpush.msra.mxu0 %v1865_v43 }
 0x346   :  { %1889 = vmatpush.msra.mxu0 %v1864_v52  ;;  %v1979_v52 = vld [vmem:[%s6242_s4 + $0x1a8] sm:$0xff] }
 0x347   :  { %4307 = vmatmul.msk.f32.gmra.mxu0 %vm33_vm0, %v1605_v60 }
 0x34f   :  { %4314 = vmatmul.msk.f32.vlgmr.msrb.gmra.mxu0 %vm33_vm0, %v1732_v59 }
 0x357   :  { %4315 = vmatmul.msk.f32.gmra.mxu0 %vm33_vm0, %v1733_v24 }
 0x375   :  { %v1696_v38 = vpop.f32.mrf.mxu2 }
 0x376   :  { %v1697_v31 = vadd.f32 %v4636_v8, %v1696_v38 }
 0x378   :  { %v1700_v11 = vmax.f32 %v1697_v31, 0.0 }
 0x37a   :  { %4313 = vmatmul.msk.f32.gmra.mxu3 %vm106_vm1, %v1700_v11 }
 0x37d   :  { %v1821_v47 = vpop.f32.mrf.mxu2 }
 0x37e   :  { %v1822_v30 = vadd.f32 %v4636_v8, %v1821_v47 }
 0x380   :  { %v1827_v32 = vmax.f32 %v1822_v30, 0.0 }
 0x382   :  { %4320 = vmatmul.msk.f32.vlgmr.msrb.gmra.mxu3 %vm106_vm1, %v1827_v32 }
 0x385   :  { %v1824_v46 = vpop.f32.mrf.mxu2 }
 0x386   :  { %v1825_v48 = vadd.f32 %v4636_v8, %v1824_v46  ;;  %v4520_v46 = vld [vmem:[%s6243_s5 + $0x2] ss:$0 sm:$0xff] }
 0x387   :  { %v1596_v42 = vpop.f32.mrf.mxu3 }
 0x388   :  { %v1828_v22 = vmax.f32 %v1825_v48, 0.0 }
 0x38a   :  { %4321 = vmatmul.msk.f32.gmra.mxu3 %vm106_vm1, %v1828_v22 }
 0x38c   :  { %v5452_v63 = vpop.f32.mrf.mxu0 }
 0x394   :  { %v5459_v7 = vpop.f32.mrf.mxu0 }
 0x39c   :  { %v1377_v9 = vpop.f32.mrf.mxu0 }
 0x39d   :  { %v1599_v44 = vpop.f32.mrf.mxu3  ;;  %v1407_v54 = vadd.f32 %v1406_v15, %v1377_v9 }
 0x39f   :  { %v1474_v57 = vadd.f32 %v1468_v34, %v1407_v54  ;;  %v1976_v54 = vld [vmem:[%s6242_s4 + $0x190] sm:$0xff] }
 0x3a4   :  { %v1380_v40 = vpop.f32.mrf.mxu0 }
 0x3a5   :  { %v1410_v59 = vadd.f32 %v1409_v55, %v1380_v40 }
 0x3ac   :  { %v1501_v50 = vpop.f32.mrf.mxu0 }
 0x3ad   :  { %v1502_v23 = vadd.f32 %v4636_v8, %v1501_v50  ;;  %v1724_v49 = vpop.f32.mrf.mxu3 }
 0x3af   :  { %v1507_v21 = vmax.f32 %v1502_v23, 0.0 }
 0x3b1   :  { %4300 = vmatmul.msk.f32.vlgmr.msrb.gmra.mxu1 %vm106_vm1, %v1507_v21  ;;  %v1283_v21 = vadd.f32 %v1282_v16, %v5452_v63 }
 0x3b2   :  { %1783 = vmatpush.msrb.mxu1 %v5035_v35 }
 0x3b4   :  { %v1504_v3 = vpop.f32.mrf.mxu0  ;;  %1784 = vmatpush.msrb.mxu1 %v5042_v37 }
 0x3b5   :  { %v1505_v41 = vadd.f32 %v4636_v8, %v1504_v3 }
 0x3b6   :  { %1785 = vmatpush.msrb.mxu1 %v5055_v39 }
 0x3b7   :  { %v1508_v26 = vmax.f32 %v1505_v41, 0.0  ;;  %v1905_v41 = vld [vmem:[%s6239_s1] sm:$0xff] }
 0x3b8   :  { %1786 = vmatpush.msrb.mxu1 %v5071_v45 }
 0x3b9   :  { %4301 = vmatmul.msk.f32.gmra.mxu1 %vm106_vm1, %v1508_v26 }
 0x3bc   :  { %v1629_v29 = vpop.f32.mrf.mxu0 }
 0x3bd   :  { %v1630_v4 = vadd.f32 %v4636_v8, %v1629_v29  ;;  %v1286_v29 = vadd.f32 %v1285_v14, %v5459_v7  ;;  %v4668_v7 = vmov 32.0  }
 0x3be   :  { %4540 = vrcp.f32 %v4668_v7 }
 0x3bf   :  { %v1635_v0 = vmax.f32 %v1630_v4, 0.0 }
 0x3c1   :  { %4308 = vmatmul.msk.f32.vlgmr.msra.gmra.mxu1 %vm106_vm1, %v1635_v0 }
 0x3c2   :  { %2000 = vmatpush.msra.mxu1 %v1979_v52 }
 0x3c4   :  { %v1632_v35 = vpop.f32.mrf.mxu0 }
 0x3c5   :  { %v1633_v12 = vadd.f32 %v4636_v8, %v1632_v35 }
 0x3c7   :  { %v1636_v28 = vmax.f32 %v1633_v12, 0.0  ;;  %v1906_v12 = vld [vmem:[%s6239_s1 + $0x8] sm:$0xff] }
 0x3c9   :  { %4309 = vmatmul.msk.f32.gmra.mxu1 %vm106_vm1, %v1636_v28 }
 0x3cc   :  { %v1757_v37 = vpop.f32.mrf.mxu0 }
 0x3cd   :  { %v1758_v13 = vadd.f32 %v4636_v8, %v1757_v37 }
 0x3cf   :  { %v1763_v33 = vmax.f32 %v1758_v13, 0.0 }
 0x3d1   :  { %4316 = vmatmul.msk.f32.vlgmr.msrb.gmra.mxu1 %vm106_vm1, %v1763_v33  ;;  %v4541_v33 = vpop.eup %4540 }
 0x3d2   :  { %vm1930_vm2 = vweird.f32 %v4541_v33 }
 0x3d4   :  { %v1760_v39 = vpop.f32.mrf.mxu0 }
 0x3d5   :  { %v1761_v36 = vadd.f32 %v4636_v8, %v1760_v39  ;;  %v1475_v8 = vadd.f32 %v1471_v1, %v1410_v59  ;;  %v1926_v39 = vmul.f32 32.0, %v4541_v33 }
 0x3d7   :  { %v1764_v45 = vmax.f32 %v1761_v36, 0.0  ;;  %v1927_v36 = vsub.f32 1.0, %v1926_v39 }
 0x3d9   :  { %4317 = vmatmul.msk.f32.gmra.mxu1 %vm106_vm1, %v1764_v45  ;;  %v1928_v45 = vmul.f32 %v4541_v33, %v1927_v36 }
 0x3db   :  { %v1929_v16 = vadd.f32 %v4541_v33, %v1928_v45 }
 0x3dd   :  { %v5511_v34 = vsel %vm1930_vm2, %v4541_v33, %v1929_v16 }
 0x3fd   :  { %v1727_v17 = vpop.f32.mrf.mxu3 }
 0x405   :  { %v1852_v19 = vpop.f32.mrf.mxu3 }
 0x40d   :  { %v1855_v30 = vpop.f32.mrf.mxu3 }
 0x42e   :  { %v1532_v2 = vpop.f32.mrf.mxu1 }
 0x42f   :  { %v1538_v60 = vadd.f32 %v1532_v2, %v1474_v57 }
 0x431   :  { %v1602_v18 = vadd.f32 %v1596_v42, %v1538_v60 }
 0x436   :  { %v1535_v53 = vpop.f32.mrf.mxu1 }
 0x437   :  { %v1539_v25 = vadd.f32 %v1535_v53, %v1475_v8  ;;  %v1978_v53 = vld [vmem:[%s6242_s4 + $0x1a0] sm:$0xff] }
 0x438   :  { %2001 = vmatpush.msra.mxu1 %v1978_v53 }
 0x439   :  { %v1603_v58 = vadd.f32 %v1599_v44, %v1539_v25 }
 0x43e   :  { %v1660_v20 = vpop.f32.mrf.mxu1 }
 0x43f   :  { %v1666_v61 = vadd.f32 %v1660_v20, %v1602_v18 }
 0x441   :  { %v1730_v5 = vadd.f32 %v1724_v49, %v1666_v61  ;;  %v1977_v49 = vld [vmem:[%s6242_s4 + $0x198] sm:$0xff] }
 0x442   :  { %2002 = vmatpush.msra.mxu1 %v1977_v49  ;;  %v1910_v49 = vld [vmem:[%s6240_s2 + $0x8] sm:$0xff] }
 0x444   :  { %2003 = vmatpush.msra.mxu1 %v1976_v54 }
 0x446   :  { %v1663_v24 = vpop.f32.mrf.mxu1 }
 0x447   :  { %v1667_v10 = vadd.f32 %v1663_v24, %v1603_v58 }
 0x449   :  { %v1731_v9 = vadd.f32 %v1727_v17, %v1667_v10 }
 0x44e   :  { %v1788_v62 = vpop.f32.mrf.mxu1 }
 0x44f   :  { %v1794_v6 = vadd.f32 %v1788_v62, %v1730_v5 }
 0x451   :  { %v1858_v38 = vadd.f32 %v1852_v19, %v1794_v6  ;;  %v4521_v6 = vld [vmem:[%s6243_s5 + $0x6] ss:$0 sm:$0xff] }
 0x453   :  { %v1860_v31 = vadd.f32 %v5340_v27, %v1858_v38 }
 0x455   :  { %v1862_v11 = vmax.f32 %v1860_v31, 0.0  ;;  %v4522_v31 = vld [vmem:[%s6243_s5 + $0x7] ss:$0 sm:$0xff] }
 0x456   :  { %v1791_v47 = vpop.f32.mrf.mxu1 }
 0x457   :  { %v1795_v32 = vadd.f32 %v1791_v47, %v1731_v9  ;;  %4322 = vmatmul.msk.f32.vlgmr.msra.gmra.mxu0 %vm106_vm1, %v1862_v11 }
 0x459   :  { %v1859_v40 = vadd.f32 %v1855_v30, %v1795_v32 }
 0x45b   :  { %v1861_v50 = vadd.f32 %v5340_v27, %v1859_v40 }
 0x45d   :  { %v1863_v23 = vmax.f32 %v1861_v50, 0.0 }
 0x45f   :  { %4323 = vmatmul.msk.f32.gmra.mxu0 %vm106_vm1, %v1863_v23 }
 0x4d4   :  { %v1891_v48 = vpop.f32.mrf.mxu0 }
 0x4d5   :  { %v1897_v22 = vadd.f32 %v1891_v48, %v1283_v21  ;;  %v2013_v48 = vld [vmem:[%s6241_s3] sm:$0xff] }
 0x4d7   :  { %v1901_v3 = vadd.f32 %v4520_v46, %v1897_v22  ;;  %v2014_v22 = vld [vmem:[%s6241_s3 + $0x8] sm:$0xff] }
 0x4d8   :  { %2036 = vst.msk [vmem:[#allocation2] sm:$0xff] %vm106_vm1, %v2014_v22 }
 0x4d9   :  { %v1903_v26 = vmul.f32 5.656854, %v1901_v3  ;;  %v4523_v3 = vld [vmem:[%s6243_s5 + $0x8] ss:$0 sm:$0xff] }
 0x4db   :  { %v5500_v27 = vadd.f32 %v1905_v41, %v1903_v26 }
 0x4dc   :  { %v1894_v4 = vpop.f32.mrf.mxu0 }
 0x4dd   :  { %v1898_v0 = vadd.f32 %v1894_v4, %v1286_v29  ;;  %v1919_v63 = vsel %vm106_vm1, %v5500_v27, 0.0 }
 0x4de   :  { %1920 = vadd.xlane.f32.xlu0 %v1919_v63  ;;  %v5566_v63 = vld [vmem:[%s6241_s3 + $0x18] sm:$0xff] }
 0x4df   :  { %v1902_v35 = vadd.f32 %v4520_v46, %v1898_v0  ;;  %2038 = vst.msk [vmem:[#allocation2 + $0x10] sm:$0xff] %vm106_vm1, %v5566_v63 }
 0x4e1   :  { %v1904_v28 = vmul.f32 5.656854, %v1902_v35 }
 0x4e3   :  { %v5507_v37 = vadd.f32 %v1906_v12, %v1904_v28  ;;  %v5578_v12 = vld [vmem:[%s6241_s3 + $0x10] sm:$0xff] }
 0x4e5   :  { %v1922_v13 = vsel %vm106_vm1, %v5507_v37, 0.0 }
 0x4e6   :  { %1923 = vadd.xlane.f32.xlu1 %v1922_v13 }
 0x551   :  { %v1921_v14 = vpop.xlane.xlu0 %1920 }
 0x552   :  { %v1932_v15 = vmul.f32 %v5511_v34, %v1921_v14  ;;  %v4327_v14 = vld [vmem:[%s6241_s3 + $0x28] sm:$0xff] }
 0x553   :  { %2041 = vst.msk [vmem:[#allocation2 + $0x20] sm:$0xff] %vm106_vm1, %v4327_v14 }
 0x554   :  { %v1934_v1 = vsub.f32 %v5500_v27, %v1932_v15 }
 0x556   :  { %v1936_v42 = vmul.f32 %v1934_v1, %v1934_v1 }
 0x558   :  { %v1938_v55 = vsel %vm106_vm1, %v1936_v42, 0.0 }
 0x559   :  { %v1924_v56 = vpop.xlane.xlu1 %1923  ;;  %1939 = vadd.xlane.f32.xlu0 %v1938_v55 }
 0x55a   :  { %v1933_v2 = vmul.f32 %v5511_v34, %v1924_v56 }
 0x55c   :  { %v1935_v44 = vsub.f32 %v5507_v37, %v1933_v2 }
 0x55e   :  { %v1937_v51 = vmul.f32 %v1935_v44, %v1935_v44 }
 0x560   :  { %v1941_v43 = vsel %vm106_vm1, %v1937_v51, 0.0 }
 0x561   :  { %1942 = vadd.xlane.f32.xlu1 %v1941_v43 }
 0x56d   :  { %2081 = vrot.lane.b32.xlu0 %v2014_v22, %s4669_s29 }
 0x575   :  { %2115 = vrot.lane.b32.xlu0 %v2013_v48, %s4670_s9 }
 0x57a   :  { %2079 = vrot.lane.b32.xlu1 %v2013_v48, %s4669_s29 }
 0x5cc   :  { %v1940_v20 = vpop.xlane.xlu0 %1939 }
 0x5cd   :  { %v1944_v57 = vmul.f32 %v1940_v20, %v5511_v34 }
 0x5cf   :  { %v1946_v17 = vadd.f32 1e-05, %v1944_v57 }
 0x5d1   :  { %4542 = vrsqrt.f32 %v1946_v17  ;;  %vm1954_vm4 = vweird.f32 %v1946_v17 }
 0x5d4   :  { %v1943_v60 = vpop.xlane.xlu1 %1942 }
 0x5d5   :  { %v1945_v59 = vmul.f32 %v1943_v60, %v5511_v34 }
 0x5d7   :  { %v4543_v24 = vpop.eup %4542  ;;  %v1947_v18 = vadd.f32 1e-05, %v1945_v59 }
 0x5d8   :  { %v1949_v8 = vmul.f32 %v4543_v24, %v1946_v17  ;;  %vm1955_vm3 = vweird.f32 %v4543_v24  ;;  %v5637_v17 = vld [vmem:[%s6240_s2 + $0x10] sm:$0xff] }
 0x5d9   :  { %4544 = vrsqrt.f32 %v1947_v18  ;;  %vm1956_vm5 = vmor %vm1954_vm4, %vm1955_vm3  ;;  %vm1964_vm7 = vweird.f32 %v1947_v18 }
 0x5da   :  { %v1950_v61 = vmul.f32 %v4543_v24, %v1949_v8 }
 0x5dc   :  { %v1951_v25 = vmul.f32 0.5, %v1950_v61  ;;  %v1912_v61 = vld [vmem:[%s6240_s2 + $0x18] sm:$0xff] }
 0x5de   :  { %v1952_v19 = vsub.f32 1.5, %v1951_v25 }
 0x5df   :  { %v4545_v5 = vpop.eup %4544  ;;  %v2082_v39 = vpop.permute.xlu0 %2081 }
 0x5e0   :  { %v1953_v62 = vmul.f32 %v4543_v24, %v1952_v19  ;;  %v1959_v58 = vmul.f32 %v4545_v5, %v1947_v18  ;;  %vm1965_vm6 = vweird.f32 %v4545_v5  ;;  %v5647_v18 = vld [vmem:[%s6241_s3 + $0x20] sm:$0xff] }
 0x5e1   :  { %vm1966_vm8 = vmor %vm1964_vm7, %vm1965_vm6 }
 0x5e2   :  { %v1957_v10 = vsel %vm1956_vm5, %v4543_v24, %v1953_v62  ;;  %v1960_v38 = vmul.f32 %v4545_v5, %v1959_v58 }
 0x5e3   :  { %v1968_v9 = vmul.f32 %v1957_v10, %v1934_v1 }
 0x5e4   :  { %v1961_v11 = vmul.f32 0.5, %v1960_v38 }
 0x5e5   :  { %v1971_v47 = vmul.f32 %v4521_v6, %v1968_v9 }
 0x5e6   :  { %v1962_v30 = vsub.f32 1.5, %v1961_v11 }
 0x5e7   :  { %v1974_v32 = vadd.f32 %v4522_v31, %v1971_v47  ;;  %v2116_v45 = vpop.permute.xlu0 %2115 }
 0x5e8   :  { %v1963_v40 = vmul.f32 %v4545_v5, %v1962_v30 }
 0x5e9   :  { %4324 = vmatmul.msk.f32.vlgmr.msra.gmra.mxu1 %vm106_vm1, %v1974_v32 }
 0x5ea   :  { %v1967_v50 = vsel %vm1966_vm8, %v4545_v5, %v1963_v40  ;;  %v1909_v5 = vld [vmem:[%s6240_s2] sm:$0xff] }
 0x5eb   :  { %v1969_v23 = vmul.f32 %v1967_v50, %v1935_v44 }
 0x5ec   :  { %v2080_v28 = vpop.permute.xlu1 %2079 }
 0x5ed   :  { %v1972_v21 = vmul.f32 %v4521_v6, %v1969_v23 }
 0x5ef   :  { %v1975_v46 = vadd.f32 %v4522_v31, %v1972_v21 }
 0x5f1   :  { %4325 = vmatmul.msk.f32.gmra.mxu1 %vm106_vm1, %v1975_v46 }
 0x666   :  { %v2005_v41 = vpop.f32.mrf.mxu1 }
 0x667   :  { %v2006_v26 = vadd.f32 %v4523_v3, %v2005_v41 }
 0x669   :  { %2023 = vrot.lane.b32.xlu2 %v2006_v26, %s4671_s12  ;;  %v2011_v35 = vmul.f32 0.35355338, %v2006_v26 }
 0x66e   :  { %v2008_v29 = vpop.f32.mrf.mxu1 }
 0x66f   :  { %v5555_v4 = vadd.f32 %v4523_v3, %v2008_v29 }
 0x671   :  { %2030 = vrot.lane.b32.xlu1 %v5555_v4, %s4671_s12  ;;  %v5600_v7 = vmul.f32 0.35355338, %v5555_v4 }
 0x6c3   :  { %v2024_v0 = vpop.permute.xlu2 %2023 }
 0x6c4   :  { %2037 = vst.msk [vmem:[#allocation2 + $0x8] sm:$0xff] %vm106_vm1, %v2024_v0  ;;  %4330 = vmatpush.xpose.msk.msrb.mxu2 %vm2045_vm9, %v2024_v0  ;;  %2155 = vrot.lane.b32.xlu0 %v2024_v0, %s4672_s13 }
 0x6c5   :  { %2083 = vrot.lane.b32.xlu2 %v2024_v0, %s4669_s29 }
 0x6c8   :  { %4331 = vmatpush.xpose.msk.msrb.mxu2 %vm2045_vm9, %v2014_v22 }
 0x6cc   :  { %4332 = vmatpush.xpose.msk.msrb.mxu2 %vm2045_vm9, %v2013_v48  ;;  %2151 = vrot.lane.b32.xlu0 %v2013_v48, %s4672_s13 }
 0x6cd   :  { %2077 = vrot.lane.b32.xlu2 %v2011_v35, %s4669_s29 }
 0x6cf   :  { %4333 = vmatmul.msk.f32.vlgmr.msrb.gmra.mxu2 %vm2045_vm9, %v2011_v35 }
 0x6d4   :  { %2218 = vrot.lane.b32.xlu0 %v5578_v12, %s4669_s29 }
 0x6d5   :  { %2119 = vrot.lane.b32.xlu2 %v2024_v0, %s4670_s9 }
 0x6dc   :  { %2026 = vrot.lane.b32.xlu0 %v2006_v26, %s4673_s17 }
 0x6dd   :  { %2117 = vrot.lane.b32.xlu2 %v2014_v22, %s4670_s9 }
 0x6e3   :  { %v5585_v13 = vpop.permute.xlu1 %2030 }
 0x6e4   :  { %2039 = vst.msk [vmem:[#allocation2 + $0x18] sm:$0xff] %vm106_vm1, %v5585_v13  ;;  %2222 = vrot.lane.b32.xlu1 %v5585_v13, %s4669_s29  ;;  %4346 = vmatpush.xpose.msk.msra.mxu2 %vm2045_vm9, %v5585_v13 }
 0x6e5   :  { %2113 = vrot.lane.b32.xlu2 %v2011_v35, %s4670_s9 }
 0x6e8   :  { %4347 = vmatpush.xpose.msk.msra.mxu2 %vm2045_vm9, %v5566_v63 }
 0x6ec   :  { %4348 = vmatpush.xpose.msk.msra.mxu2 %vm2045_vm9, %v5578_v12  ;;  %2149 = vrot.lane.b32.xlu1 %v2011_v35, %s4672_s13 }
 0x6ed   :  { %2153 = vrot.lane.b32.xlu2 %v2014_v22, %s4672_s13 }
 0x6ef   :  { %4349 = vmatmul.msk.f32.vlgmr.msra.gmra.mxu2 %vm2045_vm9, %v5600_v7 }
 0x6f5   :  { %2220 = vrot.lane.b32.xlu2 %v5566_v63, %s4669_s29 }
 0x6fd   :  { %2216 = vrot.lane.b32.xlu2 %v5600_v7, %s4669_s29 }
 0x71f   :  { %v2084_v33 = vpop.permute.xlu2 %2083 }
 0x720   :  { %4334 = vmatpush.xpose.msk.msra.mxu3 %vm2045_vm9, %v2084_v33  ;;  %v1914_v33 = vld [vmem:[%s6240_s2 + $0x28] sm:$0xff] }
 0x724   :  { %4335 = vmatpush.xpose.msk.msra.mxu3 %vm2045_vm9, %v2082_v39 }
 0x727   :  { %v2078_v36 = vpop.permute.xlu2 %2077 }
 0x728   :  { %4336 = vmatpush.xpose.msk.msra.mxu3 %vm2045_vm9, %v2080_v28 }
 0x72b   :  { %4337 = vmatmul.msk.f32.vlgmr.msra.gmra.mxu3 %vm2045_vm9, %v2078_v36 }
 0x72f   :  { %v2120_v16 = vpop.permute.xlu2 %2119 }
 0x730   :  { %4338 = vmatpush.xpose.msk.msrb.mxu0 %vm2045_vm9, %v2120_v16 }
 0x736   :  { %v2156_v15 = vpop.permute.xlu0 %2155 }
 0x737   :  { %v2118_v1 = vpop.permute.xlu2 %2117  ;;  %4342 = vmatpush.xpose.msk.msrb.mxu1 %vm2045_vm9, %v2156_v15 }
 0x738   :  { %4339 = vmatpush.xpose.msk.msrb.mxu0 %vm2045_vm9, %v2118_v1 }
 0x73c   :  { %4340 = vmatpush.xpose.msk.msrb.mxu0 %vm2045_vm9, %v2116_v45 }
 0x73e   :  { %v2152_v42 = vpop.permute.xlu0 %2151 }
 0x73f   :  { %v2114_v55 = vpop.permute.xlu2 %2113 }
 0x740   :  { %4341 = vmatmul.msk.f32.vlgmr.msrb.gmra.mxu0 %vm2045_vm9, %v2114_v55 }
 0x746   :  { %v2219_v56 = vpop.permute.xlu0 %2218 }
 0x747   :  { %v2154_v2 = vpop.permute.xlu2 %2153 }
 0x748   :  { %4343 = vmatpush.xpose.msk.msrb.mxu1 %vm2045_vm9, %v2154_v2 }
 0x74c   :  { %4344 = vmatpush.xpose.msk.msrb.mxu1 %vm2045_vm9, %v2152_v42 }
 0x74e   :  { %v2027_v44 = vpop.permute.xlu0 %2026 }
 0x74f   :  { %2042 = vst.msk [vmem:[#allocation2 + $0x28] sm:$0xff] %vm106_vm1, %v2027_v44  ;;  %2437 = vmatpush.msrb.mxu2 %v2027_v44  ;;  %v2221_v43 = vpop.permute.xlu2 %2220  ;;  %v4458_v8 = vpack.i.bf16 %v4327_v14, %v2027_v44 }
 0x751   :  { %2438 = vmatpush.msrb.mxu2 %v4327_v14 }
 0x752   :  { %v2074_v62 = vpop.f32.mrf.mxu2 }
 0x753   :  { %2439 = vmatpush.msrb.mxu2 %v5647_v18  ;;  %v5677_v6 = vadd.f32 %v2074_v62, %v1909_v5 }
 0x755   :  { %v2333_v10 = vsel %vm2332_vm10, %v5677_v6, -inf }
 0x756   :  { %v2223_v51 = vpop.permute.xlu1 %2222 }
 0x757   :  { %4350 = vmatpush.xpose.msk.msrb.mxu3 %vm2045_vm9, %v2223_v51  ;;  %v2217_v53 = vpop.permute.xlu2 %2216 }
 0x75b   :  { %4351 = vmatpush.xpose.msk.msrb.mxu3 %vm2045_vm9, %v2221_v43 }
 0x75e   :  { %v2150_v52 = vpop.permute.xlu1 %2149 }
 0x75f   :  { %4345 = vmatmul.msk.f32.vlgmr.msrb.gmra.mxu1 %vm2045_vm9, %v2150_v52  ;;  %4352 = vmatpush.xpose.msk.msrb.mxu3 %vm2045_vm9, %v2219_v56 }
 0x762   :  { %4353 = vmatmul.msk.f32.vlgmr.msrb.gmra.mxu3 %vm2045_vm9, %v2217_v53 }
 0x7ae   :  { %v2110_v54 = vpop.f32.mrf.mxu3 }
 0x7af   :  { %v2325_v20 = vadd.f32 %v2110_v54, %v1910_v49  ;;  %v5717_v49 = vld [vmem:[%s6241_s3 + $0x30] sm:$0xff]  ;;  %v4329_v54 = vld [vmem:[%s6241_s3 + $0x38] sm:$0xff] }
 0x7b0   :  { %2043 = vst.msk [vmem:[#allocation2 + $0x30] sm:$0xff] %vm106_vm1, %v4329_v54 }
 0x7b1   :  { %v2336_v57 = vsel %vm2332_vm10, %v2325_v20, -inf }
 0x7b2   :  { %2337 = vmax.xlane.f32.xlu1 %v2336_v57 }
 0x7bd   :  { %v2146_v60 = vpop.f32.mrf.mxu0 }
 0x7be   :  { %v5640_v59 = vadd.f32 %v2146_v60, %v5637_v17 }
 0x7c0   :  { %v2339_v24 = vsel %vm2332_vm10, %v5640_v59, -inf }
 0x7c1   :  { %2340 = vmax.xlane.f32.xlu2 %v2339_v24  ;;  %v1916_v24 = vld [vmem:[%s6240_s2 + $0x38] sm:$0xff] }
 0x7cb   :  { %4459 = vrot.lane.b32.xlu1 %v4458_v8, %s4669_s29 }
 0x7d3   :  { %2256 = vrot.lane.b32.xlu1 %v5566_v63, %s4670_s9 }
 0x7d9   :  { %2258 = vrot.lane.b32.xlu2 %v5585_v13, %s4670_s9 }
 0x7db   :  { %2252 = vrot.lane.b32.xlu1 %v5600_v7, %s4670_s9 }
 0x7dc   :  { %v2182_v25 = vpop.f32.mrf.mxu1 }
 0x7dd   :  { %v2327_v19 = vadd.f32 %v2182_v25, %v1912_v61 }
 0x7df   :  { %v2342_v58 = vsel %vm2332_vm10, %v2327_v19, -inf }
 0x7e1   :  { %2254 = vrot.lane.b32.xlu2 %v5578_v12, %s4670_s9 }
 0x7e3   :  { %2526 = vrot.lane.b32.xlu1 %v5647_v18, %s4670_s9 }
 0x7e5   :  { %v2249_v39 = vpop.f32.mrf.mxu3 }
 0x7e6   :  { %v2329_v36 = vadd.f32 %v2249_v39, %v1914_v33 }
 0x7e8   :  { %v2348_v45 = vsel %vm2332_vm10, %v2329_v36, -inf }
 0x7e9   :  { %4464 = vrot.lane.b32.xlu2 %v4458_v8, %s4670_s9 }
 0x7eb   :  { %2292 = vrot.lane.b32.xlu1 %v5566_v63, %s4672_s13 }
 0x7f1   :  { %2294 = vrot.lane.b32.xlu2 %v5585_v13, %s4672_s13 }
 0x7f3   :  { %2288 = vrot.lane.b32.xlu1 %v5600_v7, %s4672_s13 }
 0x7f9   :  { %2290 = vrot.lane.b32.xlu2 %v5578_v12, %s4672_s13 }
 0x81d   :  { %2343 = vmax.xlane.f32.xlu1 %v2342_v58  ;;  %v5737_v58 = vld [vmem:[%s6240_s2 + $0x30] sm:$0xff] }
 0x822   :  { %2334 = vmax.xlane.f32.xlu2 %v2333_v10 }
 0x825   :  { %v2338_v38 = vpop.xlane.xlu1 %2337 }
 0x826   :  { %v2358_v31 = vsub.f32 %v2325_v20, %v2338_v38 }
 0x828   :  { %v2367_v9 = vmul.f32 1.442695, %v2358_v31 }
 0x82a   :  { %4546 = vpow2.f32 %v2367_v9 }
 0x830   :  { %v5681_v11 = vpop.eup %4546 }
 0x831   :  { %v2384_v47 = vsel %vm2332_vm10, %v5681_v11, 0.0 }
 0x832   :  { %2385 = vadd.xlane.f32.xlu0 %v2384_v47  ;;  %v5753_v47 = vld [vmem:[%s6240_s2 + $0x20] sm:$0xff] }
 0x834   :  { %v2341_v30 = vpop.xlane.xlu2 %2340 }
 0x835   :  { %v2359_v63 = vsub.f32 %v5640_v59, %v2341_v30  ;;  %v2213_v30 = vpop.f32.mrf.mxu2 }
 0x836   :  { %4469 = vrot.lane.b32.xlu1 %v4458_v8, %s4672_s13 }
 0x837   :  { %v2369_v12 = vmul.f32 1.442695, %v2359_v63 }
 0x839   :  { %4548 = vpow2.f32 %v2369_v12 }
 0x83c   :  { %v2259_v32 = vpop.permute.xlu2 %2258 }
 0x83d   :  { %4354 = vmatpush.xpose.msk.msra.mxu0 %vm2045_vm9, %v2259_v32  ;;  %v4460_v40 = vpop.permute.xlu1 %4459  ;;  %v2328_v32 = vadd.f32 %v2213_v30, %v5753_v47 }
 0x83e   :  { %v4461_v50 = vunpack.i.l.bf16 %v4460_v40  ;;  %v4462_v23 = vunpack.i.h.bf16 %v4460_v40 }
 0x83f   :  { %v4549_v13 = vpop.eup %4548 }
 0x840   :  { %2472 = vmatpush.msra.mxu3 %v4461_v50  ;;  %v2387_v7 = vsel %vm2332_vm10, %v4549_v13, 0.0  ;;  %v2345_v50 = vsel %vm2332_vm10, %v2328_v32, -inf }
 0x842   :  { %2473 = vmatpush.msra.mxu3 %v4462_v23 }
 0x844   :  { %v2255_v21 = vpop.permute.xlu2 %2254 }
 0x845   :  { %v2257_v46 = vpop.permute.xlu1 %2256 }
 0x846   :  { %2447 = vrot.lane.b32.xlu0 %v5647_v18, %s4669_s29  ;;  %4355 = vmatpush.xpose.msk.msra.mxu0 %vm2045_vm9, %v2257_v46 }
 0x84a   :  { %4356 = vmatpush.xpose.msk.msra.mxu0 %vm2045_vm9, %v2255_v21 }
 0x84c   :  { %v4465_v48 = vpop.permute.xlu2 %4464 }
 0x84d   :  { %v4466_v22 = vunpack.i.l.bf16 %v4465_v48  ;;  %v2253_v3 = vpop.permute.xlu1 %2252  ;;  %v4467_v41 = vunpack.i.h.bf16 %v4465_v48 }
 0x84e   :  { %4357 = vmatmul.msk.f32.vlgmr.msra.gmra.mxu0 %vm2045_vm9, %v2253_v3 }
 0x84f   :  { %2551 = vmatpush.msrb.mxu0 %v4466_v22 }
 0x851   :  { %2552 = vmatpush.msrb.mxu0 %v4467_v41 }
 0x854   :  { %v2295_v26 = vpop.permute.xlu2 %2294 }
 0x855   :  { %4358 = vmatpush.xpose.msk.msra.mxu1 %vm2045_vm9, %v2295_v26  ;;  %v2527_v29 = vpop.permute.xlu1 %2526  ;;  %v2558_v26 = vld [vmem:[%s6242_s4 + $0x1c0] sm:$0xff] }
 0x856   :  { %2553 = vmatpush.msrb.mxu0 %v2527_v29 }
 0x85c   :  { %v2291_v35 = vpop.permute.xlu2 %2290 }
 0x85d   :  { %v2293_v0 = vpop.permute.xlu1 %2292 }
 0x85e   :  { %4359 = vmatpush.xpose.msk.msra.mxu1 %vm2045_vm9, %v2293_v0 }
 0x862   :  { %4360 = vmatpush.xpose.msk.msra.mxu1 %vm2045_vm9, %v2291_v35 }
 0x865   :  { %v2289_v28 = vpop.permute.xlu1 %2288 }
 0x866   :  { %4361 = vmatmul.msk.f32.vlgmr.msra.gmra.mxu1 %vm2045_vm9, %v2289_v28 }
 0x867   :  { %2577 = vmatpush.msrb.mxu1 %v2558_v26 }
 0x870   :  { %2388 = vadd.xlane.f32.xlu0 %v2387_v7 }
 0x878   :  { %2349 = vmax.xlane.f32.xlu0 %v2348_v45 }
 0x88c   :  { %2033 = vrot.lane.b32.xlu0 %v5555_v4, %s4673_s17 }
 0x890   :  { %v2344_v16 = vpop.xlane.xlu1 %2343 }
 0x891   :  { %v2360_v14 = vsub.f32 %v2327_v19, %v2344_v16 }
 0x893   :  { %v2371_v15 = vmul.f32 1.442695, %v2360_v14 }
 0x895   :  { %4550 = vpow2.f32 %v2371_v15  ;;  %v2335_v55 = vpop.xlane.xlu2 %2334 }
 0x896   :  { %v2357_v56 = vsub.f32 %v5677_v6, %v2335_v55 }
 0x898   :  { %v2365_v2 = vmul.f32 1.442695, %v2357_v56 }
 0x89a   :  { %4552 = vpow2.f32 %v2365_v2 }
 0x89b   :  { %v5704_v1 = vpop.eup %4550 }
 0x89c   :  { %v2390_v42 = vsel %vm2332_vm10, %v5704_v1, 0.0 }
 0x89d   :  { %2391 = vadd.xlane.f32.xlu2 %v2390_v42 }
 0x8a0   :  { %v4553_v51 = vpop.eup %4552 }
 0x8a1   :  { %v2381_v4 = vsel %vm2332_vm10, %v4553_v51, 0.0 }
 0x8a5   :  { %v2386_v44 = vpop.xlane.xlu0 %2385 }
 0x8a6   :  { %4554 = vrcp.f32 %v2386_v44 }
 0x8a8   :  { %v4470_v21 = vpop.permute.xlu1 %4469 }
 0x8a9   :  { %v4471_v22 = vunpack.i.l.bf16 %v4470_v21  ;;  %v4472_v3 = vunpack.i.h.bf16 %v4470_v21 }
 0x8ac   :  { %v4555_v43 = vpop.eup %4554 }
 0x8ad   :  { %v2414_v52 = vmul.f32 %v4555_v43, %v5681_v11  ;;  %v2479_v11 = vld [vmem:[%s6242_s4 + $0x1b8] sm:$0xff] }
 0x8ae   :  { %2498 = vmatpush.msra.mxu2 %v2479_v11 }
 0x8b5   :  { %2583 = vrot.lane.b32.xlu2 %v5647_v18, %s4672_s13 }
 0x8b6   :  { %2382 = vadd.xlane.f32.xlu0 %v2381_v4 }
 0x8b8   :  { %v2448_v53 = vpop.permute.xlu0 %2447 }
 0x8b9   :  { %2474 = vmatpush.msra.mxu3 %v2448_v53 }
 0x8ba   :  { %4363 = vmatmul.msk.f32.vlgmr.msra.gmra.mxu3 %vm2332_vm10, %v2414_v52 }
 0x8ca   :  { %2665 = vrot.lane.b32.xlu0 %v5717_v49, %s4669_s29 }
 0x8cb   :  { %v2285_v6 = vpop.f32.mrf.mxu0 }
 0x8cc   :  { %v2330_v10 = vadd.f32 %v2285_v6, %v5737_v58 }
 0x8ce   :  { %v2351_v31 = vsel %vm2332_vm10, %v2330_v10, -inf }
 0x8e3   :  { %v2389_v20 = vpop.xlane.xlu0 %2388  ;;  %v2321_v18 = vpop.f32.mrf.mxu1 }
 0x8e4   :  { %4556 = vrcp.f32 %v2389_v20  ;;  %v2331_v25 = vadd.f32 %v2321_v18, %v1916_v24  ;;  %v2615_v20 = vld [vmem:[%s6242_s4 + $0x1c8] sm:$0xff] }
 0x8e6   :  { %v2354_v19 = vsel %vm2332_vm10, %v2331_v25, -inf }
 0x8ea   :  { %v4557_v57 = vpop.eup %4556 }
 0x8eb   :  { %v2415_v60 = vmul.f32 %v4557_v57, %v4549_v13  ;;  %v2350_v59 = vpop.xlane.xlu0 %2349 }
 0x8ec   :  { %v2362_v8 = vsub.f32 %v2329_v36, %v2350_v59 }
 0x8ed   :  { %4366 = vmatmul.msk.f32.vlgmr.msrb.gmra.mxu0 %vm2332_vm10, %v2415_v60 }
 0x8ee   :  { %v2375_v61 = vmul.f32 1.442695, %v2362_v8 }
 0x8f0   :  { %4558 = vpow2.f32 %v2375_v61 }
 0x8f4   :  { %2355 = vmax.xlane.f32.xlu0 %v2354_v19 }
 0x8f6   :  { %v5730_v5 = vpop.eup %4558 }
 0x8f7   :  { %v2396_v62 = vsel %vm2332_vm10, %v5730_v5, 0.0 }
 0x8f8   :  { %2397 = vadd.xlane.f32.xlu1 %v2396_v62 }
 0x8fe   :  { %v2034_v38 = vpop.permute.xlu0 %2033 }
 0x8ff   :  { %2044 = vst.msk [vmem:[#allocation2 + $0x38] sm:$0xff] %vm106_vm1, %v2034_v38  ;;  %2656 = vmatpush.msra.mxu0 %v2034_v38  ;;  %v5742_v9 = vpack.i.bf16 %v4329_v54, %v2034_v38 }
 0x900   :  { %2352 = vmax.xlane.f32.xlu1 %v2351_v31 }
 0x901   :  { %4474 = vrot.lane.b32.xlu2 %v5742_v9, %s4669_s29  ;;  %2657 = vmatpush.msra.mxu0 %v4329_v54 }
 0x903   :  { %2658 = vmatpush.msra.mxu0 %v5717_v49 }
 0x910   :  { %v2392_v23 = vpop.xlane.xlu2 %2391 }
 0x918   :  { %v2584_v41 = vpop.permute.xlu2 %2583 }
 0x929   :  { %v2383_v40 = vpop.xlane.xlu0 %2382 }
 0x92a   :  { %4560 = vrcp.f32 %v2383_v40  ;;  %2346 = vmax.xlane.f32.xlu2 %v2345_v50 }
 0x92b   :  { %4562 = vrcp.f32 %v2392_v23 }
 0x930   :  { %v4561_v46 = vpop.eup %4560 }
 0x931   :  { %v2413_v48 = vmul.f32 %v4561_v46, %v4553_v51  ;;  %v4563_v0 = vpop.eup %4562  ;;  %v2444_v51 = vld [vmem:[%s6242_s4 + $0x1b0] sm:$0xff] }
 0x932   :  { %v2416_v63 = vmul.f32 %v4563_v0, %v5704_v1  ;;  %2521 = vmatpush.msrb.mxu3 %v2444_v51 }
 0x933   :  { %4362 = vmatmul.msk.f32.vlgmr.msrb.gmra.mxu2 %vm2332_vm10, %v2413_v48 }
 0x934   :  { %2608 = vmatpush.msrb.mxu2 %v4471_v22  ;;  %2634 = vmatpush.msra.mxu3 %v2615_v20 }
 0x936   :  { %2609 = vmatpush.msrb.mxu2 %v4472_v3  ;;  %v4524_v3 = vld [vmem:[%s6243_s5 + $0x9] ss:$0 sm:$0xff] }
 0x938   :  { %2610 = vmatpush.msrb.mxu2 %v2584_v41 }
 0x93c   :  { %v2666_v28 = vpop.permute.xlu0 %2665 }
 0x93d   :  { %v2476_v29 = vpop.f32.mrf.mxu3 }
 0x93e   :  { %4364 = vmatmul.msk.f32.vlgmr.msra.gmra.mxu2 %vm2045_vm9, %v2476_v29 }
 0x93f   :  { %2715 = vmatpush.msra.mxu2 %v2479_v11 }
 0x946   :  { %4368 = vmatmul.msk.f32.vlgmr.msrb.gmra.mxu2 %vm2332_vm10, %v2416_v63 }
 0x95b   :  { %v4475_v35 = vpop.permute.xlu2 %4474 }
 0x95c   :  { %v4476_v12 = vunpack.i.l.bf16 %v4475_v35  ;;  %v4477_v13 = vunpack.i.h.bf16 %v4475_v35 }
 0x95e   :  { %2690 = vmatpush.msra.mxu1 %v4476_v12 }
 0x960   :  { %2691 = vmatpush.msra.mxu1 %v4477_v13 }
 0x962   :  { %2692 = vmatpush.msra.mxu1 %v2666_v28 }
 0x967   :  { %v2356_v7 = vpop.xlane.xlu0 %2355 }
 0x968   :  { %v2364_v33 = vsub.f32 %v2331_v25, %v2356_v7 }
 0x96a   :  { %v2379_v39 = vmul.f32 1.442695, %v2364_v33  ;;  %v2555_v36 = vpop.f32.mrf.mxu0 }
 0x96b   :  { %4367 = vmatmul.msk.f32.vlgmr.msrb.gmra.mxu1 %vm2045_vm9, %v2555_v36  ;;  %v2398_v45 = vpop.xlane.xlu1 %2397  ;;  %v2915_v36 = vld [vmem:[%s6242_s4 + $0x1e0] sm:$0xff] }
 0x96c   :  { %4564 = vpow2.f32 %v2379_v39  ;;  %2793 = vmatpush.msrb.mxu1 %v2558_v26  ;;  %v2916_v39 = vld [vmem:[%s6242_s4 + $0x1e8] sm:$0xff] }
 0x96d   :  { %4566 = vrcp.f32 %v2398_v45 }
 0x972   :  { %v4565_v16 = vpop.eup %4564 }
 0x973   :  { %v4567_v14 = vpop.eup %4566  ;;  %v2353_v15 = vpop.xlane.xlu1 %2352  ;;  %v2402_v1 = vsel %vm2332_vm10, %v4565_v16, 0.0 }
 0x974   :  { %v2418_v42 = vmul.f32 %v4567_v14, %v5730_v5  ;;  %v2363_v55 = vsub.f32 %v2330_v10, %v2353_v15  ;;  %2403 = vadd.xlane.f32.xlu2 %v2402_v1  ;;  %v2913_v14 = vld [vmem:[%s6242_s4 + $0x1d0] sm:$0xff] }
 0x976   :  { %v2377_v56 = vmul.f32 1.442695, %v2363_v55  ;;  %4371 = vmatmul.msk.f32.vlgmr.msra.gmra.mxu1 %vm2332_vm10, %v2418_v42 }
 0x978   :  { %4568 = vpow2.f32 %v2377_v56 }
 0x97e   :  { %v4569_v2 = vpop.eup %4568 }
 0x97f   :  { %v2399_v44 = vsel %vm2332_vm10, %v4569_v2, 0.0 }
 0x980   :  { %2400 = vadd.xlane.f32.xlu0 %v2399_v44 }
 0x98c   :  { %2799 = vrot.lane.b32.xlu2 %v5717_v49, %s4672_s13 }
 0x994   :  { %4484 = vrot.lane.b32.xlu0 %v5742_v9, %s4670_s9 }
 0x99d   :  { %v2347_v43 = vpop.xlane.xlu2 %2346 }
 0x99e   :  { %v2361_v4 = vsub.f32 %v2328_v32, %v2347_v43 }
 0x9a0   :  { %v2373_v52 = vmul.f32 1.442695, %v2361_v4 }
 0x9a2   :  { %4570 = vpow2.f32 %v2373_v52 }
 0x9a8   :  { %v4571_v53 = vpop.eup %4570 }
 0x9a9   :  { %v2393_v54 = vsel %vm2332_vm10, %v4571_v53, 0.0 }
 0x9aa   :  { %2394 = vadd.xlane.f32.xlu1 %v2393_v54 }
 0x9b6   :  { %v2441_v57 = vpop.f32.mrf.mxu2 }
 0x9b7   :  { %4365 = vmatmul.msk.f32.vlgmr.msrb.gmra.mxu3 %vm2045_vm9, %v2441_v57 }
 0x9b8   :  { %2738 = vmatpush.msrb.mxu3 %v2444_v51 }
 0x9c1   :  { %v2500_v60 = vpop.f32.mrf.mxu2 }
 0x9c3   :  { %4479 = vrot.lane.b32.xlu1 %v5742_v9, %s4672_s13 }
 0x9c9   :  { %v2612_v59 = vpop.f32.mrf.mxu2 }
 0x9ca   :  { %4369 = vmatmul.msk.f32.vlgmr.msra.gmra.mxu3 %vm2045_vm9, %v2612_v59 }
 0x9cb   :  { %2743 = vrot.lane.b32.xlu1 %v5717_v49, %s4670_s9  ;;  %2849 = vmatpush.msra.mxu3 %v2615_v20 }
 0x9e7   :  { %v2404_v10 = vpop.xlane.xlu2 %2403 }
 0x9e8   :  { %v2579_v24 = vpop.f32.mrf.mxu1 }
 0x9ef   :  { %v2800_v11 = vpop.permute.xlu2 %2799 }
 0x9f3   :  { %v2694_v18 = vpop.f32.mrf.mxu1  ;;  %v2401_v8 = vpop.xlane.xlu0 %2400 }
 0x9f4   :  { %4372 = vmatmul.msk.f32.vlgmr.msra.gmra.mxu2 %vm2045_vm9, %v2694_v18  ;;  %v4526_v18 = vld [vmem:[%s6243_s5 + $0xb] ss:$0 sm:$0xff] }
 0xa06   :  { %v4485_v61 = vpop.permute.xlu0 %4484 }
 0xa07   :  { %v4486_v25 = vunpack.i.l.bf16 %v4485_v61  ;;  %v4487_v19 = vunpack.i.h.bf16 %v4485_v61 }
 0xa09   :  { %2768 = vmatpush.msrb.mxu0 %v4486_v25 }
 0xa0b   :  { %2769 = vmatpush.msrb.mxu0 %v4487_v19  ;;  %v2957_v19 = vld [vmem:[%s6242_s4 + $0x228] sm:$0xff] }
 0xa0c   :  { %2973 = vmatpush.msra.mxu1 %v2957_v19 }
 0xa1d   :  { %v2395_v5 = vpop.xlane.xlu1 %2394 }
 0xa1e   :  { %4572 = vrcp.f32 %v2395_v5  ;;  %v2956_v5 = vld [vmem:[%s6242_s4 + $0x220] sm:$0xff] }
 0xa1f   :  { %4574 = vrcp.f32 %v2404_v10  ;;  %2974 = vmatpush.msra.mxu1 %v2956_v5  ;;  %v2953_v10 = vld [vmem:[%s6242_s4 + $0x208] sm:$0xff] }
 0xa20   :  { %4576 = vrcp.f32 %v2401_v8  ;;  %v4529_v5 = vld [vmem:[%s6243_s5 + $0xe] ss:$0 sm:$0xff] }
 0xa24   :  { %v4573_v62 = vpop.eup %4572 }
 0xa25   :  { %v2417_v6 = vmul.f32 %v4573_v62, %v4571_v53  ;;  %v4575_v31 = vpop.eup %4574  ;;  %v2955_v62 = vld [vmem:[%s6242_s4 + $0x218] sm:$0xff] }
 0xa26   :  { %v4577_v30 = vpop.eup %4576  ;;  %v2420_v32 = vmul.f32 %v4575_v31, %v4565_v16  ;;  %v2914_v16 = vld [vmem:[%s6242_s4 + $0x1d8] sm:$0xff]  ;;  %2975 = vmatpush.msra.mxu1 %v2955_v62  ;;  %v4530_v62 = vld [vmem:[%s6243_s5 + $0xf] ss:$0 sm:$0xff] }
 0xa27   :  { %4370 = vmatmul.msk.f32.vlgmr.msra.gmra.mxu0 %vm2332_vm10, %v2417_v6  ;;  %v2419_v40 = vmul.f32 %v4577_v30, %v4569_v2  ;;  %v2954_v6 = vld [vmem:[%s6242_s4 + $0x210] sm:$0xff]  ;;  %v2951_v31 = vld [vmem:[%s6242_s4 + $0x1f8] sm:$0xff] }
 0xa28   :  { %2976 = vmatpush.msra.mxu1 %v2954_v6 }
 0xa2a   :  { %2977 = vmatpush.msra.mxu1 %v2953_v10 }
 0xa35   :  { %v4480_v49 = vpop.permute.xlu1 %4479 }
 0xa36   :  { %v4481_v38 = vunpack.i.l.bf16 %v4480_v49  ;;  %v4482_v9 = vunpack.i.h.bf16 %v4480_v49  ;;  %v2952_v49 = vld [vmem:[%s6242_s4 + $0x200] sm:$0xff] }
 0xa37   :  { %2978 = vmatpush.msra.mxu1 %v2952_v49 }
 0xa38   :  { %2824 = vmatpush.msrb.mxu2 %v4481_v38 }
 0xa39   :  { %2979 = vmatpush.msra.mxu1 %v2951_v31 }
 0xa3a   :  { %2825 = vmatpush.msrb.mxu2 %v4482_v9  ;;  %v2523_v23 = vpop.f32.mrf.mxu3 }
 0xa3b   :  { %v2524_v21 = vadd.f32 %v2523_v23, %v2500_v60 }
 0xa3c   :  { %2826 = vmatpush.msrb.mxu2 %v2800_v11  ;;  %v2950_v11 = vld [vmem:[%s6242_s4 + $0x1f0] sm:$0xff] }
 0xa3d   :  { %v2744_v50 = vpop.permute.xlu1 %2743  ;;  %4376 = vmatmul.msk.f32.vlgmr.msrb.gmra.mxu2 %vm2332_vm10, %v2420_v32  ;;  %v2582_v46 = vadd.f32 %v2579_v24, %v2524_v21  ;;  %v4525_v24 = vld [vmem:[%s6243_s5 + $0xa] ss:$0 sm:$0xff]  ;;  %2980 = vmatpush.msra.mxu1 %v2950_v11 }
 0xa3e   :  { %2770 = vmatpush.msrb.mxu0 %v2744_v50  ;;  %v4527_v50 = vld [vmem:[%s6243_s5 + $0xc] ss:$0 sm:$0xff] }
 0xa3f   :  { %4374 = vmatmul.msk.f32.vlgmr.msrb.gmra.mxu0 %vm2332_vm10, %v2419_v40 }
 0xa40   :  { %2937 = vmatpush.msra.mxu0 %v2916_v39 }
 0xa42   :  { %2938 = vmatpush.msra.mxu0 %v2915_v36 }
 0xa44   :  { %2939 = vmatpush.msra.mxu0 %v2914_v16 }
 0xa46   :  { %2940 = vmatpush.msra.mxu0 %v2913_v14 }
 0xa4d   :  { %v2636_v48 = vpop.f32.mrf.mxu3 }
 0xa4e   :  { %v2639_v22 = vadd.f32 %v2636_v48, %v2582_v46 }
 0xa50   :  { %v2855_v41 = vadd.f32 %v2639_v22, %v5500_v27 }
 0xa52   :  { %v5794_v26 = vadd.f32 %v4524_v3, %v2855_v41 }
 0xa54   :  { %v2863_v29 = vsel %vm106_vm1, %v5794_v26, 0.0 }
 0xa55   :  { %2864 = vadd.xlane.f32.xlu2 %v2863_v29 }
 0xa77   :  { %v2717_v63 = vpop.f32.mrf.mxu2 }
 0xaa4   :  { %v2660_v0 = vpop.f32.mrf.mxu0 }
 0xaa5   :  { %4373 = vmatmul.msk.f32.vlgmr.msrb.gmra.mxu3 %vm2045_vm9, %v2660_v0 }
 0xabc   :  { %v2772_v35 = vpop.f32.mrf.mxu0 }
 0xabd   :  { %4375 = vmatmul.msk.f32.vlgmr.msrb.gmra.mxu1 %vm2045_vm9, %v2772_v35 }
 0xac0   :  { %v2828_v12 = vpop.f32.mrf.mxu2 }
 0xac1   :  { %4377 = vmatmul.msk.f32.vlgmr.msra.gmra.mxu3 %vm2045_vm9, %v2828_v12 }
 0xac8   :  { %v2865_v28 = vpop.xlane.xlu2 %2864 }
 0xac9   :  { %v2869_v13 = vmul.f32 %v2865_v28, %v5511_v34 }
 0xacb   :  { %v2871_v27 = vsub.f32 %v5794_v26, %v2869_v13 }
 0xacd   :  { %v2873_v7 = vmul.f32 %v2871_v27, %v2871_v27 }
 0xacf   :  { %v2875_v33 = vsel %vm106_vm1, %v2873_v7, 0.0 }
 0xad0   :  { %2876 = vadd.xlane.f32.xlu1 %v2875_v33  ;;  %v4528_v33 = vld [vmem:[%s6243_s5 + $0xd] ss:$0 sm:$0xff] }
 0xb28   :  { %v2740_v45 = vpop.f32.mrf.mxu3 }
 0xb29   :  { %v2741_v1 = vadd.f32 %v2740_v45, %v2717_v63 }
 0xb3a   :  { %v2795_v15 = vpop.f32.mrf.mxu1 }
 0xb3b   :  { %v2798_v42 = vadd.f32 %v2795_v15, %v2741_v1 }
 0xb43   :  { %v2877_v55 = vpop.xlane.xlu1 %2876 }
 0xb44   :  { %v2881_v56 = vmul.f32 %v2877_v55, %v5511_v34  ;;  %v2851_v2 = vpop.f32.mrf.mxu3 }
 0xb45   :  { %v2854_v44 = vadd.f32 %v2851_v2, %v2798_v42 }
 0xb46   :  { %v2883_v51 = vadd.f32 1e-05, %v2881_v56 }
 0xb47   :  { %v2856_v43 = vadd.f32 %v2854_v44, %v5507_v37 }
 0xb48   :  { %4578 = vrsqrt.f32 %v2883_v51  ;;  %vm2891_vm12 = vweird.f32 %v2883_v51 }
 0xb49   :  { %v5818_v4 = vadd.f32 %v4524_v3, %v2856_v43  ;;  %v3047_v43 = vld [vmem:[%s6242_s4 + $0x238] sm:$0xff] }
 0xb4b   :  { %v2866_v52 = vsel %vm106_vm1, %v5818_v4, 0.0 }
 0xb4c   :  { %2867 = vadd.xlane.f32.xlu0 %v2866_v52  ;;  %v3046_v52 = vld [vmem:[%s6242_s4 + $0x230] sm:$0xff] }
 0xb4e   :  { %v4579_v53 = vpop.eup %4578 }
 0xb4f   :  { %v2886_v54 = vmul.f32 %v4579_v53, %v2883_v51  ;;  %vm2892_vm11 = vweird.f32 %v4579_v53  ;;  %v3048_v51 = vld [vmem:[%s6242_s4 + $0x240] sm:$0xff] }
 0xb50   :  { %vm2893_vm13 = vmor %vm2891_vm12, %vm2892_vm11 }
 0xb51   :  { %v2887_v20 = vmul.f32 %v4579_v53, %v2886_v54 }
 0xb53   :  { %v2888_v57 = vmul.f32 0.5, %v2887_v20 }
 0xb55   :  { %v2889_v60 = vsub.f32 1.5, %v2888_v57 }
 0xb57   :  { %v2890_v59 = vmul.f32 %v4579_v53, %v2889_v60 }
 0xb59   :  { %v2894_v37 = vsel %vm2893_vm13, %v4579_v53, %v2890_v59 }
 0xb5a   :  { %v2905_v8 = vmul.f32 %v2894_v37, %v2871_v27 }
 0xb5c   :  { %v2908_v61 = vmul.f32 %v4525_v24, %v2905_v8 }
 0xb5e   :  { %v2911_v25 = vadd.f32 %v4526_v18, %v2908_v61 }
 0xb60   :  { %4378 = vmatmul.msk.f32.vlgmr.msra.gmra.mxu0 %vm106_vm1, %v2911_v25 }
 0xbbf   :  { %v2868_v38 = vpop.xlane.xlu0 %2867 }
 0xbc0   :  { %v2870_v9 = vmul.f32 %v2868_v38, %v5511_v34 }
 0xbc2   :  { %v2872_v30 = vsub.f32 %v5818_v4, %v2870_v9 }
 0xbc4   :  { %v2874_v32 = vmul.f32 %v2872_v30, %v2872_v30 }
 0xbc6   :  { %v2878_v40 = vsel %vm106_vm1, %v2874_v32, 0.0  ;;  %v4531_v32 = vld [vmem:[%s6243_s5 + $0x10] ss:$0 sm:$0xff] }
 0xbc7   :  { %2879 = vadd.xlane.f32.xlu2 %v2878_v40 }
 0xbdd   :  { %v2942_v23 = vpop.f32.mrf.mxu0 }
 0xbde   :  { %v2943_v21 = vadd.f32 %v4527_v50, %v2942_v23  ;;  %v5909_v23 = vld [vmem:[%s6241_s3 + $0x40] sm:$0xff] }
 0xbe0   :  { %v2948_v46 = vmax.f32 %v2943_v21, 0.0 }
 0xbe2   :  { %4380 = vmatmul.msk.f32.vlgmr.msra.gmra.mxu1 %vm2958_vm14, %v2948_v46  ;;  %v4385_v46 = vld [vmem:[%s6241_s3 + $0x48] sm:$0xff] }
 0xbe3   :  { %3108 = vst.msk [vmem:[#allocation2 + $0x40] sm:$0xff] %vm106_vm1, %v4385_v46 }
 0xc3a   :  { %v2880_v48 = vpop.xlane.xlu2 %2879 }
 0xc3b   :  { %v2882_v22 = vmul.f32 %v2880_v48, %v5511_v34 }
 0xc3d   :  { %v2884_v3 = vadd.f32 1e-05, %v2882_v22 }
 0xc3f   :  { %4580 = vrsqrt.f32 %v2884_v3  ;;  %vm2901_vm0 = vweird.f32 %v2884_v3 }
 0xc45   :  { %v4581_v41 = vpop.eup %4580 }
 0xc46   :  { %v2896_v29 = vmul.f32 %v4581_v41, %v2884_v3  ;;  %vm2902_vm15 = vweird.f32 %v4581_v41 }
 0xc47   :  { %vm2903_vm2 = vmor %vm2901_vm0, %vm2902_vm15 }
 0xc48   :  { %v2897_v0 = vmul.f32 %v4581_v41, %v2896_v29 }
 0xc4a   :  { %v2898_v63 = vmul.f32 0.5, %v2897_v0 }
 0xc4c   :  { %v2899_v35 = vsub.f32 1.5, %v2898_v63 }
 0xc4e   :  { %v2900_v12 = vmul.f32 %v4581_v41, %v2899_v35 }
 0xc50   :  { %v2904_v28 = vsel %vm2903_vm2, %v4581_v41, %v2900_v12 }
 0xc51   :  { %v2906_v13 = vmul.f32 %v2904_v28, %v2872_v30 }
 0xc53   :  { %v2909_v27 = vmul.f32 %v4525_v24, %v2906_v13 }
 0xc55   :  { %v2912_v7 = vadd.f32 %v4526_v18, %v2909_v27 }
 0xc57   :  { %4379 = vmatmul.msk.f32.gmra.mxu0 %vm106_vm1, %v2912_v7 }
 0xc5f   :  { %v2982_v39 = vpop.f32.mrf.mxu1 }
 0xc60   :  { %v2988_v36 = vadd.f32 %v2982_v39, %v5794_v26  ;;  %v3049_v26 = vld [vmem:[%s6242_s4 + $0x248] sm:$0xff]  ;;  %v4386_v39 = vld [vmem:[%s6241_s3 + $0x50] sm:$0xff] }
 0xc61   :  { %3070 = vmatpush.msra.mxu2 %v3049_v26 }
 0xc62   :  { %v5866_v45 = vadd.f32 %v4528_v33, %v2988_v36 }
 0xc63   :  { %3071 = vmatpush.msra.mxu2 %v3048_v51 }
 0xc64   :  { %v2996_v16 = vsel %vm106_vm1, %v5866_v45, 0.0 }
 0xc65   :  { %2997 = vadd.xlane.f32.xlu1 %v2996_v16  ;;  %3072 = vmatpush.msra.mxu2 %v3047_v43 }
 0xc67   :  { %3073 = vmatpush.msra.mxu2 %v3046_v52 }
 0xcd4   :  { %v2945_v14 = vpop.f32.mrf.mxu0 }
 0xcd5   :  { %v2946_v15 = vadd.f32 %v4527_v50, %v2945_v14  ;;  %v4387_v14 = vld [vmem:[%s6241_s3 + $0x58] sm:$0xff] }
 0xcd6   :  { %3110 = vst.msk [vmem:[#allocation2 + $0x50] sm:$0xff] %vm106_vm1, %v4387_v14 }
 0xcd7   :  { %v2949_v1 = vmax.f32 %v2946_v15, 0.0 }
 0xcd8   :  { %v2998_v42 = vpop.xlane.xlu1 %2997 }
 0xcd9   :  { %v3002_v55 = vmul.f32 %v2998_v42, %v5511_v34  ;;  %4381 = vmatmul.msk.f32.gmra.mxu1 %vm2958_vm14, %v2949_v1  ;;  %v4389_v1 = vld [vmem:[%s6241_s3 + $0x68] sm:$0xff] }
 0xcda   :  { %3113 = vst.msk [vmem:[#allocation2 + $0x60] sm:$0xff] %vm106_vm1, %v4389_v1 }
 0xcdb   :  { %v3004_v56 = vsub.f32 %v5866_v45, %v3002_v55 }
 0xcdd   :  { %v3006_v2 = vmul.f32 %v3004_v56, %v3004_v56 }
 0xcdf   :  { %v3008_v44 = vsel %vm106_vm1, %v3006_v2, 0.0 }
 0xce0   :  { %3009 = vadd.xlane.f32.xlu2 %v3008_v44 }
 0xd53   :  { %v3010_v53 = vpop.xlane.xlu2 %3009 }
 0xd54   :  { %v3014_v54 = vmul.f32 %v3010_v53, %v5511_v34 }
 0xd56   :  { %v3016_v20 = vadd.f32 1e-05, %v3014_v54  ;;  %v2985_v57 = vpop.f32.mrf.mxu1 }
 0xd57   :  { %v2989_v60 = vadd.f32 %v2985_v57, %v5818_v4 }
 0xd58   :  { %4582 = vrsqrt.f32 %v3016_v20  ;;  %vm3024_vm4 = vweird.f32 %v3016_v20 }
 0xd59   :  { %v5888_v59 = vadd.f32 %v4528_v33, %v2989_v60 }
 0xd5b   :  { %v2999_v24 = vsel %vm106_vm1, %v5888_v59, 0.0 }
 0xd5c   :  { %3000 = vadd.xlane.f32.xlu1 %v2999_v24 }
 0xd5e   :  { %v4583_v37 = vpop.eup %4582 }
 0xd5f   :  { %v3019_v18 = vmul.f32 %v4583_v37, %v3016_v20  ;;  %vm3025_vm3 = vweird.f32 %v4583_v37  ;;  %v5976_v20 = vld [vmem:[%s6241_s3 + $0x60] sm:$0xff] }
 0xd60   :  { %vm3026_vm5 = vmor %vm3024_vm4, %vm3025_vm3 }
 0xd61   :  { %v3020_v8 = vmul.f32 %v4583_v37, %v3019_v18 }
 0xd63   :  { %v3021_v61 = vmul.f32 0.5, %v3020_v8 }
 0xd65   :  { %v3022_v25 = vsub.f32 1.5, %v3021_v61 }
 0xd67   :  { %v3023_v19 = vmul.f32 %v4583_v37, %v3022_v25 }
 0xd69   :  { %v3027_v4 = vsel %vm3026_vm5, %v4583_v37, %v3023_v19 }
 0xd6a   :  { %v3038_v6 = vmul.f32 %v3027_v4, %v3004_v56  ;;  %v4637_v4 = vld [vmem:[%s6240_s2 + $0x8] sm:$0xff] }
 0xd6c   :  { %v3041_v10 = vmul.f32 %v4529_v5, %v3038_v6 }
 0xd6e   :  { %v3044_v49 = vadd.f32 %v4530_v62, %v3041_v10 }
 0xd70   :  { %4382 = vmatmul.msk.f32.vlgmr.msra.gmra.mxu2 %vm106_vm1, %v3044_v49 }
 0xdcf   :  { %v3001_v38 = vpop.xlane.xlu1 %3000 }
 0xdd0   :  { %v3003_v31 = vmul.f32 %v3001_v38, %v5511_v34 }
 0xdd2   :  { %v3005_v9 = vsub.f32 %v5888_v59, %v3003_v31 }
 0xdd4   :  { %v3007_v11 = vmul.f32 %v3005_v9, %v3005_v9 }
 0xdd6   :  { %v3011_v30 = vsel %vm106_vm1, %v3007_v11, 0.0 }
 0xdd7   :  { %3012 = vadd.xlane.f32.xlu2 %v3011_v30 }
 0xdef   :  { %3188 = vrot.lane.b32.xlu2 %v4385_v46, %s4670_s9 }
 0xdf3   :  { %v3075_v40 = vpop.f32.mrf.mxu2 }
 0xdf4   :  { %v3076_v50 = vadd.f32 %v4531_v32, %v3075_v40 }
 0xdf6   :  { %3094 = vrot.lane.b32.xlu0 %v3076_v50, %s4671_s12  ;;  %v5913_v21 = vmul.f32 0.35355338, %v3076_v50 }
 0xdfe   :  { %3186 = vrot.lane.b32.xlu0 %v5909_v23, %s4670_s9 }
 0xe06   :  { %3184 = vrot.lane.b32.xlu0 %v5913_v21, %s4670_s9 }
 0xe0e   :  { %3152 = vrot.lane.b32.xlu0 %v4385_v46, %s4669_s29 }
 0xe4a   :  { %v3013_v48 = vpop.xlane.xlu2 %3012 }
 0xe4b   :  { %v3015_v22 = vmul.f32 %v3013_v48, %v5511_v34 }
 0xe4d   :  { %v3017_v3 = vadd.f32 1e-05, %v3015_v22  ;;  %v4391_v22 = vld [vmem:[%s6241_s3 + $0x78] sm:$0xff] }
 0xe4e   :  { %3115 = vst.msk [vmem:[#allocation2 + $0x70] sm:$0xff] %vm106_vm1, %v4391_v22 }
 0xe4f   :  { %4584 = vrsqrt.f32 %v3017_v3  ;;  %vm3034_vm7 = vweird.f32 %v3017_v3 }
 0xe52   :  { %v3189_v15 = vpop.permute.xlu2 %3188 }
 0xe55   :  { %v4585_v41 = vpop.eup %4584 }
 0xe56   :  { %v3029_v29 = vmul.f32 %v4585_v41, %v3017_v3  ;;  %vm3035_vm6 = vweird.f32 %v4585_v41 }
 0xe57   :  { %vm3036_vm8 = vmor %vm3034_vm7, %vm3035_vm6  ;;  %vm4152_vm6 = vcmask 326656  }
 0xe58   :  { %v3030_v0 = vmul.f32 %v4585_v41, %v3029_v29 }
 0xe5a   :  { %v3031_v63 = vmul.f32 0.5, %v3030_v0 }
 0xe5c   :  { %v3032_v35 = vsub.f32 1.5, %v3031_v63 }
 0xe5e   :  { %v3033_v12 = vmul.f32 %v4585_v41, %v3032_v35 }
 0xe60   :  { %v3037_v28 = vsel %vm3036_vm8, %v4585_v41, %v3033_v12 }
 0xe61   :  { %v3039_v13 = vmul.f32 %v3037_v28, %v3005_v9 }
 0xe63   :  { %v3042_v27 = vmul.f32 %v4529_v5, %v3039_v13 }
 0xe65   :  { %v3045_v7 = vadd.f32 %v4530_v62, %v3042_v27 }
 0xe67   :  { %4383 = vmatmul.msk.f32.gmra.mxu2 %vm106_vm1, %v3045_v7 }
 0xe68   :  { %v3095_v33 = vpop.permute.xlu0 %3094 }
 0xe69   :  { %3109 = vst.msk [vmem:[#allocation2 + $0x48] sm:$0xff] %vm106_vm1, %v3095_v33  ;;  %4392 = vmatpush.xpose.msk.msrb.mxu3 %vm2045_vm9, %v3095_v33  ;;  %3190 = vrot.lane.b32.xlu1 %v3095_v33, %s4670_s9 }
 0xe6d   :  { %4393 = vmatpush.xpose.msk.msrb.mxu3 %vm2045_vm9, %v4385_v46 }
 0xe70   :  { %v3187_v16 = vpop.permute.xlu0 %3186 }
 0xe71   :  { %4394 = vmatpush.xpose.msk.msrb.mxu3 %vm2045_vm9, %v5909_v23  ;;  %3154 = vrot.lane.b32.xlu1 %v3095_v33, %s4669_s29 }
 0xe74   :  { %4395 = vmatmul.msk.f32.vlgmr.msrb.gmra.mxu3 %vm2045_vm9, %v5913_v21 }
 0xe78   :  { %v3185_v55 = vpop.permute.xlu0 %3184 }
 0xe79   :  { %3148 = vrot.lane.b32.xlu1 %v5913_v21, %s4669_s29 }
 0xe80   :  { %v3153_v43 = vpop.permute.xlu0 %3152 }
 0xe81   :  { %3289 = vrot.lane.b32.xlu1 %v4386_v39, %s4669_s29 }
 0xe89   :  { %3097 = vrot.lane.b32.xlu1 %v3076_v50, %s4673_s17 }
 0xe91   :  { %3224 = vrot.lane.b32.xlu1 %v4385_v46, %s4672_s13 }
 0xedb   :  { %v3191_v36 = vpop.permute.xlu1 %3190 }
 0xedc   :  { %4400 = vmatpush.xpose.msk.msrb.mxu2 %vm2045_vm9, %v3191_v36  ;;  %v4638_v36 = vld [vmem:[%s6240_s2 + $0x28] sm:$0xff] }
 0xee0   :  { %4401 = vmatpush.xpose.msk.msrb.mxu2 %vm2045_vm9, %v3189_v15 }
 0xee3   :  { %v3155_v42 = vpop.permute.xlu1 %3154 }
 0xee4   :  { %4396 = vmatpush.xpose.msk.msrb.mxu0 %vm2045_vm9, %v3155_v42  ;;  %4402 = vmatpush.xpose.msk.msrb.mxu2 %vm2045_vm9, %v3187_v16 }
 0xee7   :  { %4403 = vmatmul.msk.f32.vlgmr.msrb.gmra.mxu2 %vm2045_vm9, %v3185_v55 }
 0xee8   :  { %4397 = vmatpush.xpose.msk.msrb.mxu0 %vm2045_vm9, %v3153_v43  ;;  %v4639_v43 = vld [vmem:[%s6240_s2] sm:$0xff] }
 0xeea   :  { %v3078_v56 = vpop.f32.mrf.mxu2 }
 0xeeb   :  { %v3079_v2 = vadd.f32 %v4531_v32, %v3078_v56  ;;  %v3149_v44 = vpop.permute.xlu1 %3148 }
 0xeed   :  { %3101 = vrot.lane.b32.xlu2 %v3079_v2, %s4671_s12  ;;  %v3082_v53 = vmul.f32 0.35355338, %v3079_v2  ;;  %s4677_s12 = smov 8  }
 0xef3   :  { %v3290_v26 = vpop.permute.xlu1 %3289 }
 0xef5   :  { %3150 = vrot.lane.b32.xlu2 %v5909_v23, %s4669_s29 }
 0xefb   :  { %v3098_v51 = vpop.permute.xlu1 %3097 }
 0xefc   :  { %3114 = vst.msk [vmem:[#allocation2 + $0x68] sm:$0xff] %vm106_vm1, %v3098_v51  ;;  %v5989_v37 = vpack.i.bf16 %v4389_v1, %v3098_v51 }
 0xefd   :  { %3291 = vrot.lane.b32.xlu2 %v4387_v14, %s4669_s29 }
 0xf03   :  { %v3225_v61 = vpop.permute.xlu1 %3224 }
 0xf47   :  { %v3102_v52 = vpop.permute.xlu2 %3101 }
 0xf48   :  { %3111 = vst.msk [vmem:[#allocation2 + $0x58] sm:$0xff] %vm106_vm1, %v3102_v52  ;;  %4408 = vmatpush.xpose.msk.msrb.mxu1 %vm2045_vm9, %v3102_v52  ;;  %3365 = vrot.lane.b32.xlu1 %v3102_v52, %s4672_s13 }
 0xf49   :  { %3293 = vrot.lane.b32.xlu0 %v3102_v52, %s4669_s29 }
 0xf4c   :  { %4409 = vmatpush.xpose.msk.msrb.mxu1 %vm2045_vm9, %v4387_v14 }
 0xf4f   :  { %v3151_v54 = vpop.permute.xlu2 %3150 }
 0xf50   :  { %4410 = vmatpush.xpose.msk.msrb.mxu1 %vm2045_vm9, %v4386_v39  ;;  %4398 = vmatpush.xpose.msk.msrb.mxu0 %vm2045_vm9, %v3151_v54 }
 0xf51   :  { %3287 = vrot.lane.b32.xlu0 %v3082_v53, %s4669_s29  ;;  %3363 = vrot.lane.b32.xlu1 %v4387_v14, %s4672_s13 }
 0xf53   :  { %4399 = vmatmul.msk.f32.vlgmr.msrb.gmra.mxu0 %vm2045_vm9, %v3149_v44  ;;  %4411 = vmatmul.msk.f32.vlgmr.msrb.gmra.mxu1 %vm2045_vm9, %v3082_v53 }
 0xf54   :  { %3507 = vmatpush.msra.mxu1 %v3098_v51  ;;  %v3145_v51 = vpop.f32.mrf.mxu3 }
 0xf56   :  { %3508 = vmatpush.msra.mxu1 %v4389_v1 }
 0xf57   :  { %v3292_v18 = vpop.permute.xlu2 %3291 }
 0xf58   :  { %3509 = vmatpush.msra.mxu1 %v5976_v20 }
 0xf59   :  { %3226 = vrot.lane.b32.xlu0 %v3095_v33, %s4672_s13 }
 0xf61   :  { %3222 = vrot.lane.b32.xlu0 %v5909_v23, %s4672_s13 }
 0xf69   :  { %3220 = vrot.lane.b32.xlu0 %v5913_v21, %s4672_s13 }
 0xf6a   :  { %v3217_v57 = vpop.f32.mrf.mxu2 }
 0xf6b   :  { %v3397_v60 = vadd.f32 %v3217_v57, %v5637_v17 }
 0xf6d   :  { %v3409_v24 = vsel %vm2332_vm10, %v3397_v60, -inf }
 0xf6e   :  { %3410 = vmax.xlane.f32.xlu2 %v3409_v24 }
 0xf71   :  { %3361 = vrot.lane.b32.xlu0 %v4386_v39, %s4672_s13 }
 0xf79   :  { %3359 = vrot.lane.b32.xlu0 %v3082_v53, %s4672_s13 }
 0xf81   :  { %3596 = vrot.lane.b32.xlu0 %v5976_v20, %s4670_s9 }
 0xf86   :  { %4489 = vrot.lane.b32.xlu2 %v5989_v37, %s4670_s9 }
 0xf89   :  { %3329 = vrot.lane.b32.xlu0 %v3102_v52, %s4670_s9  ;;  %v3395_v52 = vadd.f32 %v4639_v43, %v3145_v51  ;;  %v3549_v51 = vld [vmem:[%s6242_s4 + $0x258] sm:$0xff] }
 0xf8a   :  { %3568 = vmatpush.msrb.mxu1 %v3549_v51 }
 0xf8e   :  { %3325 = vrot.lane.b32.xlu2 %v4386_v39, %s4670_s9 }
 0xf91   :  { %3327 = vrot.lane.b32.xlu0 %v4387_v14, %s4670_s9 }
 0xf99   :  { %3323 = vrot.lane.b32.xlu0 %v3082_v53, %s4670_s9  ;;  %v3403_v53 = vsel %vm2332_vm10, %v3395_v52, -inf }
 0xfa1   :  { %3104 = vrot.lane.b32.xlu0 %v3079_v2, %s4673_s17 }
 0xfa9   :  { %4494 = vrot.lane.b32.xlu0 %v5989_v37, %s4669_s29 }
 0xfba   :  { %v3366_v19 = vpop.permute.xlu1 %3365 }
 0xfbb   :  { %v3294_v17 = vpop.permute.xlu0 %3293 }
 0xfbc   :  { %4412 = vmatpush.xpose.msk.msra.mxu0 %vm2045_vm9, %v3294_v17 }
 0xfc0   :  { %4413 = vmatpush.xpose.msk.msra.mxu0 %vm2045_vm9, %v3292_v18 }
 0xfc3   :  { %v3288_v8 = vpop.permute.xlu0 %3287  ;;  %v3364_v49 = vpop.permute.xlu1 %3363 }
 0xfc4   :  { %4414 = vmatpush.xpose.msk.msra.mxu0 %vm2045_vm9, %v3290_v26 }
 0xfc7   :  { %4415 = vmatmul.msk.f32.vlgmr.msra.gmra.mxu0 %vm2045_vm9, %v3288_v8  ;;  %v4640_v8 = vld [vmem:[%s6240_s2 + $0x18] sm:$0xff] }
 0xfcb   :  { %v3227_v25 = vpop.permute.xlu0 %3226 }
 0xfcc   :  { %4404 = vmatpush.xpose.msk.msra.mxu3 %vm2045_vm9, %v3227_v25 }
 0xfd0   :  { %4405 = vmatpush.xpose.msk.msra.mxu3 %vm2045_vm9, %v3225_v61  ;;  %v3181_v5 = vpop.f32.mrf.mxu0  ;;  %v3284_v27 = vpop.f32.mrf.mxu1 }
 0xfd1   :  { %v3396_v62 = vadd.f32 %v4637_v4, %v3181_v5  ;;  %v6031_v7 = vadd.f32 %v3284_v27, %v5753_v47  ;;  %v6042_v47 = vld [vmem:[%s6241_s3 + $0x70] sm:$0xff] }
 0xfd3   :  { %v3223_v6 = vpop.permute.xlu0 %3222  ;;  %v3406_v10 = vsel %vm2332_vm10, %v3396_v62, -inf  ;;  %v3415_v33 = vsel %vm2332_vm10, %v6031_v7, -inf }
 0xfd4   :  { %4406 = vmatpush.xpose.msk.msra.mxu3 %vm2045_vm9, %v3223_v6  ;;  %3407 = vmax.xlane.f32.xlu2 %v3406_v10  ;;  %v4641_v10 = vld [vmem:[%s6240_s2 + $0x38] sm:$0xff] }
 0xfd8   :  { %4420 = vmatpush.xpose.msk.msrb.mxu3 %vm2045_vm9, %v3366_v19 }
 0xfdb   :  { %v3221_v38 = vpop.permute.xlu0 %3220 }
 0xfdc   :  { %4421 = vmatpush.xpose.msk.msrb.mxu3 %vm2045_vm9, %v3364_v49 }
 0xfdd   :  { %4407 = vmatmul.msk.f32.vlgmr.msra.gmra.mxu3 %vm2045_vm9, %v3221_v38 }
 0xfe1   :  { %v3411_v31 = vpop.xlane.xlu2 %3410 }
 0xfe2   :  { %v3429_v9 = vsub.f32 %v3397_v60, %v3411_v31 }
 0xfe3   :  { %v3362_v11 = vpop.permute.xlu0 %3361 }
 0xfe4   :  { %v3439_v30 = vmul.f32 1.442695, %v3429_v9  ;;  %4422 = vmatpush.xpose.msk.msrb.mxu3 %vm2045_vm9, %v3362_v11 }
 0xfe6   :  { %4586 = vpow2.f32 %v3439_v30 }
 0xfe9   :  { %v4490_v32 = vpop.permute.xlu2 %4489 }
 0xfea   :  { %v4491_v40 = vunpack.i.l.bf16 %v4490_v32  ;;  %v4492_v21 = vunpack.i.h.bf16 %v4490_v32 }
 0xfeb   :  { %v3360_v50 = vpop.permute.xlu0 %3359 }
 0xfec   :  { %v4587_v23 = vpop.eup %4586  ;;  %4423 = vmatmul.msk.f32.vlgmr.msrb.gmra.mxu3 %vm2045_vm9, %v3360_v50 }
 0xfed   :  { %3621 = vmatpush.msra.mxu3 %v4491_v40  ;;  %v3457_v46 = vsel %vm2332_vm10, %v4587_v23, 0.0 }
 0xfee   :  { %3458 = vadd.xlane.f32.xlu1 %v3457_v46 }
 0xfef   :  { %3622 = vmatpush.msra.mxu3 %v4492_v21 }
 0xff1   :  { %v3326_v29 = vpop.permute.xlu2 %3325 }
 0xff3   :  { %v3597_v48 = vpop.permute.xlu0 %3596 }
 0xff4   :  { %3623 = vmatpush.msra.mxu3 %v3597_v48 }
 0xffb   :  { %v3330_v3 = vpop.permute.xlu0 %3329 }
 0xffc   :  { %4416 = vmatpush.xpose.msk.msra.mxu2 %vm2045_vm9, %v3330_v3 }
0x1003   :  { %v3328_v41 = vpop.permute.xlu0 %3327 }
0x1004   :  { %4417 = vmatpush.xpose.msk.msra.mxu2 %vm2045_vm9, %v3328_v41 }
0x1008   :  { %4418 = vmatpush.xpose.msk.msra.mxu2 %vm2045_vm9, %v3326_v29 }
0x100b   :  { %v3324_v0 = vpop.permute.xlu0 %3323 }
0x100c   :  { %4419 = vmatmul.msk.f32.vlgmr.msra.gmra.mxu2 %vm2045_vm9, %v3324_v0 }
0x1013   :  { %v3105_v63 = vpop.permute.xlu0 %3104 }
0x1014   :  { %3116 = vst.msk [vmem:[#allocation2 + $0x78] sm:$0xff] %vm106_vm1, %v3105_v63  ;;  %3726 = vmatpush.msrb.mxu3 %v3105_v63  ;;  %v6026_v35 = vpack.i.bf16 %v4391_v22, %v3105_v63 }
0x1016   :  { %4499 = vrot.lane.b32.xlu2 %v6026_v35, %s4669_s29  ;;  %3727 = vmatpush.msrb.mxu3 %v4391_v22 }
0x1018   :  { %3728 = vmatpush.msrb.mxu3 %v6042_v47 }
0x101b   :  { %v4495_v12 = vpop.permute.xlu0 %4494 }
0x101c   :  { %v4496_v28 = vunpack.i.l.bf16 %v4495_v12  ;;  %v4497_v13 = vunpack.i.h.bf16 %v4495_v12 }
0x101e   :  { %3542 = vmatpush.msrb.mxu0 %v4496_v28 }
0x1020   :  { %3543 = vmatpush.msrb.mxu0 %v4497_v13 }
0x103f   :  { %3416 = vmax.xlane.f32.xlu2 %v3415_v33 }
0x1044   :  { %v3320_v39 = vpop.f32.mrf.mxu0 }
0x1045   :  { %v3400_v16 = vadd.f32 %v4638_v36, %v3320_v39 }
0x1047   :  { %v3418_v14 = vsel %vm2332_vm10, %v3400_v16, -inf  ;;  %v3408_v15 = vpop.xlane.xlu2 %3407 }
0x1048   :  { %3419 = vmax.xlane.f32.xlu1 %v3418_v14  ;;  %v3428_v1 = vsub.f32 %v3396_v62, %v3408_v15 }
0x104a   :  { %v3437_v42 = vmul.f32 1.442695, %v3428_v1 }
0x104c   :  { %4588 = vpow2.f32 %v3437_v42 }
0x1052   :  { %v4589_v55 = vpop.eup %4588 }
0x1053   :  { %v3454_v56 = vsel %vm2332_vm10, %v4589_v55, 0.0 }
0x1054   :  { %3455 = vadd.xlane.f32.xlu1 %v3454_v56 }
0x1060   :  { %v3253_v18 = vpop.f32.mrf.mxu3 }
0x1061   :  { %v3459_v2 = vpop.xlane.xlu1 %3458  ;;  %v3398_v61 = vadd.f32 %v4640_v8, %v3253_v18 }
0x1062   :  { %4590 = vrcp.f32 %v3459_v2 }
0x1063   :  { %v3412_v25 = vsel %vm2332_vm10, %v3398_v61, -inf }
0x1068   :  { %v4591_v44 = vpop.eup %4590 }
0x1069   :  { %v3485_v26 = vmul.f32 %v4591_v44, %v4587_v23 }
0x106b   :  { %4428 = vmatmul.msk.f32.vlgmr.msra.gmra.mxu3 %vm2332_vm10, %v3485_v26 }
0x106d   :  { %3517 = vrot.lane.b32.xlu1 %v5976_v20, %s4669_s29 }
0x106f   :  { %v3392_v6 = vpop.f32.mrf.mxu3 }
0x1070   :  { %v3402_v49 = vadd.f32 %v4641_v10, %v3392_v6  ;;  %v4500_v31 = vpop.permute.xlu2 %4499 }
0x1071   :  { %v4501_v32 = vunpack.i.l.bf16 %v4500_v31  ;;  %v4502_v40 = vunpack.i.h.bf16 %v4500_v31 }
0x1072   :  { %v3424_v11 = vsel %vm2332_vm10, %v3402_v49, -inf }
0x1075   :  { %3735 = vrot.lane.b32.xlu1 %v6042_v47, %s4669_s29 }
0x108f   :  { %v3356_v19 = vpop.f32.mrf.mxu2 }
0x1090   :  { %v3401_v5 = vadd.f32 %v3356_v19, %v5737_v58  ;;  %v3628_v58 = vld [vmem:[%s6242_s4 + $0x260] sm:$0xff] }
0x1092   :  { %v3421_v62 = vsel %vm2332_vm10, %v3401_v5, -inf }
0x109f   :  { %3404 = vmax.xlane.f32.xlu1 %v3403_v53 }
0x10b2   :  { %v3417_v21 = vpop.xlane.xlu2 %3416 }
0x10b3   :  { %v3431_v22 = vsub.f32 %v6031_v7, %v3417_v21 }
0x10b5   :  { %v3443_v41 = vmul.f32 1.442695, %v3431_v22 }
0x10bb   :  { %v3420_v54 = vpop.xlane.xlu1 %3419 }
0x10bc   :  { %v3432_v57 = vsub.f32 %v3400_v16, %v3420_v54 }
0x10be   :  { %v3445_v60 = vmul.f32 1.442695, %v3432_v57 }
0x10c0   :  { %4592 = vpow2.f32 %v3445_v60 }
0x10c6   :  { %v4593_v24 = vpop.eup %4592 }
0x10c7   :  { %v3466_v17 = vsel %vm2332_vm10, %v4593_v24, 0.0  ;;  %v3456_v4 = vpop.xlane.xlu1 %3455 }
0x10c8   :  { %3467 = vadd.xlane.f32.xlu0 %v3466_v17  ;;  %4594 = vrcp.f32 %v3456_v4 }
0x10ce   :  { %v4595_v38 = vpop.eup %4594 }
0x10cf   :  { %v3484_v9 = vmul.f32 %v4595_v38, %v4589_v55 }
0x10d0   :  { %3413 = vmax.xlane.f32.xlu0 %v3412_v25 }
0x10d8   :  { %3422 = vmax.xlane.f32.xlu0 %v3421_v62 }
0x10df   :  { %v3518_v30 = vpop.permute.xlu1 %3517 }
0x10e0   :  { %3425 = vmax.xlane.f32.xlu0 %v3424_v11  ;;  %3544 = vmatpush.msrb.mxu0 %v3518_v30 }
0x10e1   :  { %4425 = vmatmul.msk.f32.vlgmr.msrb.gmra.mxu0 %vm2332_vm10, %v3484_v9 }
0x10e2   :  { %3647 = vmatpush.msra.mxu0 %v3628_v58 }
0x10e4   :  { %3760 = vmatpush.msrb.mxu0 %v4501_v32 }
0x10e6   :  { %3761 = vmatpush.msrb.mxu0 %v4502_v40 }
0x10e7   :  { %v3736_v50 = vpop.permute.xlu1 %3735 }
0x10e8   :  { %3762 = vmatpush.msrb.mxu0 %v3736_v50  ;;  %v3514_v50 = vld [vmem:[%s6242_s4 + $0x250] sm:$0xff] }
0x10e9   :  { %3591 = vmatpush.msrb.mxu2 %v3514_v50 }
0x10ee   :  { %v3625_v23 = vpop.f32.mrf.mxu3 }
0x10ef   :  { %4429 = vmatmul.msk.f32.vlgmr.msra.gmra.mxu0 %vm2045_vm9, %v3625_v23  ;;  %v3685_v23 = vld [vmem:[%s6242_s4 + $0x268] sm:$0xff] }
0x10f0   :  { %3863 = vmatpush.msra.mxu0 %v3628_v58  ;;  %3704 = vmatpush.msra.mxu2 %v3685_v23 }
0x1112   :  { %v3405_v46 = vpop.xlane.xlu1 %3404 }
0x1113   :  { %v3427_v48 = vsub.f32 %v3395_v52, %v3405_v46 }
0x1115   :  { %v3435_v3 = vmul.f32 1.442695, %v3427_v48 }
0x1117   :  { %4596 = vpow2.f32 %v3435_v3 }
0x1118   :  { %4598 = vpow2.f32 %v3443_v41 }
0x111d   :  { %v4597_v29 = vpop.eup %4596 }
0x111e   :  { %v3451_v0 = vsel %vm2332_vm10, %v4597_v29, 0.0  ;;  %v4599_v63 = vpop.eup %4598 }
0x111f   :  { %3452 = vadd.xlane.f32.xlu0 %v3451_v0  ;;  %v3463_v12 = vsel %vm2332_vm10, %v4599_v63, 0.0 }
0x1127   :  { %3464 = vadd.xlane.f32.xlu0 %v3463_v12 }
0x113b   :  { %v3468_v28 = vpop.xlane.xlu0 %3467  ;;  %3653 = vrot.lane.b32.xlu0 %v5976_v20, %s4672_s13 }
0x113c   :  { %4600 = vrcp.f32 %v3468_v28 }
0x1142   :  { %v4601_v13 = vpop.eup %4600 }
0x1143   :  { %v3488_v27 = vmul.f32 %v4601_v13, %v4593_v24  ;;  %v3414_v7 = vpop.xlane.xlu0 %3413  ;;  %4514 = vrot.lane.b32.xlu0 %v6026_v35, %s4672_s13 }
0x1144   :  { %v3430_v33 = vsub.f32 %v3398_v61, %v3414_v7 }
0x1145   :  { %4433 = vmatmul.msk.f32.vlgmr.msrb.gmra.mxu0 %vm2332_vm10, %v3488_v27  ;;  %v4532_v27 = vld [vmem:[%s6243_s5 + $0x11] ss:$0 sm:$0xff] }
0x1146   :  { %v3441_v39 = vmul.f32 1.442695, %v3430_v33 }
0x1148   :  { %4602 = vpow2.f32 %v3441_v39 }
0x114b   :  { %v3423_v36 = vpop.xlane.xlu0 %3422  ;;  %3869 = vrot.lane.b32.xlu0 %v6042_v47, %s4672_s13 }
0x114c   :  { %v3433_v16 = vsub.f32 %v3401_v5, %v3423_v36 }
0x114e   :  { %v4603_v14 = vpop.eup %4602  ;;  %v3447_v15 = vmul.f32 1.442695, %v3433_v16 }
0x114f   :  { %v3460_v20 = vsel %vm2332_vm10, %v4603_v14, 0.0 }
0x1150   :  { %4604 = vpow2.f32 %v3447_v15  ;;  %3461 = vadd.xlane.f32.xlu1 %v3460_v20 }
0x1153   :  { %v3426_v1 = vpop.xlane.xlu0 %3425 }
0x1154   :  { %v3434_v42 = vsub.f32 %v3402_v49, %v3426_v1 }
0x1156   :  { %v4605_v55 = vpop.eup %4604  ;;  %v3449_v56 = vmul.f32 1.442695, %v3434_v42 }
0x1157   :  { %v3469_v2 = vsel %vm2332_vm10, %v4605_v55, 0.0 }
0x1158   :  { %4606 = vpow2.f32 %v3449_v56  ;;  %3470 = vadd.xlane.f32.xlu2 %v3469_v2 }
0x115e   :  { %v4607_v44 = vpop.eup %4606  ;;  %v3546_v60 = vpop.f32.mrf.mxu0 }
0x115f   :  { %v3472_v26 = vsel %vm2332_vm10, %v4607_v44, 0.0 }
0x1160   :  { %3473 = vadd.xlane.f32.xlu2 %v3472_v26 }
0x1169   :  { %4504 = vrot.lane.b32.xlu1 %v5989_v37, %s4672_s13  ;;  %s4675_s13 = smov [#allocation2]  }
0x116a   :  { %s4194_s23 = sshll.u32 %s4675_s13, 4  ;;  %s4195_s23 = int_to_ptr.vmem [resolvable:$true] %s4194_s23 }
0x116b   :  { %4202 = dma.vmem_to_hbm [thread:$0]  %s4195_s23, 2048, %s4197_s26, [#allocation3], %s4676_s0, %s4676_s0, %s4677_s12  }
0x116c   :  { %v3649_v49 = vpop.f32.mrf.mxu0 }
0x1171   :  { %3813 = vrot.lane.b32.xlu1 %v6042_v47, %s4670_s9 }
0x1178   :  { %4509 = vrot.lane.b32.xlu2 %v6026_v35, %s4670_s9 }
0x1192   :  { %v3453_v43 = vpop.xlane.xlu0 %3452 }
0x1193   :  { %4608 = vrcp.f32 %v3453_v43 }
0x1199   :  { %v4609_v52 = vpop.eup %4608 }
0x119a   :  { %v3483_v53 = vmul.f32 %v4609_v52, %v4597_v29  ;;  %v3465_v54 = vpop.xlane.xlu0 %3464 }
0x119b   :  { %4610 = vrcp.f32 %v3465_v54 }
0x119c   :  { %4424 = vmatmul.msk.f32.vlgmr.msra.gmra.mxu1 %vm2332_vm10, %v3483_v53 }
0x11a1   :  { %v4611_v37 = vpop.eup %4610 }
0x11a2   :  { %v3487_v57 = vmul.f32 %v4611_v37, %v4599_v63  ;;  %v3986_v37 = vld [vmem:[%s6242_s4 + $0x288] sm:$0xff] }
0x11a4   :  { %4426 = vmatmul.msk.f32.vlgmr.msrb.gmra.mxu1 %vm2045_vm9, %v3546_v60  ;;  %4432 = vmatmul.msk.f32.vlgmr.msrb.gmra.mxu3 %vm2332_vm10, %v3487_v57  ;;  %v3985_v57 = vld [vmem:[%s6242_s4 + $0x280] sm:$0xff]  ;;  %v3984_v60 = vld [vmem:[%s6242_s4 + $0x278] sm:$0xff] }
0x11ad   :  { %v3654_v17 = vpop.permute.xlu0 %3653 }
0x11b5   :  { %v4515_v5 = vpop.permute.xlu0 %4514 }
0x11b6   :  { %v4516_v38 = vunpack.i.l.bf16 %v4515_v5  ;;  %v4517_v11 = vunpack.i.h.bf16 %v4515_v5  ;;  %v4025_v5 = vld [vmem:[%s6242_s4 + $0x2b8] sm:$0xff] }
0x11bd   :  { %v3870_v30 = vpop.permute.xlu0 %3869 }
0x11c2   :  { %v3764_v58 = vpop.f32.mrf.mxu0 }
0x11c3   :  { %v3462_v47 = vpop.xlane.xlu1 %3461 }
0x11c4   :  { %4612 = vrcp.f32 %v3462_v47 }
0x11ca   :  { %v4613_v19 = vpop.eup %4612 }
0x11cb   :  { %v3471_v35 = vpop.xlane.xlu2 %3470  ;;  %v3486_v10 = vmul.f32 %v4613_v19, %v4603_v14 }
0x11cc   :  { %4614 = vrcp.f32 %v3471_v35  ;;  %v3983_v35 = vld [vmem:[%s6242_s4 + $0x270] sm:$0xff] }
0x11d2   :  { %v4615_v6 = vpop.eup %4614 }
0x11d3   :  { %v3474_v24 = vpop.xlane.xlu2 %3473  ;;  %v3489_v31 = vmul.f32 %v4615_v6, %v4605_v55 }
0x11d4   :  { %4616 = vrcp.f32 %v3474_v24 }
0x11da   :  { %v4617_v32 = vpop.eup %4616 }
0x11db   :  { %v4505_v18 = vpop.permute.xlu1 %4504  ;;  %v4510_v8 = vpop.permute.xlu2 %4509  ;;  %v3490_v40 = vmul.f32 %v4617_v32, %v4607_v44 }
0x11dc   :  { %v4506_v61 = vunpack.i.l.bf16 %v4505_v18  ;;  %v4511_v25 = vunpack.i.l.bf16 %v4510_v8  ;;  %v4507_v4 = vunpack.i.h.bf16 %v4505_v18  ;;  %v4512_v62 = vunpack.i.h.bf16 %v4510_v8 }
0x11de   :  { %3678 = vmatpush.msra.mxu1 %v4506_v61  ;;  %3838 = vmatpush.msra.mxu3 %v4511_v25  ;;  %v4027_v61 = vld [vmem:[%s6242_s4 + $0x2c8] sm:$0xff]  ;;  %v4026_v25 = vld [vmem:[%s6242_s4 + $0x2c0] sm:$0xff] }
0x11df   :  { %4042 = vmatpush.msrb.mxu0 %v4027_v61 }
0x11e0   :  { %3679 = vmatpush.msra.mxu1 %v4507_v4  ;;  %3839 = vmatpush.msra.mxu3 %v4512_v62 }
0x11e1   :  { %4043 = vmatpush.msrb.mxu0 %v4026_v25 }
0x11e2   :  { %3680 = vmatpush.msra.mxu1 %v3654_v17 }
0x11e3   :  { %v3814_v9 = vpop.permute.xlu1 %3813  ;;  %4430 = vmatmul.msk.f32.vlgmr.msra.gmra.mxu1 %vm2332_vm10, %v3486_v10  ;;  %v4024_v10 = vld [vmem:[%s6242_s4 + $0x2b0] sm:$0xff]  ;;  %4044 = vmatpush.msrb.mxu0 %v4025_v5 }
0x11e4   :  { %3785 = vmatpush.msrb.mxu1 %v3549_v51  ;;  %3840 = vmatpush.msra.mxu3 %v3814_v9 }
0x11e5   :  { %4436 = vmatmul.msk.f32.vlgmr.msra.gmra.mxu3 %vm2332_vm10, %v3489_v31  ;;  %v4023_v31 = vld [vmem:[%s6242_s4 + $0x2a8] sm:$0xff]  ;;  %4045 = vmatpush.msrb.mxu0 %v4024_v10 }
0x11e6   :  { %3894 = vmatpush.msra.mxu1 %v4516_v38  ;;  %4007 = vmatpush.msrb.mxu3 %v3986_v37 }
0x11e7   :  { %4046 = vmatpush.msrb.mxu0 %v4023_v31  ;;  %v4537_v31 = vld [vmem:[%s6243_s5 + $0x3] ss:$0 sm:$0xff] }
0x11e8   :  { %3895 = vmatpush.msra.mxu1 %v4517_v11  ;;  %4008 = vmatpush.msrb.mxu3 %v3985_v57  ;;  %v4533_v11 = vld [vmem:[%s6243_s5 + $0x12] ss:$0 sm:$0xff] }
0x11ea   :  { %3896 = vmatpush.msra.mxu1 %v3870_v30  ;;  %4009 = vmatpush.msrb.mxu3 %v3984_v60 }
0x11eb   :  { %4434 = vmatmul.msk.f32.vlgmr.msrb.gmra.mxu1 %vm2045_vm9, %v3764_v58  ;;  %v4534_v58 = vld [vmem:[%s6243_s5 + $0x13] ss:$0 sm:$0xff] }
0x11ec   :  { %4010 = vmatpush.msrb.mxu3 %v3983_v35 }
0x11f3   :  { %4438 = vmatmul.msk.f32.vlgmr.msra.gmra.mxu1 %vm2332_vm10, %v3490_v40 }
0x1219   :  { %v3511_v21 = vpop.f32.mrf.mxu1 }
0x121a   :  { %4427 = vmatmul.msk.f32.vlgmr.msrb.gmra.mxu2 %vm2045_vm9, %v3511_v21 }
0x121b   :  { %3808 = vmatpush.msrb.mxu2 %v3514_v50 }
0x1221   :  { %v3570_v46 = vpop.f32.mrf.mxu1 }
0x1227   :  { %v3730_v48 = vpop.f32.mrf.mxu3 }
0x1260   :  { %v3682_v22 = vpop.f32.mrf.mxu1 }
0x1261   :  { %4431 = vmatmul.msk.f32.vlgmr.msra.gmra.mxu2 %vm2045_vm9, %v3682_v22 }
0x1262   :  { %3919 = vmatpush.msra.mxu2 %v3685_v23 }
0x1268   :  { %v3787_v3 = vpop.f32.mrf.mxu1  ;;  %v3842_v41 = vpop.f32.mrf.mxu3 }
0x1269   :  { %4435 = vmatmul.msk.f32.vlgmr.msrb.gmra.mxu2 %vm2045_vm9, %v3730_v48  ;;  %4437 = vmatmul.msk.f32.vlgmr.msra.gmra.mxu0 %vm2045_vm9, %v3842_v41 }
0x1270   :  { %v3898_v29 = vpop.f32.mrf.mxu1 }
0x1271   :  { %4439 = vmatmul.msk.f32.vlgmr.msra.gmra.mxu2 %vm2045_vm9, %v3898_v29 }
0x129d   :  { %v3593_v0 = vpop.f32.mrf.mxu2 }
0x129e   :  { %v3594_v63 = vadd.f32 %v3593_v0, %v3570_v46 }
0x12a0   :  { %v3652_v12 = vadd.f32 %v3649_v49, %v3594_v63 }
0x12e4   :  { %v3706_v28 = vpop.f32.mrf.mxu2 }
0x12e5   :  { %v3709_v13 = vadd.f32 %v3706_v28, %v3652_v12  ;;  %v4022_v12 = vld [vmem:[%s6242_s4 + $0x2a0] sm:$0xff]  ;;  %v4021_v28 = vld [vmem:[%s6242_s4 + $0x298] sm:$0xff] }
0x12e6   :  { %v3865_v14 = vpop.f32.mrf.mxu0  ;;  %4047 = vmatpush.msrb.mxu0 %v4022_v12 }
0x12e7   :  { %v3925_v7 = vadd.f32 %v3709_v13, %v5866_v45  ;;  %v4020_v13 = vld [vmem:[%s6242_s4 + $0x290] sm:$0xff] }
0x12e8   :  { %4048 = vmatpush.msrb.mxu0 %v4021_v28 }
0x12e9   :  { %v6115_v33 = vadd.f32 %v4532_v27, %v3925_v7 }
0x12ea   :  { %4049 = vmatpush.msrb.mxu0 %v4020_v13 }
0x12eb   :  { %v3933_v39 = vsel %vm106_vm1, %v6115_v33, 0.0 }
0x12ec   :  { %v3810_v36 = vpop.f32.mrf.mxu2  ;;  %3934 = vadd.xlane.f32.xlu1 %v3933_v39 }
0x12ed   :  { %v3811_v16 = vadd.f32 %v3810_v36, %v3787_v3 }
0x12ef   :  { %v3868_v15 = vadd.f32 %v3865_v14, %v3811_v16 }
0x12f4   :  { %v3921_v20 = vpop.f32.mrf.mxu2 }
0x12f5   :  { %v3924_v1 = vadd.f32 %v3921_v20, %v3868_v15  ;;  %v4536_v20 = vld [vmem:[%s6243_s5 + $0x15] ss:$0 sm:$0xff] }
0x12f7   :  { %v3926_v42 = vadd.f32 %v3924_v1, %v5888_v59 }
0x12f9   :  { %v6120_v55 = vadd.f32 %v4532_v27, %v3926_v42  ;;  %v4535_v27 = vld [vmem:[%s6243_s5 + $0x14] ss:$0 sm:$0xff] }
0x12fb   :  { %v3936_v56 = vsel %vm106_vm1, %v6120_v55, 0.0 }
0x12fc   :  { %3937 = vadd.xlane.f32.xlu0 %v3936_v56 }
0x135f   :  { %v3935_v45 = vpop.xlane.xlu1 %3934 }
0x1360   :  { %v3939_v2 = vmul.f32 %v3935_v45, %v5511_v34 }
0x1362   :  { %v3941_v44 = vsub.f32 %v6115_v33, %v3939_v2 }
0x1364   :  { %v3943_v26 = vmul.f32 %v3941_v44, %v3941_v44 }
0x1366   :  { %v3945_v51 = vsel %vm106_vm1, %v3943_v26, 0.0 }
0x1367   :  { %3946 = vadd.xlane.f32.xlu2 %v3945_v51 }
0x136f   :  { %v3938_v43 = vpop.xlane.xlu0 %3937 }
0x1370   :  { %v3940_v52 = vmul.f32 %v3938_v43, %v5511_v34 }
0x1372   :  { %v3942_v59 = vsub.f32 %v6120_v55, %v3940_v52 }
0x1374   :  { %v3944_v53 = vmul.f32 %v3942_v59, %v3942_v59 }
0x1376   :  { %v3948_v54 = vsel %vm106_vm1, %v3944_v53, 0.0 }
0x1377   :  { %3949 = vadd.xlane.f32.xlu1 %v3948_v54 }
0x13da   :  { %v3947_v47 = vpop.xlane.xlu2 %3946 }
0x13db   :  { %v3951_v24 = vmul.f32 %v3947_v47, %v5511_v34  ;;  %v4119_v47 = vld [vmem:[%s6242_s4 + $0x2e0] sm:$0xff] }
0x13dd   :  { %v3953_v17 = vadd.f32 1e-05, %v3951_v24  ;;  %v4118_v24 = vld [vmem:[%s6242_s4 + $0x2d8] sm:$0xff] }
0x13df   :  { %4618 = vrsqrt.f32 %v3953_v17  ;;  %vm3961_vm10 = vweird.f32 %v3953_v17 }
0x13e5   :  { %v4619_v18 = vpop.eup %4618 }
0x13e6   :  { %v3956_v8 = vmul.f32 %v4619_v18, %v3953_v17  ;;  %vm3962_vm9 = vweird.f32 %v4619_v18  ;;  %v4117_v17 = vld [vmem:[%s6242_s4 + $0x2d0] sm:$0xff] }
0x13e7   :  { %vm3963_vm11 = vmor %vm3961_vm10, %vm3962_vm9 }
0x13e8   :  { %v3957_v19 = vmul.f32 %v4619_v18, %v3956_v8 }
0x13ea   :  { %v3958_v4 = vmul.f32 0.5, %v3957_v19  ;;  %v3950_v62 = vpop.xlane.xlu1 %3949 }
0x13eb   :  { %v3952_v6 = vmul.f32 %v3950_v62, %v5511_v34 }
0x13ec   :  { %v3959_v49 = vsub.f32 1.5, %v3958_v4 }
0x13ed   :  { %v3954_v38 = vadd.f32 1e-05, %v3952_v6 }
0x13ee   :  { %v3960_v9 = vmul.f32 %v4619_v18, %v3959_v49 }
0x13ef   :  { %4620 = vrsqrt.f32 %v3954_v38  ;;  %vm3971_vm13 = vweird.f32 %v3954_v38 }
0x13f0   :  { %v3964_v30 = vsel %vm3963_vm11, %v4619_v18, %v3960_v9 }
0x13f1   :  { %v3975_v32 = vmul.f32 %v3964_v30, %v3941_v44 }
0x13f3   :  { %v3978_v40 = vmul.f32 %v4533_v11, %v3975_v32 }
0x13f5   :  { %v4621_v50 = vpop.eup %4620  ;;  %v3981_v23 = vadd.f32 %v4534_v58, %v3978_v40 }
0x13f6   :  { %v3966_v21 = vmul.f32 %v4621_v50, %v3954_v38  ;;  %vm3972_vm12 = vweird.f32 %v4621_v50 }
0x13f7   :  { %4440 = vmatmul.msk.f32.vlgmr.msrb.gmra.mxu3 %vm106_vm1, %v3981_v23  ;;  %vm3973_vm15 = vmor %vm3971_vm13, %vm3972_vm12 }
0x13f8   :  { %v3967_v46 = vmul.f32 %v4621_v50, %v3966_v21 }
0x13fa   :  { %v3968_v48 = vmul.f32 0.5, %v3967_v46 }
0x13fc   :  { %v3969_v22 = vsub.f32 1.5, %v3968_v48 }
0x13fe   :  { %v3970_v3 = vmul.f32 %v4621_v50, %v3969_v22 }
0x1400   :  { %v3974_v41 = vsel %vm3973_vm15, %v4621_v50, %v3970_v3 }
0x1401   :  { %v3976_v29 = vmul.f32 %v3974_v41, %v3942_v59 }
0x1403   :  { %v3979_v0 = vmul.f32 %v4533_v11, %v3976_v29  ;;  %v4538_v11 = vld [vmem:[%s6243_s5 + $0x4] ss:$0 sm:$0xff]  ;;  %v4539_v29 = vld [vmem:[%s6243_s5 + $0x5] ss:$0 sm:$0xff]  ;;  %s4674_s5 = smov 32  }
0x1405   :  { %v3982_v63 = vadd.f32 %v4534_v58, %v3979_v0 }
0x1407   :  { %4441 = vmatmul.msk.f32.gmra.mxu3 %vm106_vm1, %v3982_v63 }
0x147a   :  { %v4012_v7 = vpop.f32.mrf.mxu3 }
0x147b   :  { %v4013_v39 = vadd.f32 %v4535_v27, %v4012_v7 }
0x147d   :  { %v4018_v36 = vmax.f32 %v4013_v39, 0.0 }
0x147f   :  { %4442 = vmatmul.msk.f32.vlgmr.msrb.gmra.mxu0 %vm2958_vm14, %v4018_v36 }
0x148a   :  { %v4015_v16 = vpop.f32.mrf.mxu3 }
0x148b   :  { %v4016_v14 = vadd.f32 %v4535_v27, %v4015_v16 }
0x148d   :  { %v4019_v15 = vmax.f32 %v4016_v14, 0.0 }
0x148f   :  { %4443 = vmatmul.msk.f32.gmra.mxu0 %vm2958_vm14, %v4019_v15 }
0x14fc   :  { %v4051_v1 = vpop.f32.mrf.mxu0 }
0x14fd   :  { %v4057_v42 = vadd.f32 %v4051_v1, %v6115_v33 }
0x14ff   :  { %v4061_v56 = vadd.f32 %v4536_v20, %v4057_v42 }
0x1501   :  { %v4065_v45 = vsel %vm106_vm1, %v4061_v56, 0.0 }
0x1502   :  { %4066 = vadd.xlane.f32.xlu0 %v4065_v45 }
0x150c   :  { %v4054_v2 = vpop.f32.mrf.mxu0 }
0x150d   :  { %v4058_v44 = vadd.f32 %v4054_v2, %v6120_v55  ;;  %v4120_v55 = vld [vmem:[%s6242_s4 + $0x2e8] sm:$0xff] }
0x150e   :  { %4141 = vmatpush.msrb.mxu1 %v4120_v55 }
0x150f   :  { %v4062_v26 = vadd.f32 %v4536_v20, %v4058_v44 }
0x1510   :  { %4142 = vmatpush.msrb.mxu1 %v4119_v47 }
0x1511   :  { %v4068_v51 = vsel %vm106_vm1, %v4062_v26, 0.0 }
0x1512   :  { %4069 = vadd.xlane.f32.xlu1 %v4068_v51  ;;  %4143 = vmatpush.msrb.mxu1 %v4118_v24 }
0x1514   :  { %4144 = vmatpush.msrb.mxu1 %v4117_v17 }
0x1575   :  { %v4067_v43 = vpop.xlane.xlu0 %4066 }
0x1576   :  { %v4071_v52 = vmul.f32 %v4067_v43, %v5511_v34 }
0x1578   :  { %v4073_v59 = vsub.f32 %v4061_v56, %v4071_v52 }
0x157a   :  { %v4075_v53 = vmul.f32 %v4073_v59, %v4073_v59 }
0x157c   :  { %v4077_v54 = vsel %vm106_vm1, %v4075_v53, 0.0 }
0x157d   :  { %4078 = vadd.xlane.f32.xlu2 %v4077_v54 }
0x1585   :  { %v4070_v33 = vpop.xlane.xlu1 %4069 }
0x1586   :  { %v4072_v37 = vmul.f32 %v4070_v33, %v5511_v34 }
0x1588   :  { %v4074_v57 = vsub.f32 %v4062_v26, %v4072_v37 }
0x158a   :  { %v4076_v60 = vmul.f32 %v4074_v57, %v4074_v57 }
0x158c   :  { %v4080_v35 = vsel %vm106_vm1, %v4076_v60, 0.0 }
0x158d   :  { %4081 = vadd.xlane.f32.xlu0 %v4080_v35 }
0x15f0   :  { %v4079_v18 = vpop.xlane.xlu2 %4078 }
0x15f1   :  { %v4083_v8 = vmul.f32 %v4079_v18, %v5511_v34 }
0x15f3   :  { %v4085_v61 = vadd.f32 1e-05, %v4083_v8 }
0x15f5   :  { %4622 = vrsqrt.f32 %v4085_v61  ;;  %vm4093_vm0 = vweird.f32 %v4085_v61 }
0x15fb   :  { %v4623_v25 = vpop.eup %4622 }
0x15fc   :  { %v4088_v19 = vmul.f32 %v4623_v25, %v4085_v61  ;;  %vm4094_vm14 = vweird.f32 %v4623_v25 }
0x15fd   :  { %vm4095_vm2 = vmor %vm4093_vm0, %vm4094_vm14 }
0x15fe   :  { %v4089_v5 = vmul.f32 %v4623_v25, %v4088_v19 }
0x1600   :  { %v4090_v4 = vmul.f32 0.5, %v4089_v5  ;;  %v4082_v62 = vpop.xlane.xlu0 %4081 }
0x1601   :  { %v4084_v6 = vmul.f32 %v4082_v62, %v5511_v34 }
0x1602   :  { %v4091_v10 = vsub.f32 1.5, %v4090_v4 }
0x1603   :  { %v4086_v49 = vadd.f32 1e-05, %v4084_v6 }
0x1604   :  { %v4092_v38 = vmul.f32 %v4623_v25, %v4091_v10 }
0x1605   :  { %4624 = vrsqrt.f32 %v4086_v49  ;;  %vm4103_vm4 = vweird.f32 %v4086_v49 }
0x1606   :  { %v4096_v9 = vsel %vm4095_vm2, %v4623_v25, %v4092_v38 }
0x1607   :  { %v4107_v30 = vmul.f32 %v4096_v9, %v4073_v59 }
0x1609   :  { %v4110_v58 = vmul.f32 %v4537_v31, %v4107_v30 }
0x160b   :  { %v4625_v32 = vpop.eup %4624  ;;  %v4113_v34 = vadd.f32 %v4538_v11, %v4110_v58 }
0x160c   :  { %v4098_v40 = vmul.f32 %v4625_v32, %v4086_v49  ;;  %vm4104_vm3 = vweird.f32 %v4625_v32 }
0x160d   :  { %4115 = vst.msk [vmem:[%s6244_s6] sm:$0xff] %vm106_vm1, %v4113_v34  ;;  %4444 = vmatmul.msk.f32.vlgmr.msrb.gmra.mxu1 %vm106_vm1, %v4113_v34  ;;  %vm4105_vm5 = vmor %vm4103_vm4, %vm4104_vm3 }
0x160e   :  { %v4099_v50 = vmul.f32 %v4625_v32, %v4098_v40 }
0x1610   :  { %v4100_v23 = vmul.f32 0.5, %v4099_v50 }
0x1612   :  { %v4101_v21 = vsub.f32 1.5, %v4100_v23 }
0x1614   :  { %v4102_v46 = vmul.f32 %v4625_v32, %v4101_v21 }
0x1616   :  { %v4106_v48 = vsel %vm4105_vm5, %v4625_v32, %v4102_v46 }
0x1617   :  { %v4108_v22 = vmul.f32 %v4106_v48, %v4074_v57 }
0x1619   :  { %v4111_v3 = vmul.f32 %v4537_v31, %v4108_v22 }
0x161b   :  { %v4114_v41 = vadd.f32 %v4538_v11, %v4111_v3 }
0x161d   :  { %4445 = vmatmul.msk.f32.gmra.mxu1 %vm106_vm1, %v4114_v41  ;;  %4116 = vst.msk [vmem:[%s6244_s6 + $0x8] sm:$0xff] %vm106_vm1, %v4114_v41  ;;  %vm4185_vm1 = vcmask 589056  }
0x168a   :  { %v4146_v0 = vpop.f32.mrf.mxu1 }
0x168b   :  { %v4147_v63 = vadd.f32 %v4539_v29, %v4146_v0 }
0x168d   :  { %v4153_v12 = vsel %vm4152_vm6, %v4147_v63, -inf }
0x168e   :  { %4154 = vmax.xlane.f32.xlu1 %v4153_v12 }
0x169a   :  { %v4149_v28 = vpop.f32.mrf.mxu1 }
0x169b   :  { %v4150_v13 = vadd.f32 %v4539_v29, %v4149_v28 }
0x169d   :  { %v4156_v27 = vsel %vm4152_vm6, %v4150_v13, -inf }
0x169e   :  { %4157 = vmax.xlane.f32.xlu2 %v4156_v27 }
0x1701   :  { %v4155_v7 = vpop.xlane.xlu1 %4154 }
0x1702   :  { %v4159_v39 = vsub.f32 %v4147_v63, %v4155_v7 }
0x1704   :  { %v4161_v36 = vmul.f32 1.442695, %v4159_v39 }
0x1706   :  { %4626 = vpow2.f32 %v4161_v36 }
0x170c   :  { %v4627_v16 = vpop.eup %4626 }
0x170d   :  { %v4165_v14 = vsel %vm4152_vm6, %v4627_v16, 0.0 }
0x170e   :  { %4166 = vadd.xlane.f32.xlu0 %v4165_v14 }
0x1711   :  { %v4158_v15 = vpop.xlane.xlu2 %4157 }
0x1712   :  { %v4160_v20 = vsub.f32 %v4150_v13, %v4158_v15 }
0x1714   :  { %v4163_v1 = vmul.f32 1.442695, %v4160_v20 }
0x1716   :  { %4628 = vpow2.f32 %v4163_v1 }
0x171c   :  { %v4629_v42 = vpop.eup %4628 }
0x171d   :  { %v4168_v56 = vsel %vm4152_vm6, %v4629_v42, 0.0 }
0x171e   :  { %4169 = vadd.xlane.f32.xlu1 %v4168_v56 }
0x1781   :  { %v4167_v45 = vpop.xlane.xlu0 %4166 }
0x1782   :  { %4630 = vlog2.f32 %v4167_v45 }
0x1788   :  { %v4631_v2 = vpop.eup %4630 }
0x1789   :  { %v4172_v44 = vmul.f32 0.6931472, %v4631_v2 }
0x178b   :  { %v4175_v26 = vsub.f32 %v4159_v39, %v4172_v44 }
0x178d   :  { %4179 = vrot.lane.b32.xlu2 %v4175_v26, %s4674_s5 }
0x1791   :  { %v4170_v51 = vpop.xlane.xlu1 %4169 }
0x1792   :  { %4632 = vlog2.f32 %v4170_v51 }
0x1798   :  { %v4633_v43 = vpop.eup %4632 }
0x1799   :  { %v4174_v52 = vmul.f32 0.6931472, %v4633_v43 }
0x179b   :  { %v4176_v59 = vsub.f32 %v4160_v20, %v4174_v52 }
0x179d   :  { %4181 = vrot.lane.b32.xlu0 %v4176_v59, %s4674_s5 }
0x17e7   :  { %v4180_v53 = vpop.permute.xlu2 %4179 }
0x17e8   :  { %4186 = vst.msk [vmem:[%s6244_s6] sm:$0xff] %vm4185_vm1, %v4180_v53 }
0x180f   :  { %v4182_v54 = vpop.permute.xlu0 %4181 }
0x1810   :  { %4187 = vst.msk [vmem:[%s6244_s6 + $0x8] sm:$0xff] %vm4185_vm1, %v4182_v54 }
0x1811   :  { %4666 = dma.done.wait [#allocation3], 2048  }
0x1812   :  { %4667 = vsyncadd [#allocation3], 4294965248 }
0x1813   :  { %4209 = vsyncpa [#allocation3], 1 }

</bundles_post_ra>
